<compile_context>
chip_gen: v6e
topology: v6e:2x2x1
jax: 0.10.0
libtpu: 0.0.40
codegen_flags: <defaults>
</compile_context>

<pallas_src>
import math

import jax
import jax.numpy as jnp
from jax.experimental import pallas as pl
from jax.experimental.pallas import tpu as pltpu

# --- model hyper-parameters (small, consistent with the module) ---
HID = 32            # hid_dim
N_HEADS = 4         # n_heads
HEAD_DIM = HID // N_HEADS
PF_DIM = 64         # pf_dim
N_LAYERS = 2        # n_layers
OUTPUT_DIM = 50     # output_dim (vocab)
OUT_PAD = 64        # fc_out padded to a lane-friendlier width
MAX_LENGTH = 100    # max_length
LN_EPS = 1e-5       # torch.nn.LayerNorm default eps
INV_ATTN_SCALE = 1.0 / math.sqrt(HEAD_DIM)   # MHA scale = sqrt(head_dim)
EMB_SCALE = math.sqrt(HID)                   # Decoder embedding scale = sqrt(hid_dim)


# ----------------------------- in-kernel helpers -----------------------------
def _layernorm(x, g, b):
    mu = jnp.mean(x, axis=-1, keepdims=True)
    var = jnp.mean((x - mu) ** 2, axis=-1, keepdims=True)
    return (x - mu) * jax.lax.rsqrt(var + LN_EPS) * g + b


def _split_heads(x):
    # (T, HID) -> (H, T, HEAD_DIM): lane slices stacked along a new leading dim
    return jnp.concatenate(
        [x[:, h * HEAD_DIM:(h + 1) * HEAD_DIM][None, :, :] for h in range(N_HEADS)],
        axis=0)


def _merge_heads(x):
    # (H, T, HEAD_DIM) -> (T, HID)
    return jnp.concatenate([x[h] for h in range(N_HEADS)], axis=-1)


def _attention(q, k, v, mask3, wo, bo):
    """Multi-head attention, all heads at once.

    q: (Tq, HID), k/v: (Tk, HID), mask3 broadcastable to (H, Tq, Tk).
    Returns (out (Tq, HID), attn (H, Tq, Tk)).
    """
    qh = _split_heads(q)          # (H, Tq, d)
    kh = _split_heads(k)          # (H, Tk, d)
    vh = _split_heads(v)          # (H, Tk, d)

    e = jnp.einsum('hqd,hkd->hqk', qh, kh,
                   preferred_element_type=jnp.float32) * INV_ATTN_SCALE
    e = jnp.where(mask3 == 0.0, -1e10, e)
    m = jnp.max(e, axis=-1, keepdims=True)
    p = jnp.exp(e - m)
    a = p / jnp.sum(p, axis=-1, keepdims=True)                   # (H, Tq, Tk)
    ctx = jnp.einsum('hqk,hkd->hqd', a, vh,
                     preferred_element_type=jnp.float32)         # (H, Tq, d)
    out = jnp.dot(_merge_heads(ctx), wo,
                  preferred_element_type=jnp.float32) + bo       # (Tq, HID)
    return out, a


# ----------------------------- fused decoder kernel -----------------------------
def _decoder_kernel(x_ref, enc_ref, tmask_ref, smask_ref,
                    wqkv1_ref, bqkv1_ref, wo1_ref, bo1_ref, g1_ref, be1_ref,
                    wqkv2_ref, bqkv2_ref, wo2_ref, bo2_ref, g2_ref, be2_ref,
                    wf1_ref, bf1_ref, wf2_ref, bf2_ref, g3_ref, be3_ref,
                    wout_ref, bout_ref,
                    logits_ref, attn_ref):
    x = x_ref[...]                          # (T, HID)
    enc = enc_ref[...]                      # (S, HID)
    tmask = tmask_ref[...][None, :, :]      # (1, T, T)
    smask = smask_ref[...][None, :, :]      # (1, 1, S)

    for l in range(N_LAYERS):
        # ---- self attention (fused QKV) + residual + layernorm ----
        qkv = jnp.dot(x, wqkv1_ref[l],
                      preferred_element_type=jnp.float32) + bqkv1_ref[l]
        q, k, v = qkv[:, :HID], qkv[:, HID:2 * HID], qkv[:, 2 * HID:]
        sa, _ = _attention(q, k, v, tmask, wo1_ref[l], bo1_ref[l])
        x = _layernorm(x + sa, g1_ref[l], be1_ref[l])

        # ---- encoder (cross) attention + residual + layernorm ----
        wqkv2 = wqkv2_ref[l]
        bqkv2 = bqkv2_ref[l]
        q = jnp.dot(x, wqkv2[:, :HID],
                    preferred_element_type=jnp.float32) + bqkv2[:, :HID]
        kv = jnp.dot(enc, wqkv2[:, HID:],
                     preferred_element_type=jnp.float32) + bqkv2[:, HID:]
        k, v = kv[:, :HID], kv[:, HID:]
        ca, a_cross = _attention(q, k, v, smask, wo2_ref[l], bo2_ref[l])
        x = _layernorm(x + ca, g2_ref[l], be2_ref[l])

        # ---- position-wise feed-forward + residual + layernorm ----
        h = jnp.dot(x, wf1_ref[l], preferred_element_type=jnp.float32) + bf1_ref[l]
        h = jnp.maximum(h, 0.0)
        ff = jnp.dot(h, wf2_ref[l], preferred_element_type=jnp.float32) + bf2_ref[l]
        x = _layernorm(x + ff, g3_ref[l], be3_ref[l])

        if l == N_LAYERS - 1:               # only the last layer's attn is returned
            attn_ref[...] = a_cross

    # ---- fused final projection (padded to OUT_PAD lanes) ----
    logits_ref[...] = (jnp.dot(x, wout_ref[...],
                               preferred_element_type=jnp.float32) + bout_ref[...])


# ----------------------------- full decoder forward -----------------------------
def decoder_forward(trg_ids, enc_src, trg_mask, src_mask, params):
    B, T = trg_ids.shape
    S = enc_src.shape[1]

    pos = jnp.arange(T)
    x = (params['tok_emb'][trg_ids] * EMB_SCALE
         + params['pos_emb'][pos][None, :, :]).astype(jnp.float32)

    tmask = trg_mask.astype(jnp.float32)                     # (B, T, T)
    smask = src_mask.astype(jnp.float32).reshape(B, 1, S)    # (B, 1, S)

    p = params
    args = (x, enc_src.astype(jnp.float32), tmask, smask,
            p['wqkv1'], p['bqkv1'], p['wo1'], p['bo1'], p['g1'], p['be1'],
            p['wqkv2'], p['bqkv2'], p['wo2'], p['bo2'], p['g2'], p['be2'],
            p['wf1'], p['bf1'], p['wf2'], p['bf2'], p['g3'], p['be3'],
            p['fc_out_w_pad'], p['fc_out_b_pad'])

    def batch_spec(shape):
        n = len(shape)
        return pl.BlockSpec((None,) + shape, lambda b, _n=n: (b,) + (0,) * _n)

    def full_spec(shape):
        n = len(shape)
        return pl.BlockSpec(shape, lambda b, _n=n: (0,) * _n)

    in_specs = [batch_spec((T, HID)), batch_spec((S, HID)),
                batch_spec((T, T)), batch_spec((1, S))]
    in_specs += [full_spec(a.shape) for a in args[4:]]

    out_specs = (batch_spec((T, OUT_PAD)),
                 batch_spec((N_HEADS, T, S)))

    logits_pad, attn = pl.pallas_call(
        _decoder_kernel,
        out_shape=(jax.ShapeDtypeStruct((B, T, OUT_PAD), jnp.float32),
                   jax.ShapeDtypeStruct((B, N_HEADS, T, S), jnp.float32)),
        grid=(B,),
        in_specs=in_specs,
        out_specs=out_specs,
        compiler_params=pltpu.CompilerParams(
            dimension_semantics=("parallel",)),
    )(*args)

    return logits_pad[..., :OUTPUT_DIM], attn


# ----------------------------- deterministic parameter init -----------------------------
def init_params(key):
    def dense(k, din, dout):
        kw, kb = jax.random.split(k)
        w = jax.random.normal(kw, (din, dout), jnp.float32) * 0.05
        b = jax.random.normal(kb, (dout,), jnp.float32) * 0.05
        return w, b.reshape(1, dout)

    keys = jax.random.split(key, 3 + N_LAYERS)
    params = {
        'tok_emb': jax.random.normal(keys[0], (OUTPUT_DIM, HID), jnp.float32) * 0.05,
        'pos_emb': jax.random.normal(keys[1], (MAX_LENGTH, HID), jnp.float32) * 0.05,
    }
    fw, fb = dense(keys[2], HID, OUTPUT_DIM)
    params['fc_out_w_pad'] = jnp.zeros((HID, OUT_PAD), jnp.float32).at[:, :OUTPUT_DIM].set(fw)
    params['fc_out_b_pad'] = jnp.zeros((1, OUT_PAD), jnp.float32).at[:, :OUTPUT_DIM].set(fb)

    acc = {name: [] for name in
           ('wqkv1', 'bqkv1', 'wo1', 'bo1', 'g1', 'be1',
            'wqkv2', 'bqkv2', 'wo2', 'bo2', 'g2', 'be2',
            'wf1', 'bf1', 'wf2', 'bf2', 'g3', 'be3')}

    for i in range(N_LAYERS):
        lk = jax.random.split(keys[3 + i], 10)
        wq1, bq1 = dense(lk[0], HID, HID)
        wk1, bk1 = dense(lk[1], HID, HID)
        wv1, bv1 = dense(lk[2], HID, HID)
        wo1, bo1 = dense(lk[3], HID, HID)
        wq2, bq2 = dense(lk[4], HID, HID)
        wk2, bk2 = dense(lk[5], HID, HID)
        wv2, bv2 = dense(lk[6], HID, HID)
        wo2, bo2 = dense(lk[7], HID, HID)
        wf1, bf1 = dense(lk[8], HID, PF_DIM)
        wf2, bf2 = dense(lk[9], PF_DIM, HID)

        acc['wqkv1'].append(jnp.concatenate([wq1, wk1, wv1], axis=1))
        acc['bqkv1'].append(jnp.concatenate([bq1, bk1, bv1], axis=1))
        acc['wo1'].append(wo1); acc['bo1'].append(bo1)
        acc['wqkv2'].append(jnp.concatenate([wq2, wk2, wv2], axis=1))
        acc['bqkv2'].append(jnp.concatenate([bq2, bk2, bv2], axis=1))
        acc['wo2'].append(wo2); acc['bo2'].append(bo2)
        acc['wf1'].append(wf1); acc['bf1'].append(bf1)
        acc['wf2'].append(wf2); acc['bf2'].append(bf2)
        for n in ('1', '2', '3'):
            acc['g' + n].append(jnp.ones((1, HID), jnp.float32))
            acc['be' + n].append(jnp.zeros((1, HID), jnp.float32))

    for name, vals in acc.items():
        params[name] = jnp.stack(vals, axis=0)
    return params


if __name__ == "__main__":
    key = jax.random.PRNGKey(0)
    kp, kt, ke = jax.random.split(key, 3)
    params = init_params(kp)

    B, T, S = 2, 8, 12
    trg_ids = jax.random.randint(kt, (B, T), 0, OUTPUT_DIM)
    enc_src = jax.random.normal(ke, (B, S, HID), jnp.float32)

    # causal target mask (B, T, T) and source pad mask (B, S) (last 2 positions padded)
    trg_mask = jnp.tile(jnp.tril(jnp.ones((T, T), jnp.float32))[None], (B, 1, 1))
    src_mask = jnp.ones((B, S), jnp.float32).at[:, S - 2:].set(0.0)

    fwd = jax.jit(decoder_forward)
    logits, attn = fwd(trg_ids, enc_src, trg_mask, src_mask, params)
    jax.block_until_ready((logits, attn))

    assert logits.shape == (B, T, OUTPUT_DIM)
    assert attn.shape == (B, N_HEADS, T, S)
    assert bool(jnp.all(jnp.isfinite(logits)))
    assert bool(jnp.all(jnp.isfinite(attn)))
    print("KERNEL_OK")
</pallas_src>

<mosaic_0001>
module attributes {stable_mosaic.version = 11 : i64} {
  func.func @_decoder_kernel(%arg0: i32, %arg1: memref<1x8x32xf32, #tpu.memory_space<vmem>>, %arg2: memref<1x12x32xf32, #tpu.memory_space<vmem>>, %arg3: memref<1x8x8xf32, #tpu.memory_space<vmem>>, %arg4: memref<1x1x12xf32, #tpu.memory_space<vmem>>, %arg5: memref<2x32x96xf32, #tpu.memory_space<vmem>>, %arg6: memref<2x1x96xf32, #tpu.memory_space<vmem>>, %arg7: memref<2x32x32xf32, #tpu.memory_space<vmem>>, %arg8: memref<2x1x32xf32, #tpu.memory_space<vmem>>, %arg9: memref<2x1x32xf32, #tpu.memory_space<vmem>>, %arg10: memref<2x1x32xf32, #tpu.memory_space<vmem>>, %arg11: memref<2x32x96xf32, #tpu.memory_space<vmem>>, %arg12: memref<2x1x96xf32, #tpu.memory_space<vmem>>, %arg13: memref<2x32x32xf32, #tpu.memory_space<vmem>>, %arg14: memref<2x1x32xf32, #tpu.memory_space<vmem>>, %arg15: memref<2x1x32xf32, #tpu.memory_space<vmem>>, %arg16: memref<2x1x32xf32, #tpu.memory_space<vmem>>, %arg17: memref<2x32x64xf32, #tpu.memory_space<vmem>>, %arg18: memref<2x1x64xf32, #tpu.memory_space<vmem>>, %arg19: memref<2x64x32xf32, #tpu.memory_space<vmem>>, %arg20: memref<2x1x32xf32, #tpu.memory_space<vmem>>, %arg21: memref<2x1x32xf32, #tpu.memory_space<vmem>>, %arg22: memref<2x1x32xf32, #tpu.memory_space<vmem>>, %arg23: memref<32x64xf32, #tpu.memory_space<vmem>>, %arg24: memref<1x64xf32, #tpu.memory_space<vmem>>, %arg25: memref<1x8x64xf32, #tpu.memory_space<vmem>>, %arg26: memref<1x4x8x12xf32, #tpu.memory_space<vmem>>) attributes {dimension_semantics = [#tpu.dimension_semantics<parallel>], iteration_bounds = array<i64: 2>, scalar_prefetch = 0 : i64, scratch_operands = 0 : i64, tpu.core_type = #tpu.core_type<tc>, window_params = [{transform_indices = @transform_0, window_bounds = array<i64: 1, 8, 32>}, {transform_indices = @transform_1, window_bounds = array<i64: 1, 12, 32>}, {transform_indices = @transform_2, window_bounds = array<i64: 1, 8, 8>}, {transform_indices = @transform_3, window_bounds = array<i64: 1, 1, 12>}, {pipeline_mode = #tpu.pipeline_mode<synchronous>, transform_indices = @transform_4, window_bounds = array<i64: 2, 32, 96>}, {pipeline_mode = #tpu.pipeline_mode<synchronous>, transform_indices = @transform_5, window_bounds = array<i64: 2, 1, 96>}, {pipeline_mode = #tpu.pipeline_mode<synchronous>, transform_indices = @transform_6, window_bounds = array<i64: 2, 32, 32>}, {pipeline_mode = #tpu.pipeline_mode<synchronous>, transform_indices = @transform_7, window_bounds = array<i64: 2, 1, 32>}, {pipeline_mode = #tpu.pipeline_mode<synchronous>, transform_indices = @transform_8, window_bounds = array<i64: 2, 1, 32>}, {pipeline_mode = #tpu.pipeline_mode<synchronous>, transform_indices = @transform_9, window_bounds = array<i64: 2, 1, 32>}, {pipeline_mode = #tpu.pipeline_mode<synchronous>, transform_indices = @transform_10, window_bounds = array<i64: 2, 32, 96>}, {pipeline_mode = #tpu.pipeline_mode<synchronous>, transform_indices = @transform_11, window_bounds = array<i64: 2, 1, 96>}, {pipeline_mode = #tpu.pipeline_mode<synchronous>, transform_indices = @transform_12, window_bounds = array<i64: 2, 32, 32>}, {pipeline_mode = #tpu.pipeline_mode<synchronous>, transform_indices = @transform_13, window_bounds = array<i64: 2, 1, 32>}, {pipeline_mode = #tpu.pipeline_mode<synchronous>, transform_indices = @transform_14, window_bounds = array<i64: 2, 1, 32>}, {pipeline_mode = #tpu.pipeline_mode<synchronous>, transform_indices = @transform_15, window_bounds = array<i64: 2, 1, 32>}, {pipeline_mode = #tpu.pipeline_mode<synchronous>, transform_indices = @transform_16, window_bounds = array<i64: 2, 32, 64>}, {pipeline_mode = #tpu.pipeline_mode<synchronous>, transform_indices = @transform_17, window_bounds = array<i64: 2, 1, 64>}, {pipeline_mode = #tpu.pipeline_mode<synchronous>, transform_indices = @transform_18, window_bounds = array<i64: 2, 64, 32>}, {pipeline_mode = #tpu.pipeline_mode<synchronous>, transform_indices = @transform_19, window_bounds = array<i64: 2, 1, 32>}, {pipeline_mode = #tpu.pipeline_mode<synchronous>, transform_indices = @transform_20, window_bounds = array<i64: 2, 1, 32>}, {pipeline_mode = #tpu.pipeline_mode<synchronous>, transform_indices = @transform_21, window_bounds = array<i64: 2, 1, 32>}, {pipeline_mode = #tpu.pipeline_mode<synchronous>, transform_indices = @transform_22, window_bounds = array<i64: 32, 64>}, {pipeline_mode = #tpu.pipeline_mode<synchronous>, transform_indices = @transform_23, window_bounds = array<i64: 1, 64>}, {transform_indices = @transform_24, window_bounds = array<i64: 1, 8, 64>}, {transform_indices = @transform_25, window_bounds = array<i64: 1, 4, 8, 12>}]} {
    %c0 = arith.constant 0 : index
    %c0_0 = arith.constant 0 : index
    %c0_1 = arith.constant 0 : index
    %0 = vector.load %arg1[%c0, %c0_0, %c0_1] : memref<1x8x32xf32, #tpu.memory_space<vmem>>, vector<1x8x32xf32>
    %1 = vector.shape_cast %0 : vector<1x8x32xf32> to vector<8x32xf32>
    %c0_2 = arith.constant 0 : index
    %c0_3 = arith.constant 0 : index
    %c0_4 = arith.constant 0 : index
    %2 = vector.load %arg2[%c0_2, %c0_3, %c0_4] : memref<1x12x32xf32, #tpu.memory_space<vmem>>, vector<1x12x32xf32>
    %3 = vector.shape_cast %2 : vector<1x12x32xf32> to vector<12x32xf32>
    %c0_5 = arith.constant 0 : index
    %c0_6 = arith.constant 0 : index
    %c0_7 = arith.constant 0 : index
    %4 = vector.load %arg3[%c0_5, %c0_6, %c0_7] : memref<1x8x8xf32, #tpu.memory_space<vmem>>, vector<1x8x8xf32>
    %5 = vector.shape_cast %4 : vector<1x8x8xf32> to vector<8x8xf32>
    %6 = vector.shape_cast %5 : vector<8x8xf32> to vector<1x8x8xf32>
    %c0_8 = arith.constant 0 : index
    %c0_9 = arith.constant 0 : index
    %c0_10 = arith.constant 0 : index
    %7 = vector.load %arg4[%c0_8, %c0_9, %c0_10] : memref<1x1x12xf32, #tpu.memory_space<vmem>>, vector<1x1x12xf32>
    %8 = vector.shape_cast %7 : vector<1x1x12xf32> to vector<1x12xf32>
    %9 = vector.shape_cast %8 : vector<1x12xf32> to vector<1x1x12xf32>
    %c0_11 = arith.constant 0 : index
    %c0_12 = arith.constant 0 : index
    %c0_13 = arith.constant 0 : index
    %10 = vector.load %arg5[%c0_11, %c0_12, %c0_13] : memref<2x32x96xf32, #tpu.memory_space<vmem>>, vector<1x32x96xf32>
    %11 = vector.shape_cast %10 : vector<1x32x96xf32> to vector<32x96xf32>
    %cst = arith.constant dense<0.000000e+00> : vector<8x96xf32>
    %12 = tpu.matmul %1, %11, %cst {dimension_numbers = #tpu.dot_dimension_numbers<[1], [0], [0], [1], [0, 0, 1, 1], [], []>} : vector<8x32xf32>, vector<32x96xf32>, vector<8x96xf32> -> vector<8x96xf32>
    %c0_14 = arith.constant 0 : index
    %c0_15 = arith.constant 0 : index
    %c0_16 = arith.constant 0 : index
    %13 = vector.load %arg6[%c0_14, %c0_15, %c0_16] : memref<2x1x96xf32, #tpu.memory_space<vmem>>, vector<1x1x96xf32>
    %14 = vector.shape_cast %13 : vector<1x1x96xf32> to vector<1x96xf32>
    %15 = vector.broadcast %14 : vector<1x96xf32> to vector<8x96xf32>
    %16 = arith.addf %12, %15 : vector<8x96xf32>
    %17 = vector.extract_strided_slice %16 {offsets = [0, 0], sizes = [8, 32], strides = [1, 1]} : vector<8x96xf32> to vector<8x32xf32>
    %18 = vector.extract_strided_slice %16 {offsets = [0, 32], sizes = [8, 32], strides = [1, 1]} : vector<8x96xf32> to vector<8x32xf32>
    %19 = vector.extract_strided_slice %16 {offsets = [0, 64], sizes = [8, 32], strides = [1, 1]} : vector<8x96xf32> to vector<8x32xf32>
    %c0_17 = arith.constant 0 : index
    %c0_18 = arith.constant 0 : index
    %c0_19 = arith.constant 0 : index
    %20 = vector.load %arg7[%c0_17, %c0_18, %c0_19] : memref<2x32x32xf32, #tpu.memory_space<vmem>>, vector<1x32x32xf32>
    %21 = vector.shape_cast %20 : vector<1x32x32xf32> to vector<32x32xf32>
    %c0_20 = arith.constant 0 : index
    %c0_21 = arith.constant 0 : index
    %c0_22 = arith.constant 0 : index
    %22 = vector.load %arg8[%c0_20, %c0_21, %c0_22] : memref<2x1x32xf32, #tpu.memory_space<vmem>>, vector<1x1x32xf32>
    %23 = vector.shape_cast %22 : vector<1x1x32xf32> to vector<1x32xf32>
    %24 = vector.extract_strided_slice %17 {offsets = [0, 0], sizes = [8, 8], strides = [1, 1]} : vector<8x32xf32> to vector<8x8xf32>
    %25 = vector.shape_cast %24 : vector<8x8xf32> to vector<1x8x8xf32>
    %26 = vector.extract_strided_slice %17 {offsets = [0, 8], sizes = [8, 8], strides = [1, 1]} : vector<8x32xf32> to vector<8x8xf32>
    %27 = vector.shape_cast %26 : vector<8x8xf32> to vector<1x8x8xf32>
    %28 = vector.extract_strided_slice %17 {offsets = [0, 16], sizes = [8, 8], strides = [1, 1]} : vector<8x32xf32> to vector<8x8xf32>
    %29 = vector.shape_cast %28 : vector<8x8xf32> to vector<1x8x8xf32>
    %30 = vector.extract_strided_slice %17 {offsets = [0, 24], sizes = [8, 8], strides = [1, 1]} : vector<8x32xf32> to vector<8x8xf32>
    %31 = vector.shape_cast %30 : vector<8x8xf32> to vector<1x8x8xf32>
    %32 = tpu.concatenate %25, %27, %29, %31 in 0 : vector<1x8x8xf32>, vector<1x8x8xf32>, vector<1x8x8xf32>, vector<1x8x8xf32> -> vector<4x8x8xf32>
    %33 = vector.extract_strided_slice %18 {offsets = [0, 0], sizes = [8, 8], strides = [1, 1]} : vector<8x32xf32> to vector<8x8xf32>
    %34 = vector.shape_cast %33 : vector<8x8xf32> to vector<1x8x8xf32>
    %35 = vector.extract_strided_slice %18 {offsets = [0, 8], sizes = [8, 8], strides = [1, 1]} : vector<8x32xf32> to vector<8x8xf32>
    %36 = vector.shape_cast %35 : vector<8x8xf32> to vector<1x8x8xf32>
    %37 = vector.extract_strided_slice %18 {offsets = [0, 16], sizes = [8, 8], strides = [1, 1]} : vector<8x32xf32> to vector<8x8xf32>
    %38 = vector.shape_cast %37 : vector<8x8xf32> to vector<1x8x8xf32>
    %39 = vector.extract_strided_slice %18 {offsets = [0, 24], sizes = [8, 8], strides = [1, 1]} : vector<8x32xf32> to vector<8x8xf32>
    %40 = vector.shape_cast %39 : vector<8x8xf32> to vector<1x8x8xf32>
    %41 = tpu.concatenate %34, %36, %38, %40 in 0 : vector<1x8x8xf32>, vector<1x8x8xf32>, vector<1x8x8xf32>, vector<1x8x8xf32> -> vector<4x8x8xf32>
    %42 = vector.extract_strided_slice %19 {offsets = [0, 0], sizes = [8, 8], strides = [1, 1]} : vector<8x32xf32> to vector<8x8xf32>
    %43 = vector.shape_cast %42 : vector<8x8xf32> to vector<1x8x8xf32>
    %44 = vector.extract_strided_slice %19 {offsets = [0, 8], sizes = [8, 8], strides = [1, 1]} : vector<8x32xf32> to vector<8x8xf32>
    %45 = vector.shape_cast %44 : vector<8x8xf32> to vector<1x8x8xf32>
    %46 = vector.extract_strided_slice %19 {offsets = [0, 16], sizes = [8, 8], strides = [1, 1]} : vector<8x32xf32> to vector<8x8xf32>
    %47 = vector.shape_cast %46 : vector<8x8xf32> to vector<1x8x8xf32>
    %48 = vector.extract_strided_slice %19 {offsets = [0, 24], sizes = [8, 8], strides = [1, 1]} : vector<8x32xf32> to vector<8x8xf32>
    %49 = vector.shape_cast %48 : vector<8x8xf32> to vector<1x8x8xf32>
    %50 = tpu.concatenate %43, %45, %47, %49 in 0 : vector<1x8x8xf32>, vector<1x8x8xf32>, vector<1x8x8xf32>, vector<1x8x8xf32> -> vector<4x8x8xf32>
    "tpu.trace_start"() <{level = 10 : i32, message = "hqd,hkd->hqk"}> : () -> ()
    %cst_23 = arith.constant dense<0.000000e+00> : vector<4x8x8xf32>
    %51 = tpu.matmul %32, %41, %cst_23 {dimension_numbers = #tpu.dot_dimension_numbers<[2], [2], [1], [1], [0, 0, 0, 1, 1, 1], [0], [0]>} : vector<4x8x8xf32>, vector<4x8x8xf32>, vector<4x8x8xf32> -> vector<4x8x8xf32>
    "tpu.trace_stop"() : () -> ()
    %cst_24 = arith.constant 0.353553385 : f32
    %52 = vector.broadcast %cst_24 : f32 to vector<4x8x8xf32>
    %53 = arith.mulf %51, %52 : vector<4x8x8xf32>
    %cst_25 = arith.constant 0.000000e+00 : f32
    %54 = vector.broadcast %cst_25 : f32 to vector<1x8x8xf32>
    %55 = arith.cmpf oeq, %6, %54 : vector<1x8x8xf32>
    %cst_26 = arith.constant -1.000000e+10 : f32
    %56 = vector.shape_cast %55 : vector<1x8x8xi1> to vector<1x8x8xi1>
    %57 = vector.broadcast %56 : vector<1x8x8xi1> to vector<4x8x8xi1>
    %58 = vector.broadcast %cst_26 : f32 to vector<4x8x8xf32>
    %59 = arith.select %57, %58, %53 : vector<4x8x8xi1>, vector<4x8x8xf32>
    %cst_27 = arith.constant dense<0xFF800000> : vector<4x8xf32>
    %60 = vector.multi_reduction <maximumf>, %59, %cst_27 [2] : vector<4x8x8xf32> to vector<4x8xf32>
    %61 = vector.shape_cast %60 : vector<4x8xf32> to vector<4x8x1xf32>
    %62 = vector.broadcast %61 : vector<4x8x1xf32> to vector<4x8x8xf32>
    %63 = arith.subf %59, %62 : vector<4x8x8xf32>
    %64 = math.exp %63 : vector<4x8x8xf32>
    %cst_28 = arith.constant dense<0.000000e+00> : vector<4x8xf32>
    %65 = vector.multi_reduction <add>, %64, %cst_28 [2] : vector<4x8x8xf32> to vector<4x8xf32>
    %66 = vector.shape_cast %65 : vector<4x8xf32> to vector<4x8x1xf32>
    %67 = vector.broadcast %66 : vector<4x8x1xf32> to vector<4x8x8xf32>
    %68 = arith.divf %64, %67 : vector<4x8x8xf32>
    "tpu.trace_start"() <{level = 10 : i32, message = "hqk,hkd->hqd"}> : () -> ()
    %cst_29 = arith.constant dense<0.000000e+00> : vector<4x8x8xf32>
    %69 = tpu.matmul %68, %50, %cst_29 {dimension_numbers = #tpu.dot_dimension_numbers<[2], [1], [1], [2], [0, 0, 0, 1, 1, 2], [0], [0]>} : vector<4x8x8xf32>, vector<4x8x8xf32>, vector<4x8x8xf32> -> vector<4x8x8xf32>
    "tpu.trace_stop"() : () -> ()
    %70 = vector.extract_strided_slice %69 {offsets = [0, 0, 0], sizes = [1, 8, 8], strides = [1, 1, 1]} : vector<4x8x8xf32> to vector<1x8x8xf32>
    %71 = vector.shape_cast %70 : vector<1x8x8xf32> to vector<8x8xf32>
    %72 = vector.extract_strided_slice %69 {offsets = [1, 0, 0], sizes = [1, 8, 8], strides = [1, 1, 1]} : vector<4x8x8xf32> to vector<1x8x8xf32>
    %73 = vector.shape_cast %72 : vector<1x8x8xf32> to vector<8x8xf32>
    %74 = vector.extract_strided_slice %69 {offsets = [2, 0, 0], sizes = [1, 8, 8], strides = [1, 1, 1]} : vector<4x8x8xf32> to vector<1x8x8xf32>
    %75 = vector.shape_cast %74 : vector<1x8x8xf32> to vector<8x8xf32>
    %76 = vector.extract_strided_slice %69 {offsets = [3, 0, 0], sizes = [1, 8, 8], strides = [1, 1, 1]} : vector<4x8x8xf32> to vector<1x8x8xf32>
    %77 = vector.shape_cast %76 : vector<1x8x8xf32> to vector<8x8xf32>
    %78 = tpu.concatenate %71, %73, %75, %77 in 1 : vector<8x8xf32>, vector<8x8xf32>, vector<8x8xf32>, vector<8x8xf32> -> vector<8x32xf32>
    %cst_30 = arith.constant dense<0.000000e+00> : vector<8x32xf32>
    %79 = tpu.matmul %78, %21, %cst_30 {dimension_numbers = #tpu.dot_dimension_numbers<[1], [0], [0], [1], [0, 0, 1, 1], [], []>} : vector<8x32xf32>, vector<32x32xf32>, vector<8x32xf32> -> vector<8x32xf32>
    %80 = vector.broadcast %23 : vector<1x32xf32> to vector<8x32xf32>
    %81 = arith.addf %79, %80 : vector<8x32xf32>
    %82 = arith.addf %1, %81 : vector<8x32xf32>
    %c0_31 = arith.constant 0 : index
    %c0_32 = arith.constant 0 : index
    %c0_33 = arith.constant 0 : index
    %83 = vector.load %arg9[%c0_31, %c0_32, %c0_33] : memref<2x1x32xf32, #tpu.memory_space<vmem>>, vector<1x1x32xf32>
    %84 = vector.shape_cast %83 : vector<1x1x32xf32> to vector<1x32xf32>
    %c0_34 = arith.constant 0 : index
    %c0_35 = arith.constant 0 : index
    %c0_36 = arith.constant 0 : index
    %85 = vector.load %arg10[%c0_34, %c0_35, %c0_36] : memref<2x1x32xf32, #tpu.memory_space<vmem>>, vector<1x1x32xf32>
    %86 = vector.shape_cast %85 : vector<1x1x32xf32> to vector<1x32xf32>
    %cst_37 = arith.constant dense<0.000000e+00> : vector<8xf32>
    %87 = vector.multi_reduction <add>, %82, %cst_37 [1] : vector<8x32xf32> to vector<8xf32>
    %88 = vector.shape_cast %87 : vector<8xf32> to vector<8x1xf32>
    %cst_38 = arith.constant 3.200000e+01 : f32
    %89 = vector.broadcast %cst_38 : f32 to vector<8x1xf32>
    %90 = arith.divf %88, %89 : vector<8x1xf32>
    %91 = vector.broadcast %90 : vector<8x1xf32> to vector<8x32xf32>
    %92 = arith.subf %82, %91 : vector<8x32xf32>
    %93 = arith.mulf %92, %92 : vector<8x32xf32>
    %cst_39 = arith.constant dense<0.000000e+00> : vector<8xf32>
    %94 = vector.multi_reduction <add>, %93, %cst_39 [1] : vector<8x32xf32> to vector<8xf32>
    %95 = vector.shape_cast %94 : vector<8xf32> to vector<8x1xf32>
    %cst_40 = arith.constant 3.200000e+01 : f32
    %96 = vector.broadcast %cst_40 : f32 to vector<8x1xf32>
    %97 = arith.divf %95, %96 : vector<8x1xf32>
    %98 = vector.broadcast %90 : vector<8x1xf32> to vector<8x32xf32>
    %99 = arith.subf %82, %98 : vector<8x32xf32>
    %cst_41 = arith.constant 9.99999974E-6 : f32
    %100 = vector.broadcast %cst_41 : f32 to vector<8x1xf32>
    %101 = arith.addf %97, %100 : vector<8x1xf32>
    %102 = math.rsqrt %101 : vector<8x1xf32>
    %103 = vector.broadcast %102 : vector<8x1xf32> to vector<8x32xf32>
    %104 = arith.mulf %99, %103 : vector<8x32xf32>
    %105 = vector.broadcast %84 : vector<1x32xf32> to vector<8x32xf32>
    %106 = arith.mulf %104, %105 : vector<8x32xf32>
    %107 = vector.broadcast %86 : vector<1x32xf32> to vector<8x32xf32>
    %108 = arith.addf %106, %107 : vector<8x32xf32>
    %c0_42 = arith.constant 0 : index
    %c0_43 = arith.constant 0 : index
    %c0_44 = arith.constant 0 : index
    %109 = vector.load %arg11[%c0_42, %c0_43, %c0_44] : memref<2x32x96xf32, #tpu.memory_space<vmem>>, vector<1x32x96xf32>
    %110 = vector.shape_cast %109 : vector<1x32x96xf32> to vector<32x96xf32>
    %c0_45 = arith.constant 0 : index
    %c0_46 = arith.constant 0 : index
    %c0_47 = arith.constant 0 : index
    %111 = vector.load %arg12[%c0_45, %c0_46, %c0_47] : memref<2x1x96xf32, #tpu.memory_space<vmem>>, vector<1x1x96xf32>
    %112 = vector.shape_cast %111 : vector<1x1x96xf32> to vector<1x96xf32>
    %113 = vector.extract_strided_slice %110 {offsets = [0, 0], sizes = [32, 32], strides = [1, 1]} : vector<32x96xf32> to vector<32x32xf32>
    %cst_48 = arith.constant dense<0.000000e+00> : vector<8x32xf32>
    %114 = tpu.matmul %108, %113, %cst_48 {dimension_numbers = #tpu.dot_dimension_numbers<[1], [0], [0], [1], [0, 0, 1, 1], [], []>} : vector<8x32xf32>, vector<32x32xf32>, vector<8x32xf32> -> vector<8x32xf32>
    %115 = vector.extract_strided_slice %112 {offsets = [0, 0], sizes = [1, 32], strides = [1, 1]} : vector<1x96xf32> to vector<1x32xf32>
    %116 = vector.broadcast %115 : vector<1x32xf32> to vector<8x32xf32>
    %117 = arith.addf %114, %116 : vector<8x32xf32>
    %118 = vector.extract_strided_slice %110 {offsets = [0, 32], sizes = [32, 64], strides = [1, 1]} : vector<32x96xf32> to vector<32x64xf32>
    %cst_49 = arith.constant dense<0.000000e+00> : vector<12x64xf32>
    %119 = tpu.matmul %3, %118, %cst_49 {dimension_numbers = #tpu.dot_dimension_numbers<[1], [0], [0], [1], [0, 0, 1, 1], [], []>} : vector<12x32xf32>, vector<32x64xf32>, vector<12x64xf32> -> vector<12x64xf32>
    %120 = vector.extract_strided_slice %112 {offsets = [0, 32], sizes = [1, 64], strides = [1, 1]} : vector<1x96xf32> to vector<1x64xf32>
    %121 = vector.broadcast %120 : vector<1x64xf32> to vector<12x64xf32>
    %122 = arith.addf %119, %121 : vector<12x64xf32>
    %123 = vector.extract_strided_slice %122 {offsets = [0, 0], sizes = [12, 32], strides = [1, 1]} : vector<12x64xf32> to vector<12x32xf32>
    %124 = vector.extract_strided_slice %122 {offsets = [0, 32], sizes = [12, 32], strides = [1, 1]} : vector<12x64xf32> to vector<12x32xf32>
    %c0_50 = arith.constant 0 : index
    %c0_51 = arith.constant 0 : index
    %c0_52 = arith.constant 0 : index
    %125 = vector.load %arg13[%c0_50, %c0_51, %c0_52] : memref<2x32x32xf32, #tpu.memory_space<vmem>>, vector<1x32x32xf32>
    %126 = vector.shape_cast %125 : vector<1x32x32xf32> to vector<32x32xf32>
    %c0_53 = arith.constant 0 : index
    %c0_54 = arith.constant 0 : index
    %c0_55 = arith.constant 0 : index
    %127 = vector.load %arg14[%c0_53, %c0_54, %c0_55] : memref<2x1x32xf32, #tpu.memory_space<vmem>>, vector<1x1x32xf32>
    %128 = vector.shape_cast %127 : vector<1x1x32xf32> to vector<1x32xf32>
    %129 = vector.extract_strided_slice %117 {offsets = [0, 0], sizes = [8, 8], strides = [1, 1]} : vector<8x32xf32> to vector<8x8xf32>
    %130 = vector.shape_cast %129 : vector<8x8xf32> to vector<1x8x8xf32>
    %131 = vector.extract_strided_slice %117 {offsets = [0, 8], sizes = [8, 8], strides = [1, 1]} : vector<8x32xf32> to vector<8x8xf32>
    %132 = vector.shape_cast %131 : vector<8x8xf32> to vector<1x8x8xf32>
    %133 = vector.extract_strided_slice %117 {offsets = [0, 16], sizes = [8, 8], strides = [1, 1]} : vector<8x32xf32> to vector<8x8xf32>
    %134 = vector.shape_cast %133 : vector<8x8xf32> to vector<1x8x8xf32>
    %135 = vector.extract_strided_slice %117 {offsets = [0, 24], sizes = [8, 8], strides = [1, 1]} : vector<8x32xf32> to vector<8x8xf32>
    %136 = vector.shape_cast %135 : vector<8x8xf32> to vector<1x8x8xf32>
    %137 = tpu.concatenate %130, %132, %134, %136 in 0 : vector<1x8x8xf32>, vector<1x8x8xf32>, vector<1x8x8xf32>, vector<1x8x8xf32> -> vector<4x8x8xf32>
    %138 = vector.extract_strided_slice %123 {offsets = [0, 0], sizes = [12, 8], strides = [1, 1]} : vector<12x32xf32> to vector<12x8xf32>
    %139 = vector.shape_cast %138 : vector<12x8xf32> to vector<1x12x8xf32>
    %140 = vector.extract_strided_slice %123 {offsets = [0, 8], sizes = [12, 8], strides = [1, 1]} : vector<12x32xf32> to vector<12x8xf32>
    %141 = vector.shape_cast %140 : vector<12x8xf32> to vector<1x12x8xf32>
    %142 = vector.extract_strided_slice %123 {offsets = [0, 16], sizes = [12, 8], strides = [1, 1]} : vector<12x32xf32> to vector<12x8xf32>
    %143 = vector.shape_cast %142 : vector<12x8xf32> to vector<1x12x8xf32>
    %144 = vector.extract_strided_slice %123 {offsets = [0, 24], sizes = [12, 8], strides = [1, 1]} : vector<12x32xf32> to vector<12x8xf32>
    %145 = vector.shape_cast %144 : vector<12x8xf32> to vector<1x12x8xf32>
    %146 = tpu.concatenate %139, %141, %143, %145 in 0 : vector<1x12x8xf32>, vector<1x12x8xf32>, vector<1x12x8xf32>, vector<1x12x8xf32> -> vector<4x12x8xf32>
    %147 = vector.extract_strided_slice %124 {offsets = [0, 0], sizes = [12, 8], strides = [1, 1]} : vector<12x32xf32> to vector<12x8xf32>
    %148 = vector.shape_cast %147 : vector<12x8xf32> to vector<1x12x8xf32>
    %149 = vector.extract_strided_slice %124 {offsets = [0, 8], sizes = [12, 8], strides = [1, 1]} : vector<12x32xf32> to vector<12x8xf32>
    %150 = vector.shape_cast %149 : vector<12x8xf32> to vector<1x12x8xf32>
    %151 = vector.extract_strided_slice %124 {offsets = [0, 16], sizes = [12, 8], strides = [1, 1]} : vector<12x32xf32> to vector<12x8xf32>
    %152 = vector.shape_cast %151 : vector<12x8xf32> to vector<1x12x8xf32>
    %153 = vector.extract_strided_slice %124 {offsets = [0, 24], sizes = [12, 8], strides = [1, 1]} : vector<12x32xf32> to vector<12x8xf32>
    %154 = vector.shape_cast %153 : vector<12x8xf32> to vector<1x12x8xf32>
    %155 = tpu.concatenate %148, %150, %152, %154 in 0 : vector<1x12x8xf32>, vector<1x12x8xf32>, vector<1x12x8xf32>, vector<1x12x8xf32> -> vector<4x12x8xf32>
    "tpu.trace_start"() <{level = 10 : i32, message = "hqd,hkd->hqk"}> : () -> ()
    %cst_56 = arith.constant dense<0.000000e+00> : vector<4x8x12xf32>
    %156 = tpu.matmul %137, %146, %cst_56 {dimension_numbers = #tpu.dot_dimension_numbers<[2], [2], [1], [1], [0, 0, 0, 1, 1, 1], [0], [0]>} : vector<4x8x8xf32>, vector<4x12x8xf32>, vector<4x8x12xf32> -> vector<4x8x12xf32>
    "tpu.trace_stop"() : () -> ()
    %cst_57 = arith.constant 0.353553385 : f32
    %157 = vector.broadcast %cst_57 : f32 to vector<4x8x12xf32>
    %158 = arith.mulf %156, %157 : vector<4x8x12xf32>
    %cst_58 = arith.constant 0.000000e+00 : f32
    %159 = vector.broadcast %cst_58 : f32 to vector<1x1x12xf32>
    %160 = arith.cmpf oeq, %9, %159 : vector<1x1x12xf32>
    %cst_59 = arith.constant -1.000000e+10 : f32
    %161 = vector.shape_cast %160 : vector<1x1x12xi1> to vector<1x1x12xi1>
    %162 = vector.broadcast %161 : vector<1x1x12xi1> to vector<4x8x12xi1>
    %163 = vector.broadcast %cst_59 : f32 to vector<4x8x12xf32>
    %164 = arith.select %162, %163, %158 : vector<4x8x12xi1>, vector<4x8x12xf32>
    %cst_60 = arith.constant dense<0xFF800000> : vector<4x8xf32>
    %165 = vector.multi_reduction <maximumf>, %164, %cst_60 [2] : vector<4x8x12xf32> to vector<4x8xf32>
    %166 = vector.shape_cast %165 : vector<4x8xf32> to vector<4x8x1xf32>
    %167 = vector.broadcast %166 : vector<4x8x1xf32> to vector<4x8x12xf32>
    %168 = arith.subf %164, %167 : vector<4x8x12xf32>
    %169 = math.exp %168 : vector<4x8x12xf32>
    %cst_61 = arith.constant dense<0.000000e+00> : vector<4x8xf32>
    %170 = vector.multi_reduction <add>, %169, %cst_61 [2] : vector<4x8x12xf32> to vector<4x8xf32>
    %171 = vector.shape_cast %170 : vector<4x8xf32> to vector<4x8x1xf32>
    %172 = vector.broadcast %171 : vector<4x8x1xf32> to vector<4x8x12xf32>
    %173 = arith.divf %169, %172 : vector<4x8x12xf32>
    "tpu.trace_start"() <{level = 10 : i32, message = "hqk,hkd->hqd"}> : () -> ()
    %cst_62 = arith.constant dense<0.000000e+00> : vector<4x8x8xf32>
    %174 = tpu.matmul %173, %155, %cst_62 {dimension_numbers = #tpu.dot_dimension_numbers<[2], [1], [1], [2], [0, 0, 0, 1, 1, 2], [0], [0]>} : vector<4x8x12xf32>, vector<4x12x8xf32>, vector<4x8x8xf32> -> vector<4x8x8xf32>
    "tpu.trace_stop"() : () -> ()
    %175 = vector.extract_strided_slice %174 {offsets = [0, 0, 0], sizes = [1, 8, 8], strides = [1, 1, 1]} : vector<4x8x8xf32> to vector<1x8x8xf32>
    %176 = vector.shape_cast %175 : vector<1x8x8xf32> to vector<8x8xf32>
    %177 = vector.extract_strided_slice %174 {offsets = [1, 0, 0], sizes = [1, 8, 8], strides = [1, 1, 1]} : vector<4x8x8xf32> to vector<1x8x8xf32>
    %178 = vector.shape_cast %177 : vector<1x8x8xf32> to vector<8x8xf32>
    %179 = vector.extract_strided_slice %174 {offsets = [2, 0, 0], sizes = [1, 8, 8], strides = [1, 1, 1]} : vector<4x8x8xf32> to vector<1x8x8xf32>
    %180 = vector.shape_cast %179 : vector<1x8x8xf32> to vector<8x8xf32>
    %181 = vector.extract_strided_slice %174 {offsets = [3, 0, 0], sizes = [1, 8, 8], strides = [1, 1, 1]} : vector<4x8x8xf32> to vector<1x8x8xf32>
    %182 = vector.shape_cast %181 : vector<1x8x8xf32> to vector<8x8xf32>
    %183 = tpu.concatenate %176, %178, %180, %182 in 1 : vector<8x8xf32>, vector<8x8xf32>, vector<8x8xf32>, vector<8x8xf32> -> vector<8x32xf32>
    %cst_63 = arith.constant dense<0.000000e+00> : vector<8x32xf32>
    %184 = tpu.matmul %183, %126, %cst_63 {dimension_numbers = #tpu.dot_dimension_numbers<[1], [0], [0], [1], [0, 0, 1, 1], [], []>} : vector<8x32xf32>, vector<32x32xf32>, vector<8x32xf32> -> vector<8x32xf32>
    %185 = vector.broadcast %128 : vector<1x32xf32> to vector<8x32xf32>
    %186 = arith.addf %184, %185 : vector<8x32xf32>
    %187 = arith.addf %108, %186 : vector<8x32xf32>
    %c0_64 = arith.constant 0 : index
    %c0_65 = arith.constant 0 : index
    %c0_66 = arith.constant 0 : index
    %188 = vector.load %arg15[%c0_64, %c0_65, %c0_66] : memref<2x1x32xf32, #tpu.memory_space<vmem>>, vector<1x1x32xf32>
    %189 = vector.shape_cast %188 : vector<1x1x32xf32> to vector<1x32xf32>
    %c0_67 = arith.constant 0 : index
    %c0_68 = arith.constant 0 : index
    %c0_69 = arith.constant 0 : index
    %190 = vector.load %arg16[%c0_67, %c0_68, %c0_69] : memref<2x1x32xf32, #tpu.memory_space<vmem>>, vector<1x1x32xf32>
    %191 = vector.shape_cast %190 : vector<1x1x32xf32> to vector<1x32xf32>
    %cst_70 = arith.constant dense<0.000000e+00> : vector<8xf32>
    %192 = vector.multi_reduction <add>, %187, %cst_70 [1] : vector<8x32xf32> to vector<8xf32>
    %193 = vector.shape_cast %192 : vector<8xf32> to vector<8x1xf32>
    %cst_71 = arith.constant 3.200000e+01 : f32
    %194 = vector.broadcast %cst_71 : f32 to vector<8x1xf32>
    %195 = arith.divf %193, %194 : vector<8x1xf32>
    %196 = vector.broadcast %195 : vector<8x1xf32> to vector<8x32xf32>
    %197 = arith.subf %187, %196 : vector<8x32xf32>
    %198 = arith.mulf %197, %197 : vector<8x32xf32>
    %cst_72 = arith.constant dense<0.000000e+00> : vector<8xf32>
    %199 = vector.multi_reduction <add>, %198, %cst_72 [1] : vector<8x32xf32> to vector<8xf32>
    %200 = vector.shape_cast %199 : vector<8xf32> to vector<8x1xf32>
    %cst_73 = arith.constant 3.200000e+01 : f32
    %201 = vector.broadcast %cst_73 : f32 to vector<8x1xf32>
    %202 = arith.divf %200, %201 : vector<8x1xf32>
    %203 = vector.broadcast %195 : vector<8x1xf32> to vector<8x32xf32>
    %204 = arith.subf %187, %203 : vector<8x32xf32>
    %cst_74 = arith.constant 9.99999974E-6 : f32
    %205 = vector.broadcast %cst_74 : f32 to vector<8x1xf32>
    %206 = arith.addf %202, %205 : vector<8x1xf32>
    %207 = math.rsqrt %206 : vector<8x1xf32>
    %208 = vector.broadcast %207 : vector<8x1xf32> to vector<8x32xf32>
    %209 = arith.mulf %204, %208 : vector<8x32xf32>
    %210 = vector.broadcast %189 : vector<1x32xf32> to vector<8x32xf32>
    %211 = arith.mulf %209, %210 : vector<8x32xf32>
    %212 = vector.broadcast %191 : vector<1x32xf32> to vector<8x32xf32>
    %213 = arith.addf %211, %212 : vector<8x32xf32>
    %c0_75 = arith.constant 0 : index
    %c0_76 = arith.constant 0 : index
    %c0_77 = arith.constant 0 : index
    %214 = vector.load %arg17[%c0_75, %c0_76, %c0_77] : memref<2x32x64xf32, #tpu.memory_space<vmem>>, vector<1x32x64xf32>
    %215 = vector.shape_cast %214 : vector<1x32x64xf32> to vector<32x64xf32>
    %cst_78 = arith.constant dense<0.000000e+00> : vector<8x64xf32>
    %216 = tpu.matmul %213, %215, %cst_78 {dimension_numbers = #tpu.dot_dimension_numbers<[1], [0], [0], [1], [0, 0, 1, 1], [], []>} : vector<8x32xf32>, vector<32x64xf32>, vector<8x64xf32> -> vector<8x64xf32>
    %c0_79 = arith.constant 0 : index
    %c0_80 = arith.constant 0 : index
    %c0_81 = arith.constant 0 : index
    %217 = vector.load %arg18[%c0_79, %c0_80, %c0_81] : memref<2x1x64xf32, #tpu.memory_space<vmem>>, vector<1x1x64xf32>
    %218 = vector.shape_cast %217 : vector<1x1x64xf32> to vector<1x64xf32>
    %219 = vector.broadcast %218 : vector<1x64xf32> to vector<8x64xf32>
    %220 = arith.addf %216, %219 : vector<8x64xf32>
    %cst_82 = arith.constant 0.000000e+00 : f32
    %221 = vector.broadcast %cst_82 : f32 to vector<8x64xf32>
    %222 = arith.maximumf %220, %221 : vector<8x64xf32>
    %c0_83 = arith.constant 0 : index
    %c0_84 = arith.constant 0 : index
    %c0_85 = arith.constant 0 : index
    %223 = vector.load %arg19[%c0_83, %c0_84, %c0_85] : memref<2x64x32xf32, #tpu.memory_space<vmem>>, vector<1x64x32xf32>
    %224 = vector.shape_cast %223 : vector<1x64x32xf32> to vector<64x32xf32>
    %cst_86 = arith.constant dense<0.000000e+00> : vector<8x32xf32>
    %225 = tpu.matmul %222, %224, %cst_86 {dimension_numbers = #tpu.dot_dimension_numbers<[1], [0], [0], [1], [0, 0, 1, 1], [], []>} : vector<8x64xf32>, vector<64x32xf32>, vector<8x32xf32> -> vector<8x32xf32>
    %c0_87 = arith.constant 0 : index
    %c0_88 = arith.constant 0 : index
    %c0_89 = arith.constant 0 : index
    %226 = vector.load %arg20[%c0_87, %c0_88, %c0_89] : memref<2x1x32xf32, #tpu.memory_space<vmem>>, vector<1x1x32xf32>
    %227 = vector.shape_cast %226 : vector<1x1x32xf32> to vector<1x32xf32>
    %228 = vector.broadcast %227 : vector<1x32xf32> to vector<8x32xf32>
    %229 = arith.addf %225, %228 : vector<8x32xf32>
    %230 = arith.addf %213, %229 : vector<8x32xf32>
    %c0_90 = arith.constant 0 : index
    %c0_91 = arith.constant 0 : index
    %c0_92 = arith.constant 0 : index
    %231 = vector.load %arg21[%c0_90, %c0_91, %c0_92] : memref<2x1x32xf32, #tpu.memory_space<vmem>>, vector<1x1x32xf32>
    %232 = vector.shape_cast %231 : vector<1x1x32xf32> to vector<1x32xf32>
    %c0_93 = arith.constant 0 : index
    %c0_94 = arith.constant 0 : index
    %c0_95 = arith.constant 0 : index
    %233 = vector.load %arg22[%c0_93, %c0_94, %c0_95] : memref<2x1x32xf32, #tpu.memory_space<vmem>>, vector<1x1x32xf32>
    %234 = vector.shape_cast %233 : vector<1x1x32xf32> to vector<1x32xf32>
    %cst_96 = arith.constant dense<0.000000e+00> : vector<8xf32>
    %235 = vector.multi_reduction <add>, %230, %cst_96 [1] : vector<8x32xf32> to vector<8xf32>
    %236 = vector.shape_cast %235 : vector<8xf32> to vector<8x1xf32>
    %cst_97 = arith.constant 3.200000e+01 : f32
    %237 = vector.broadcast %cst_97 : f32 to vector<8x1xf32>
    %238 = arith.divf %236, %237 : vector<8x1xf32>
    %239 = vector.broadcast %238 : vector<8x1xf32> to vector<8x32xf32>
    %240 = arith.subf %230, %239 : vector<8x32xf32>
    %241 = arith.mulf %240, %240 : vector<8x32xf32>
    %cst_98 = arith.constant dense<0.000000e+00> : vector<8xf32>
    %242 = vector.multi_reduction <add>, %241, %cst_98 [1] : vector<8x32xf32> to vector<8xf32>
    %243 = vector.shape_cast %242 : vector<8xf32> to vector<8x1xf32>
    %cst_99 = arith.constant 3.200000e+01 : f32
    %244 = vector.broadcast %cst_99 : f32 to vector<8x1xf32>
    %245 = arith.divf %243, %244 : vector<8x1xf32>
    %246 = vector.broadcast %238 : vector<8x1xf32> to vector<8x32xf32>
    %247 = arith.subf %230, %246 : vector<8x32xf32>
    %cst_100 = arith.constant 9.99999974E-6 : f32
    %248 = vector.broadcast %cst_100 : f32 to vector<8x1xf32>
    %249 = arith.addf %245, %248 : vector<8x1xf32>
    %250 = math.rsqrt %249 : vector<8x1xf32>
    %251 = vector.broadcast %250 : vector<8x1xf32> to vector<8x32xf32>
    %252 = arith.mulf %247, %251 : vector<8x32xf32>
    %253 = vector.broadcast %232 : vector<1x32xf32> to vector<8x32xf32>
    %254 = arith.mulf %252, %253 : vector<8x32xf32>
    %255 = vector.broadcast %234 : vector<1x32xf32> to vector<8x32xf32>
    %256 = arith.addf %254, %255 : vector<8x32xf32>
    %c1 = arith.constant 1 : index
    %c0_101 = arith.constant 0 : index
    %c0_102 = arith.constant 0 : index
    %257 = vector.load %arg5[%c1, %c0_101, %c0_102] : memref<2x32x96xf32, #tpu.memory_space<vmem>>, vector<1x32x96xf32>
    %258 = vector.shape_cast %257 : vector<1x32x96xf32> to vector<32x96xf32>
    %cst_103 = arith.constant dense<0.000000e+00> : vector<8x96xf32>
    %259 = tpu.matmul %256, %258, %cst_103 {dimension_numbers = #tpu.dot_dimension_numbers<[1], [0], [0], [1], [0, 0, 1, 1], [], []>} : vector<8x32xf32>, vector<32x96xf32>, vector<8x96xf32> -> vector<8x96xf32>
    %c1_104 = arith.constant 1 : index
    %c0_105 = arith.constant 0 : index
    %c0_106 = arith.constant 0 : index
    %260 = vector.load %arg6[%c1_104, %c0_105, %c0_106] : memref<2x1x96xf32, #tpu.memory_space<vmem>>, vector<1x1x96xf32>
    %261 = vector.shape_cast %260 : vector<1x1x96xf32> to vector<1x96xf32>
    %262 = vector.broadcast %261 : vector<1x96xf32> to vector<8x96xf32>
    %263 = arith.addf %259, %262 : vector<8x96xf32>
    %264 = vector.extract_strided_slice %263 {offsets = [0, 0], sizes = [8, 32], strides = [1, 1]} : vector<8x96xf32> to vector<8x32xf32>
    %265 = vector.extract_strided_slice %263 {offsets = [0, 32], sizes = [8, 32], strides = [1, 1]} : vector<8x96xf32> to vector<8x32xf32>
    %266 = vector.extract_strided_slice %263 {offsets = [0, 64], sizes = [8, 32], strides = [1, 1]} : vector<8x96xf32> to vector<8x32xf32>
    %c1_107 = arith.constant 1 : index
    %c0_108 = arith.constant 0 : index
    %c0_109 = arith.constant 0 : index
    %267 = vector.load %arg7[%c1_107, %c0_108, %c0_109] : memref<2x32x32xf32, #tpu.memory_space<vmem>>, vector<1x32x32xf32>
    %268 = vector.shape_cast %267 : vector<1x32x32xf32> to vector<32x32xf32>
    %c1_110 = arith.constant 1 : index
    %c0_111 = arith.constant 0 : index
    %c0_112 = arith.constant 0 : index
    %269 = vector.load %arg8[%c1_110, %c0_111, %c0_112] : memref<2x1x32xf32, #tpu.memory_space<vmem>>, vector<1x1x32xf32>
    %270 = vector.shape_cast %269 : vector<1x1x32xf32> to vector<1x32xf32>
    %271 = vector.extract_strided_slice %264 {offsets = [0, 0], sizes = [8, 8], strides = [1, 1]} : vector<8x32xf32> to vector<8x8xf32>
    %272 = vector.shape_cast %271 : vector<8x8xf32> to vector<1x8x8xf32>
    %273 = vector.extract_strided_slice %264 {offsets = [0, 8], sizes = [8, 8], strides = [1, 1]} : vector<8x32xf32> to vector<8x8xf32>
    %274 = vector.shape_cast %273 : vector<8x8xf32> to vector<1x8x8xf32>
    %275 = vector.extract_strided_slice %264 {offsets = [0, 16], sizes = [8, 8], strides = [1, 1]} : vector<8x32xf32> to vector<8x8xf32>
    %276 = vector.shape_cast %275 : vector<8x8xf32> to vector<1x8x8xf32>
    %277 = vector.extract_strided_slice %264 {offsets = [0, 24], sizes = [8, 8], strides = [1, 1]} : vector<8x32xf32> to vector<8x8xf32>
    %278 = vector.shape_cast %277 : vector<8x8xf32> to vector<1x8x8xf32>
    %279 = tpu.concatenate %272, %274, %276, %278 in 0 : vector<1x8x8xf32>, vector<1x8x8xf32>, vector<1x8x8xf32>, vector<1x8x8xf32> -> vector<4x8x8xf32>
    %280 = vector.extract_strided_slice %265 {offsets = [0, 0], sizes = [8, 8], strides = [1, 1]} : vector<8x32xf32> to vector<8x8xf32>
    %281 = vector.shape_cast %280 : vector<8x8xf32> to vector<1x8x8xf32>
    %282 = vector.extract_strided_slice %265 {offsets = [0, 8], sizes = [8, 8], strides = [1, 1]} : vector<8x32xf32> to vector<8x8xf32>
    %283 = vector.shape_cast %282 : vector<8x8xf32> to vector<1x8x8xf32>
    %284 = vector.extract_strided_slice %265 {offsets = [0, 16], sizes = [8, 8], strides = [1, 1]} : vector<8x32xf32> to vector<8x8xf32>
    %285 = vector.shape_cast %284 : vector<8x8xf32> to vector<1x8x8xf32>
    %286 = vector.extract_strided_slice %265 {offsets = [0, 24], sizes = [8, 8], strides = [1, 1]} : vector<8x32xf32> to vector<8x8xf32>
    %287 = vector.shape_cast %286 : vector<8x8xf32> to vector<1x8x8xf32>
    %288 = tpu.concatenate %281, %283, %285, %287 in 0 : vector<1x8x8xf32>, vector<1x8x8xf32>, vector<1x8x8xf32>, vector<1x8x8xf32> -> vector<4x8x8xf32>
    %289 = vector.extract_strided_slice %266 {offsets = [0, 0], sizes = [8, 8], strides = [1, 1]} : vector<8x32xf32> to vector<8x8xf32>
    %290 = vector.shape_cast %289 : vector<8x8xf32> to vector<1x8x8xf32>
    %291 = vector.extract_strided_slice %266 {offsets = [0, 8], sizes = [8, 8], strides = [1, 1]} : vector<8x32xf32> to vector<8x8xf32>
    %292 = vector.shape_cast %291 : vector<8x8xf32> to vector<1x8x8xf32>
    %293 = vector.extract_strided_slice %266 {offsets = [0, 16], sizes = [8, 8], strides = [1, 1]} : vector<8x32xf32> to vector<8x8xf32>
    %294 = vector.shape_cast %293 : vector<8x8xf32> to vector<1x8x8xf32>
    %295 = vector.extract_strided_slice %266 {offsets = [0, 24], sizes = [8, 8], strides = [1, 1]} : vector<8x32xf32> to vector<8x8xf32>
    %296 = vector.shape_cast %295 : vector<8x8xf32> to vector<1x8x8xf32>
    %297 = tpu.concatenate %290, %292, %294, %296 in 0 : vector<1x8x8xf32>, vector<1x8x8xf32>, vector<1x8x8xf32>, vector<1x8x8xf32> -> vector<4x8x8xf32>
    "tpu.trace_start"() <{level = 10 : i32, message = "hqd,hkd->hqk"}> : () -> ()
    %cst_113 = arith.constant dense<0.000000e+00> : vector<4x8x8xf32>
    %298 = tpu.matmul %279, %288, %cst_113 {dimension_numbers = #tpu.dot_dimension_numbers<[2], [2], [1], [1], [0, 0, 0, 1, 1, 1], [0], [0]>} : vector<4x8x8xf32>, vector<4x8x8xf32>, vector<4x8x8xf32> -> vector<4x8x8xf32>
    "tpu.trace_stop"() : () -> ()
    %cst_114 = arith.constant 0.353553385 : f32
    %299 = vector.broadcast %cst_114 : f32 to vector<4x8x8xf32>
    %300 = arith.mulf %298, %299 : vector<4x8x8xf32>
    %cst_115 = arith.constant 0.000000e+00 : f32
    %301 = vector.broadcast %cst_115 : f32 to vector<1x8x8xf32>
    %302 = arith.cmpf oeq, %6, %301 : vector<1x8x8xf32>
    %cst_116 = arith.constant -1.000000e+10 : f32
    %303 = vector.shape_cast %302 : vector<1x8x8xi1> to vector<1x8x8xi1>
    %304 = vector.broadcast %303 : vector<1x8x8xi1> to vector<4x8x8xi1>
    %305 = vector.broadcast %cst_116 : f32 to vector<4x8x8xf32>
    %306 = arith.select %304, %305, %300 : vector<4x8x8xi1>, vector<4x8x8xf32>
    %cst_117 = arith.constant dense<0xFF800000> : vector<4x8xf32>
    %307 = vector.multi_reduction <maximumf>, %306, %cst_117 [2] : vector<4x8x8xf32> to vector<4x8xf32>
    %308 = vector.shape_cast %307 : vector<4x8xf32> to vector<4x8x1xf32>
    %309 = vector.broadcast %308 : vector<4x8x1xf32> to vector<4x8x8xf32>
    %310 = arith.subf %306, %309 : vector<4x8x8xf32>
    %311 = math.exp %310 : vector<4x8x8xf32>
    %cst_118 = arith.constant dense<0.000000e+00> : vector<4x8xf32>
    %312 = vector.multi_reduction <add>, %311, %cst_118 [2] : vector<4x8x8xf32> to vector<4x8xf32>
    %313 = vector.shape_cast %312 : vector<4x8xf32> to vector<4x8x1xf32>
    %314 = vector.broadcast %313 : vector<4x8x1xf32> to vector<4x8x8xf32>
    %315 = arith.divf %311, %314 : vector<4x8x8xf32>
    "tpu.trace_start"() <{level = 10 : i32, message = "hqk,hkd->hqd"}> : () -> ()
    %cst_119 = arith.constant dense<0.000000e+00> : vector<4x8x8xf32>
    %316 = tpu.matmul %315, %297, %cst_119 {dimension_numbers = #tpu.dot_dimension_numbers<[2], [1], [1], [2], [0, 0, 0, 1, 1, 2], [0], [0]>} : vector<4x8x8xf32>, vector<4x8x8xf32>, vector<4x8x8xf32> -> vector<4x8x8xf32>
    "tpu.trace_stop"() : () -> ()
    %317 = vector.extract_strided_slice %316 {offsets = [0, 0, 0], sizes = [1, 8, 8], strides = [1, 1, 1]} : vector<4x8x8xf32> to vector<1x8x8xf32>
    %318 = vector.shape_cast %317 : vector<1x8x8xf32> to vector<8x8xf32>
    %319 = vector.extract_strided_slice %316 {offsets = [1, 0, 0], sizes = [1, 8, 8], strides = [1, 1, 1]} : vector<4x8x8xf32> to vector<1x8x8xf32>
    %320 = vector.shape_cast %319 : vector<1x8x8xf32> to vector<8x8xf32>
    %321 = vector.extract_strided_slice %316 {offsets = [2, 0, 0], sizes = [1, 8, 8], strides = [1, 1, 1]} : vector<4x8x8xf32> to vector<1x8x8xf32>
    %322 = vector.shape_cast %321 : vector<1x8x8xf32> to vector<8x8xf32>
    %323 = vector.extract_strided_slice %316 {offsets = [3, 0, 0], sizes = [1, 8, 8], strides = [1, 1, 1]} : vector<4x8x8xf32> to vector<1x8x8xf32>
    %324 = vector.shape_cast %323 : vector<1x8x8xf32> to vector<8x8xf32>
    %325 = tpu.concatenate %318, %320, %322, %324 in 1 : vector<8x8xf32>, vector<8x8xf32>, vector<8x8xf32>, vector<8x8xf32> -> vector<8x32xf32>
    %cst_120 = arith.constant dense<0.000000e+00> : vector<8x32xf32>
    %326 = tpu.matmul %325, %268, %cst_120 {dimension_numbers = #tpu.dot_dimension_numbers<[1], [0], [0], [1], [0, 0, 1, 1], [], []>} : vector<8x32xf32>, vector<32x32xf32>, vector<8x32xf32> -> vector<8x32xf32>
    %327 = vector.broadcast %270 : vector<1x32xf32> to vector<8x32xf32>
    %328 = arith.addf %326, %327 : vector<8x32xf32>
    %329 = arith.addf %256, %328 : vector<8x32xf32>
    %c1_121 = arith.constant 1 : index
    %c0_122 = arith.constant 0 : index
    %c0_123 = arith.constant 0 : index
    %330 = vector.load %arg9[%c1_121, %c0_122, %c0_123] : memref<2x1x32xf32, #tpu.memory_space<vmem>>, vector<1x1x32xf32>
    %331 = vector.shape_cast %330 : vector<1x1x32xf32> to vector<1x32xf32>
    %c1_124 = arith.constant 1 : index
    %c0_125 = arith.constant 0 : index
    %c0_126 = arith.constant 0 : index
    %332 = vector.load %arg10[%c1_124, %c0_125, %c0_126] : memref<2x1x32xf32, #tpu.memory_space<vmem>>, vector<1x1x32xf32>
    %333 = vector.shape_cast %332 : vector<1x1x32xf32> to vector<1x32xf32>
    %cst_127 = arith.constant dense<0.000000e+00> : vector<8xf32>
    %334 = vector.multi_reduction <add>, %329, %cst_127 [1] : vector<8x32xf32> to vector<8xf32>
    %335 = vector.shape_cast %334 : vector<8xf32> to vector<8x1xf32>
    %cst_128 = arith.constant 3.200000e+01 : f32
    %336 = vector.broadcast %cst_128 : f32 to vector<8x1xf32>
    %337 = arith.divf %335, %336 : vector<8x1xf32>
    %338 = vector.broadcast %337 : vector<8x1xf32> to vector<8x32xf32>
    %339 = arith.subf %329, %338 : vector<8x32xf32>
    %340 = arith.mulf %339, %339 : vector<8x32xf32>
    %cst_129 = arith.constant dense<0.000000e+00> : vector<8xf32>
    %341 = vector.multi_reduction <add>, %340, %cst_129 [1] : vector<8x32xf32> to vector<8xf32>
    %342 = vector.shape_cast %341 : vector<8xf32> to vector<8x1xf32>
    %cst_130 = arith.constant 3.200000e+01 : f32
    %343 = vector.broadcast %cst_130 : f32 to vector<8x1xf32>
    %344 = arith.divf %342, %343 : vector<8x1xf32>
    %345 = vector.broadcast %337 : vector<8x1xf32> to vector<8x32xf32>
    %346 = arith.subf %329, %345 : vector<8x32xf32>
    %cst_131 = arith.constant 9.99999974E-6 : f32
    %347 = vector.broadcast %cst_131 : f32 to vector<8x1xf32>
    %348 = arith.addf %344, %347 : vector<8x1xf32>
    %349 = math.rsqrt %348 : vector<8x1xf32>
    %350 = vector.broadcast %349 : vector<8x1xf32> to vector<8x32xf32>
    %351 = arith.mulf %346, %350 : vector<8x32xf32>
    %352 = vector.broadcast %331 : vector<1x32xf32> to vector<8x32xf32>
    %353 = arith.mulf %351, %352 : vector<8x32xf32>
    %354 = vector.broadcast %333 : vector<1x32xf32> to vector<8x32xf32>
    %355 = arith.addf %353, %354 : vector<8x32xf32>
    %c1_132 = arith.constant 1 : index
    %c0_133 = arith.constant 0 : index
    %c0_134 = arith.constant 0 : index
    %356 = vector.load %arg11[%c1_132, %c0_133, %c0_134] : memref<2x32x96xf32, #tpu.memory_space<vmem>>, vector<1x32x96xf32>
    %357 = vector.shape_cast %356 : vector<1x32x96xf32> to vector<32x96xf32>
    %c1_135 = arith.constant 1 : index
    %c0_136 = arith.constant 0 : index
    %c0_137 = arith.constant 0 : index
    %358 = vector.load %arg12[%c1_135, %c0_136, %c0_137] : memref<2x1x96xf32, #tpu.memory_space<vmem>>, vector<1x1x96xf32>
    %359 = vector.shape_cast %358 : vector<1x1x96xf32> to vector<1x96xf32>
    %360 = vector.extract_strided_slice %357 {offsets = [0, 0], sizes = [32, 32], strides = [1, 1]} : vector<32x96xf32> to vector<32x32xf32>
    %cst_138 = arith.constant dense<0.000000e+00> : vector<8x32xf32>
    %361 = tpu.matmul %355, %360, %cst_138 {dimension_numbers = #tpu.dot_dimension_numbers<[1], [0], [0], [1], [0, 0, 1, 1], [], []>} : vector<8x32xf32>, vector<32x32xf32>, vector<8x32xf32> -> vector<8x32xf32>
    %362 = vector.extract_strided_slice %359 {offsets = [0, 0], sizes = [1, 32], strides = [1, 1]} : vector<1x96xf32> to vector<1x32xf32>
    %363 = vector.broadcast %362 : vector<1x32xf32> to vector<8x32xf32>
    %364 = arith.addf %361, %363 : vector<8x32xf32>
    %365 = vector.extract_strided_slice %357 {offsets = [0, 32], sizes = [32, 64], strides = [1, 1]} : vector<32x96xf32> to vector<32x64xf32>
    %cst_139 = arith.constant dense<0.000000e+00> : vector<12x64xf32>
    %366 = tpu.matmul %3, %365, %cst_139 {dimension_numbers = #tpu.dot_dimension_numbers<[1], [0], [0], [1], [0, 0, 1, 1], [], []>} : vector<12x32xf32>, vector<32x64xf32>, vector<12x64xf32> -> vector<12x64xf32>
    %367 = vector.extract_strided_slice %359 {offsets = [0, 32], sizes = [1, 64], strides = [1, 1]} : vector<1x96xf32> to vector<1x64xf32>
    %368 = vector.broadcast %367 : vector<1x64xf32> to vector<12x64xf32>
    %369 = arith.addf %366, %368 : vector<12x64xf32>
    %370 = vector.extract_strided_slice %369 {offsets = [0, 0], sizes = [12, 32], strides = [1, 1]} : vector<12x64xf32> to vector<12x32xf32>
    %371 = vector.extract_strided_slice %369 {offsets = [0, 32], sizes = [12, 32], strides = [1, 1]} : vector<12x64xf32> to vector<12x32xf32>
    %c1_140 = arith.constant 1 : index
    %c0_141 = arith.constant 0 : index
    %c0_142 = arith.constant 0 : index
    %372 = vector.load %arg13[%c1_140, %c0_141, %c0_142] : memref<2x32x32xf32, #tpu.memory_space<vmem>>, vector<1x32x32xf32>
    %373 = vector.shape_cast %372 : vector<1x32x32xf32> to vector<32x32xf32>
    %c1_143 = arith.constant 1 : index
    %c0_144 = arith.constant 0 : index
    %c0_145 = arith.constant 0 : index
    %374 = vector.load %arg14[%c1_143, %c0_144, %c0_145] : memref<2x1x32xf32, #tpu.memory_space<vmem>>, vector<1x1x32xf32>
    %375 = vector.shape_cast %374 : vector<1x1x32xf32> to vector<1x32xf32>
    %376 = vector.extract_strided_slice %364 {offsets = [0, 0], sizes = [8, 8], strides = [1, 1]} : vector<8x32xf32> to vector<8x8xf32>
    %377 = vector.shape_cast %376 : vector<8x8xf32> to vector<1x8x8xf32>
    %378 = vector.extract_strided_slice %364 {offsets = [0, 8], sizes = [8, 8], strides = [1, 1]} : vector<8x32xf32> to vector<8x8xf32>
    %379 = vector.shape_cast %378 : vector<8x8xf32> to vector<1x8x8xf32>
    %380 = vector.extract_strided_slice %364 {offsets = [0, 16], sizes = [8, 8], strides = [1, 1]} : vector<8x32xf32> to vector<8x8xf32>
    %381 = vector.shape_cast %380 : vector<8x8xf32> to vector<1x8x8xf32>
    %382 = vector.extract_strided_slice %364 {offsets = [0, 24], sizes = [8, 8], strides = [1, 1]} : vector<8x32xf32> to vector<8x8xf32>
    %383 = vector.shape_cast %382 : vector<8x8xf32> to vector<1x8x8xf32>
    %384 = tpu.concatenate %377, %379, %381, %383 in 0 : vector<1x8x8xf32>, vector<1x8x8xf32>, vector<1x8x8xf32>, vector<1x8x8xf32> -> vector<4x8x8xf32>
    %385 = vector.extract_strided_slice %370 {offsets = [0, 0], sizes = [12, 8], strides = [1, 1]} : vector<12x32xf32> to vector<12x8xf32>
    %386 = vector.shape_cast %385 : vector<12x8xf32> to vector<1x12x8xf32>
    %387 = vector.extract_strided_slice %370 {offsets = [0, 8], sizes = [12, 8], strides = [1, 1]} : vector<12x32xf32> to vector<12x8xf32>
    %388 = vector.shape_cast %387 : vector<12x8xf32> to vector<1x12x8xf32>
    %389 = vector.extract_strided_slice %370 {offsets = [0, 16], sizes = [12, 8], strides = [1, 1]} : vector<12x32xf32> to vector<12x8xf32>
    %390 = vector.shape_cast %389 : vector<12x8xf32> to vector<1x12x8xf32>
    %391 = vector.extract_strided_slice %370 {offsets = [0, 24], sizes = [12, 8], strides = [1, 1]} : vector<12x32xf32> to vector<12x8xf32>
    %392 = vector.shape_cast %391 : vector<12x8xf32> to vector<1x12x8xf32>
    %393 = tpu.concatenate %386, %388, %390, %392 in 0 : vector<1x12x8xf32>, vector<1x12x8xf32>, vector<1x12x8xf32>, vector<1x12x8xf32> -> vector<4x12x8xf32>
    %394 = vector.extract_strided_slice %371 {offsets = [0, 0], sizes = [12, 8], strides = [1, 1]} : vector<12x32xf32> to vector<12x8xf32>
    %395 = vector.shape_cast %394 : vector<12x8xf32> to vector<1x12x8xf32>
    %396 = vector.extract_strided_slice %371 {offsets = [0, 8], sizes = [12, 8], strides = [1, 1]} : vector<12x32xf32> to vector<12x8xf32>
    %397 = vector.shape_cast %396 : vector<12x8xf32> to vector<1x12x8xf32>
    %398 = vector.extract_strided_slice %371 {offsets = [0, 16], sizes = [12, 8], strides = [1, 1]} : vector<12x32xf32> to vector<12x8xf32>
    %399 = vector.shape_cast %398 : vector<12x8xf32> to vector<1x12x8xf32>
    %400 = vector.extract_strided_slice %371 {offsets = [0, 24], sizes = [12, 8], strides = [1, 1]} : vector<12x32xf32> to vector<12x8xf32>
    %401 = vector.shape_cast %400 : vector<12x8xf32> to vector<1x12x8xf32>
    %402 = tpu.concatenate %395, %397, %399, %401 in 0 : vector<1x12x8xf32>, vector<1x12x8xf32>, vector<1x12x8xf32>, vector<1x12x8xf32> -> vector<4x12x8xf32>
    "tpu.trace_start"() <{level = 10 : i32, message = "hqd,hkd->hqk"}> : () -> ()
    %cst_146 = arith.constant dense<0.000000e+00> : vector<4x8x12xf32>
    %403 = tpu.matmul %384, %393, %cst_146 {dimension_numbers = #tpu.dot_dimension_numbers<[2], [2], [1], [1], [0, 0, 0, 1, 1, 1], [0], [0]>} : vector<4x8x8xf32>, vector<4x12x8xf32>, vector<4x8x12xf32> -> vector<4x8x12xf32>
    "tpu.trace_stop"() : () -> ()
    %cst_147 = arith.constant 0.353553385 : f32
    %404 = vector.broadcast %cst_147 : f32 to vector<4x8x12xf32>
    %405 = arith.mulf %403, %404 : vector<4x8x12xf32>
    %cst_148 = arith.constant 0.000000e+00 : f32
    %406 = vector.broadcast %cst_148 : f32 to vector<1x1x12xf32>
    %407 = arith.cmpf oeq, %9, %406 : vector<1x1x12xf32>
    %cst_149 = arith.constant -1.000000e+10 : f32
    %408 = vector.shape_cast %407 : vector<1x1x12xi1> to vector<1x1x12xi1>
    %409 = vector.broadcast %408 : vector<1x1x12xi1> to vector<4x8x12xi1>
    %410 = vector.broadcast %cst_149 : f32 to vector<4x8x12xf32>
    %411 = arith.select %409, %410, %405 : vector<4x8x12xi1>, vector<4x8x12xf32>
    %cst_150 = arith.constant dense<0xFF800000> : vector<4x8xf32>
    %412 = vector.multi_reduction <maximumf>, %411, %cst_150 [2] : vector<4x8x12xf32> to vector<4x8xf32>
    %413 = vector.shape_cast %412 : vector<4x8xf32> to vector<4x8x1xf32>
    %414 = vector.broadcast %413 : vector<4x8x1xf32> to vector<4x8x12xf32>
    %415 = arith.subf %411, %414 : vector<4x8x12xf32>
    %416 = math.exp %415 : vector<4x8x12xf32>
    %cst_151 = arith.constant dense<0.000000e+00> : vector<4x8xf32>
    %417 = vector.multi_reduction <add>, %416, %cst_151 [2] : vector<4x8x12xf32> to vector<4x8xf32>
    %418 = vector.shape_cast %417 : vector<4x8xf32> to vector<4x8x1xf32>
    %419 = vector.broadcast %418 : vector<4x8x1xf32> to vector<4x8x12xf32>
    %420 = arith.divf %416, %419 : vector<4x8x12xf32>
    "tpu.trace_start"() <{level = 10 : i32, message = "hqk,hkd->hqd"}> : () -> ()
    %cst_152 = arith.constant dense<0.000000e+00> : vector<4x8x8xf32>
    %421 = tpu.matmul %420, %402, %cst_152 {dimension_numbers = #tpu.dot_dimension_numbers<[2], [1], [1], [2], [0, 0, 0, 1, 1, 2], [0], [0]>} : vector<4x8x12xf32>, vector<4x12x8xf32>, vector<4x8x8xf32> -> vector<4x8x8xf32>
    "tpu.trace_stop"() : () -> ()
    %422 = vector.extract_strided_slice %421 {offsets = [0, 0, 0], sizes = [1, 8, 8], strides = [1, 1, 1]} : vector<4x8x8xf32> to vector<1x8x8xf32>
    %423 = vector.shape_cast %422 : vector<1x8x8xf32> to vector<8x8xf32>
    %424 = vector.extract_strided_slice %421 {offsets = [1, 0, 0], sizes = [1, 8, 8], strides = [1, 1, 1]} : vector<4x8x8xf32> to vector<1x8x8xf32>
    %425 = vector.shape_cast %424 : vector<1x8x8xf32> to vector<8x8xf32>
    %426 = vector.extract_strided_slice %421 {offsets = [2, 0, 0], sizes = [1, 8, 8], strides = [1, 1, 1]} : vector<4x8x8xf32> to vector<1x8x8xf32>
    %427 = vector.shape_cast %426 : vector<1x8x8xf32> to vector<8x8xf32>
    %428 = vector.extract_strided_slice %421 {offsets = [3, 0, 0], sizes = [1, 8, 8], strides = [1, 1, 1]} : vector<4x8x8xf32> to vector<1x8x8xf32>
    %429 = vector.shape_cast %428 : vector<1x8x8xf32> to vector<8x8xf32>
    %430 = tpu.concatenate %423, %425, %427, %429 in 1 : vector<8x8xf32>, vector<8x8xf32>, vector<8x8xf32>, vector<8x8xf32> -> vector<8x32xf32>
    %cst_153 = arith.constant dense<0.000000e+00> : vector<8x32xf32>
    %431 = tpu.matmul %430, %373, %cst_153 {dimension_numbers = #tpu.dot_dimension_numbers<[1], [0], [0], [1], [0, 0, 1, 1], [], []>} : vector<8x32xf32>, vector<32x32xf32>, vector<8x32xf32> -> vector<8x32xf32>
    %432 = vector.broadcast %375 : vector<1x32xf32> to vector<8x32xf32>
    %433 = arith.addf %431, %432 : vector<8x32xf32>
    %434 = arith.addf %355, %433 : vector<8x32xf32>
    %c1_154 = arith.constant 1 : index
    %c0_155 = arith.constant 0 : index
    %c0_156 = arith.constant 0 : index
    %435 = vector.load %arg15[%c1_154, %c0_155, %c0_156] : memref<2x1x32xf32, #tpu.memory_space<vmem>>, vector<1x1x32xf32>
    %436 = vector.shape_cast %435 : vector<1x1x32xf32> to vector<1x32xf32>
    %c1_157 = arith.constant 1 : index
    %c0_158 = arith.constant 0 : index
    %c0_159 = arith.constant 0 : index
    %437 = vector.load %arg16[%c1_157, %c0_158, %c0_159] : memref<2x1x32xf32, #tpu.memory_space<vmem>>, vector<1x1x32xf32>
    %438 = vector.shape_cast %437 : vector<1x1x32xf32> to vector<1x32xf32>
    %cst_160 = arith.constant dense<0.000000e+00> : vector<8xf32>
    %439 = vector.multi_reduction <add>, %434, %cst_160 [1] : vector<8x32xf32> to vector<8xf32>
    %440 = vector.shape_cast %439 : vector<8xf32> to vector<8x1xf32>
    %cst_161 = arith.constant 3.200000e+01 : f32
    %441 = vector.broadcast %cst_161 : f32 to vector<8x1xf32>
    %442 = arith.divf %440, %441 : vector<8x1xf32>
    %443 = vector.broadcast %442 : vector<8x1xf32> to vector<8x32xf32>
    %444 = arith.subf %434, %443 : vector<8x32xf32>
    %445 = arith.mulf %444, %444 : vector<8x32xf32>
    %cst_162 = arith.constant dense<0.000000e+00> : vector<8xf32>
    %446 = vector.multi_reduction <add>, %445, %cst_162 [1] : vector<8x32xf32> to vector<8xf32>
    %447 = vector.shape_cast %446 : vector<8xf32> to vector<8x1xf32>
    %cst_163 = arith.constant 3.200000e+01 : f32
    %448 = vector.broadcast %cst_163 : f32 to vector<8x1xf32>
    %449 = arith.divf %447, %448 : vector<8x1xf32>
    %450 = vector.broadcast %442 : vector<8x1xf32> to vector<8x32xf32>
    %451 = arith.subf %434, %450 : vector<8x32xf32>
    %cst_164 = arith.constant 9.99999974E-6 : f32
    %452 = vector.broadcast %cst_164 : f32 to vector<8x1xf32>
    %453 = arith.addf %449, %452 : vector<8x1xf32>
    %454 = math.rsqrt %453 : vector<8x1xf32>
    %455 = vector.broadcast %454 : vector<8x1xf32> to vector<8x32xf32>
    %456 = arith.mulf %451, %455 : vector<8x32xf32>
    %457 = vector.broadcast %436 : vector<1x32xf32> to vector<8x32xf32>
    %458 = arith.mulf %456, %457 : vector<8x32xf32>
    %459 = vector.broadcast %438 : vector<1x32xf32> to vector<8x32xf32>
    %460 = arith.addf %458, %459 : vector<8x32xf32>
    %c1_165 = arith.constant 1 : index
    %c0_166 = arith.constant 0 : index
    %c0_167 = arith.constant 0 : index
    %461 = vector.load %arg17[%c1_165, %c0_166, %c0_167] : memref<2x32x64xf32, #tpu.memory_space<vmem>>, vector<1x32x64xf32>
    %462 = vector.shape_cast %461 : vector<1x32x64xf32> to vector<32x64xf32>
    %cst_168 = arith.constant dense<0.000000e+00> : vector<8x64xf32>
    %463 = tpu.matmul %460, %462, %cst_168 {dimension_numbers = #tpu.dot_dimension_numbers<[1], [0], [0], [1], [0, 0, 1, 1], [], []>} : vector<8x32xf32>, vector<32x64xf32>, vector<8x64xf32> -> vector<8x64xf32>
    %c1_169 = arith.constant 1 : index
    %c0_170 = arith.constant 0 : index
    %c0_171 = arith.constant 0 : index
    %464 = vector.load %arg18[%c1_169, %c0_170, %c0_171] : memref<2x1x64xf32, #tpu.memory_space<vmem>>, vector<1x1x64xf32>
    %465 = vector.shape_cast %464 : vector<1x1x64xf32> to vector<1x64xf32>
    %466 = vector.broadcast %465 : vector<1x64xf32> to vector<8x64xf32>
    %467 = arith.addf %463, %466 : vector<8x64xf32>
    %cst_172 = arith.constant 0.000000e+00 : f32
    %468 = vector.broadcast %cst_172 : f32 to vector<8x64xf32>
    %469 = arith.maximumf %467, %468 : vector<8x64xf32>
    %c1_173 = arith.constant 1 : index
    %c0_174 = arith.constant 0 : index
    %c0_175 = arith.constant 0 : index
    %470 = vector.load %arg19[%c1_173, %c0_174, %c0_175] : memref<2x64x32xf32, #tpu.memory_space<vmem>>, vector<1x64x32xf32>
    %471 = vector.shape_cast %470 : vector<1x64x32xf32> to vector<64x32xf32>
    %cst_176 = arith.constant dense<0.000000e+00> : vector<8x32xf32>
    %472 = tpu.matmul %469, %471, %cst_176 {dimension_numbers = #tpu.dot_dimension_numbers<[1], [0], [0], [1], [0, 0, 1, 1], [], []>} : vector<8x64xf32>, vector<64x32xf32>, vector<8x32xf32> -> vector<8x32xf32>
    %c1_177 = arith.constant 1 : index
    %c0_178 = arith.constant 0 : index
    %c0_179 = arith.constant 0 : index
    %473 = vector.load %arg20[%c1_177, %c0_178, %c0_179] : memref<2x1x32xf32, #tpu.memory_space<vmem>>, vector<1x1x32xf32>
    %474 = vector.shape_cast %473 : vector<1x1x32xf32> to vector<1x32xf32>
    %475 = vector.broadcast %474 : vector<1x32xf32> to vector<8x32xf32>
    %476 = arith.addf %472, %475 : vector<8x32xf32>
    %477 = arith.addf %460, %476 : vector<8x32xf32>
    %c1_180 = arith.constant 1 : index
    %c0_181 = arith.constant 0 : index
    %c0_182 = arith.constant 0 : index
    %478 = vector.load %arg21[%c1_180, %c0_181, %c0_182] : memref<2x1x32xf32, #tpu.memory_space<vmem>>, vector<1x1x32xf32>
    %479 = vector.shape_cast %478 : vector<1x1x32xf32> to vector<1x32xf32>
    %c1_183 = arith.constant 1 : index
    %c0_184 = arith.constant 0 : index
    %c0_185 = arith.constant 0 : index
    %480 = vector.load %arg22[%c1_183, %c0_184, %c0_185] : memref<2x1x32xf32, #tpu.memory_space<vmem>>, vector<1x1x32xf32>
    %481 = vector.shape_cast %480 : vector<1x1x32xf32> to vector<1x32xf32>
    %cst_186 = arith.constant dense<0.000000e+00> : vector<8xf32>
    %482 = vector.multi_reduction <add>, %477, %cst_186 [1] : vector<8x32xf32> to vector<8xf32>
    %483 = vector.shape_cast %482 : vector<8xf32> to vector<8x1xf32>
    %cst_187 = arith.constant 3.200000e+01 : f32
    %484 = vector.broadcast %cst_187 : f32 to vector<8x1xf32>
    %485 = arith.divf %483, %484 : vector<8x1xf32>
    %486 = vector.broadcast %485 : vector<8x1xf32> to vector<8x32xf32>
    %487 = arith.subf %477, %486 : vector<8x32xf32>
    %488 = arith.mulf %487, %487 : vector<8x32xf32>
    %cst_188 = arith.constant dense<0.000000e+00> : vector<8xf32>
    %489 = vector.multi_reduction <add>, %488, %cst_188 [1] : vector<8x32xf32> to vector<8xf32>
    %490 = vector.shape_cast %489 : vector<8xf32> to vector<8x1xf32>
    %cst_189 = arith.constant 3.200000e+01 : f32
    %491 = vector.broadcast %cst_189 : f32 to vector<8x1xf32>
    %492 = arith.divf %490, %491 : vector<8x1xf32>
    %493 = vector.broadcast %485 : vector<8x1xf32> to vector<8x32xf32>
    %494 = arith.subf %477, %493 : vector<8x32xf32>
    %cst_190 = arith.constant 9.99999974E-6 : f32
    %495 = vector.broadcast %cst_190 : f32 to vector<8x1xf32>
    %496 = arith.addf %492, %495 : vector<8x1xf32>
    %497 = math.rsqrt %496 : vector<8x1xf32>
    %498 = vector.broadcast %497 : vector<8x1xf32> to vector<8x32xf32>
    %499 = arith.mulf %494, %498 : vector<8x32xf32>
    %500 = vector.broadcast %479 : vector<1x32xf32> to vector<8x32xf32>
    %501 = arith.mulf %499, %500 : vector<8x32xf32>
    %502 = vector.broadcast %481 : vector<1x32xf32> to vector<8x32xf32>
    %503 = arith.addf %501, %502 : vector<8x32xf32>
    %c0_191 = arith.constant 0 : index
    %c0_192 = arith.constant 0 : index
    %c0_193 = arith.constant 0 : index
    %c0_194 = arith.constant 0 : index
    %504 = vector.load %arg26[%c0_191, %c0_192, %c0_193, %c0_194] : memref<1x4x8x12xf32, #tpu.memory_space<vmem>>, vector<1x4x8x12xf32>
    %505 = vector.shape_cast %504 : vector<1x4x8x12xf32> to vector<4x8x12xf32>
    %506 = vector.shape_cast %420 : vector<4x8x12xf32> to vector<1x4x8x12xf32>
    tpu.vector_store %arg26[%c0_191, %c0_192, %c0_193, %c0_194], %506 {strides = array<i32>} : memref<1x4x8x12xf32, #tpu.memory_space<vmem>>, vector<1x4x8x12xf32>,
    %c0_195 = arith.constant 0 : index
    %c0_196 = arith.constant 0 : index
    %507 = vector.load %arg23[%c0_195, %c0_196] : memref<32x64xf32, #tpu.memory_space<vmem>>, vector<32x64xf32>
    %cst_197 = arith.constant dense<0.000000e+00> : vector<8x64xf32>
    %508 = tpu.matmul %503, %507, %cst_197 {dimension_numbers = #tpu.dot_dimension_numbers<[1], [0], [0], [1], [0, 0, 1, 1], [], []>} : vector<8x32xf32>, vector<32x64xf32>, vector<8x64xf32> -> vector<8x64xf32>
    %c0_198 = arith.constant 0 : index
    %c0_199 = arith.constant 0 : index
    %509 = vector.load %arg24[%c0_198, %c0_199] : memref<1x64xf32, #tpu.memory_space<vmem>>, vector<1x64xf32>
    %510 = vector.broadcast %509 : vector<1x64xf32> to vector<8x64xf32>
    %511 = arith.addf %508, %510 : vector<8x64xf32>
    %c0_200 = arith.constant 0 : index
    %c0_201 = arith.constant 0 : index
    %c0_202 = arith.constant 0 : index
    %512 = vector.load %arg25[%c0_200, %c0_201, %c0_202] : memref<1x8x64xf32, #tpu.memory_space<vmem>>, vector<1x8x64xf32>
    %513 = vector.shape_cast %512 : vector<1x8x64xf32> to vector<8x64xf32>
    %514 = vector.shape_cast %511 : vector<8x64xf32> to vector<1x8x64xf32>
    tpu.vector_store %arg25[%c0_200, %c0_201, %c0_202], %514 {strides = array<i32>} : memref<1x8x64xf32, #tpu.memory_space<vmem>>, vector<1x8x64xf32>,
    return
  }
  func.func @transform_0(%arg0: i32) -> (i32, i32, i32) {
    %c0_i32 = arith.constant 0 : i32
    %c0_i32_0 = arith.constant 0 : i32
    %c0_i32_1 = arith.constant 0 : i32
    return %arg0, %c0_i32, %c0_i32_0 : i32, i32, i32
  }
  func.func @transform_1(%arg0: i32) -> (i32, i32, i32) {
    %c0_i32 = arith.constant 0 : i32
    %c0_i32_0 = arith.constant 0 : i32
    %c0_i32_1 = arith.constant 0 : i32
    return %arg0, %c0_i32, %c0_i32_0 : i32, i32, i32
  }
  func.func @transform_2(%arg0: i32) -> (i32, i32, i32) {
    %c0_i32 = arith.constant 0 : i32
    %c0_i32_0 = arith.constant 0 : i32
    %c0_i32_1 = arith.constant 0 : i32
    return %arg0, %c0_i32, %c0_i32_0 : i32, i32, i32
  }
  func.func @transform_3(%arg0: i32) -> (i32, i32, i32) {
    %c0_i32 = arith.constant 0 : i32
    %c0_i32_0 = arith.constant 0 : i32
    %c0_i32_1 = arith.constant 0 : i32
    return %arg0, %c0_i32, %c0_i32_0 : i32, i32, i32
  }
  func.func @transform_4(%arg0: i32) -> (i32, i32, i32) {
    %c0_i32 = arith.constant 0 : i32
    %c0_i32_0 = arith.constant 0 : i32
    %c0_i32_1 = arith.constant 0 : i32
    %c0_i32_2 = arith.constant 0 : i32
    return %c0_i32, %c0_i32_0, %c0_i32_1 : i32, i32, i32
  }
  func.func @transform_5(%arg0: i32) -> (i32, i32, i32) {
    %c0_i32 = arith.constant 0 : i32
    %c0_i32_0 = arith.constant 0 : i32
    %c0_i32_1 = arith.constant 0 : i32
    %c0_i32_2 = arith.constant 0 : i32
    return %c0_i32, %c0_i32_0, %c0_i32_1 : i32, i32, i32
  }
  func.func @transform_6(%arg0: i32) -> (i32, i32, i32) {
    %c0_i32 = arith.constant 0 : i32
    %c0_i32_0 = arith.constant 0 : i32
    %c0_i32_1 = arith.constant 0 : i32
    %c0_i32_2 = arith.constant 0 : i32
    return %c0_i32, %c0_i32_0, %c0_i32_1 : i32, i32, i32
  }
  func.func @transform_7(%arg0: i32) -> (i32, i32, i32) {
    %c0_i32 = arith.constant 0 : i32
    %c0_i32_0 = arith.constant 0 : i32
    %c0_i32_1 = arith.constant 0 : i32
    %c0_i32_2 = arith.constant 0 : i32
    return %c0_i32, %c0_i32_0, %c0_i32_1 : i32, i32, i32
  }
  func.func @transform_8(%arg0: i32) -> (i32, i32, i32) {
    %c0_i32 = arith.constant 0 : i32
    %c0_i32_0 = arith.constant 0 : i32
    %c0_i32_1 = arith.constant 0 : i32
    %c0_i32_2 = arith.constant 0 : i32
    return %c0_i32, %c0_i32_0, %c0_i32_1 : i32, i32, i32
  }
  func.func @transform_9(%arg0: i32) -> (i32, i32, i32) {
    %c0_i32 = arith.constant 0 : i32
    %c0_i32_0 = arith.constant 0 : i32
    %c0_i32_1 = arith.constant 0 : i32
    %c0_i32_2 = arith.constant 0 : i32
    return %c0_i32, %c0_i32_0, %c0_i32_1 : i32, i32, i32
  }
  func.func @transform_10(%arg0: i32) -> (i32, i32, i32) {
    %c0_i32 = arith.constant 0 : i32
    %c0_i32_0 = arith.constant 0 : i32
    %c0_i32_1 = arith.constant 0 : i32
    %c0_i32_2 = arith.constant 0 : i32
    return %c0_i32, %c0_i32_0, %c0_i32_1 : i32, i32, i32
  }
  func.func @transform_11(%arg0: i32) -> (i32, i32, i32) {
    %c0_i32 = arith.constant 0 : i32
    %c0_i32_0 = arith.constant 0 : i32
    %c0_i32_1 = arith.constant 0 : i32
    %c0_i32_2 = arith.constant 0 : i32
    return %c0_i32, %c0_i32_0, %c0_i32_1 : i32, i32, i32
  }
  func.func @transform_12(%arg0: i32) -> (i32, i32, i32) {
    %c0_i32 = arith.constant 0 : i32
    %c0_i32_0 = arith.constant 0 : i32
    %c0_i32_1 = arith.constant 0 : i32
    %c0_i32_2 = arith.constant 0 : i32
    return %c0_i32, %c0_i32_0, %c0_i32_1 : i32, i32, i32
  }
  func.func @transform_13(%arg0: i32) -> (i32, i32, i32) {
    %c0_i32 = arith.constant 0 : i32
    %c0_i32_0 = arith.constant 0 : i32
    %c0_i32_1 = arith.constant 0 : i32
    %c0_i32_2 = arith.constant 0 : i32
    return %c0_i32, %c0_i32_0, %c0_i32_1 : i32, i32, i32
  }
  func.func @transform_14(%arg0: i32) -> (i32, i32, i32) {
    %c0_i32 = arith.constant 0 : i32
    %c0_i32_0 = arith.constant 0 : i32
    %c0_i32_1 = arith.constant 0 : i32
    %c0_i32_2 = arith.constant 0 : i32
    return %c0_i32, %c0_i32_0, %c0_i32_1 : i32, i32, i32
  }
  func.func @transform_15(%arg0: i32) -> (i32, i32, i32) {
    %c0_i32 = arith.constant 0 : i32
    %c0_i32_0 = arith.constant 0 : i32
    %c0_i32_1 = arith.constant 0 : i32
    %c0_i32_2 = arith.constant 0 : i32
    return %c0_i32, %c0_i32_0, %c0_i32_1 : i32, i32, i32
  }
  func.func @transform_16(%arg0: i32) -> (i32, i32, i32) {
    %c0_i32 = arith.constant 0 : i32
    %c0_i32_0 = arith.constant 0 : i32
    %c0_i32_1 = arith.constant 0 : i32
    %c0_i32_2 = arith.constant 0 : i32
    return %c0_i32, %c0_i32_0, %c0_i32_1 : i32, i32, i32
  }
  func.func @transform_17(%arg0: i32) -> (i32, i32, i32) {
    %c0_i32 = arith.constant 0 : i32
    %c0_i32_0 = arith.constant 0 : i32
    %c0_i32_1 = arith.constant 0 : i32
    %c0_i32_2 = arith.constant 0 : i32
    return %c0_i32, %c0_i32_0, %c0_i32_1 : i32, i32, i32
  }
  func.func @transform_18(%arg0: i32) -> (i32, i32, i32) {
    %c0_i32 = arith.constant 0 : i32
    %c0_i32_0 = arith.constant 0 : i32
    %c0_i32_1 = arith.constant 0 : i32
    %c0_i32_2 = arith.constant 0 : i32
    return %c0_i32, %c0_i32_0, %c0_i32_1 : i32, i32, i32
  }
  func.func @transform_19(%arg0: i32) -> (i32, i32, i32) {
    %c0_i32 = arith.constant 0 : i32
    %c0_i32_0 = arith.constant 0 : i32
    %c0_i32_1 = arith.constant 0 : i32
    %c0_i32_2 = arith.constant 0 : i32
    return %c0_i32, %c0_i32_0, %c0_i32_1 : i32, i32, i32
  }
  func.func @transform_20(%arg0: i32) -> (i32, i32, i32) {
    %c0_i32 = arith.constant 0 : i32
    %c0_i32_0 = arith.constant 0 : i32
    %c0_i32_1 = arith.constant 0 : i32
    %c0_i32_2 = arith.constant 0 : i32
    return %c0_i32, %c0_i32_0, %c0_i32_1 : i32, i32, i32
  }
  func.func @transform_21(%arg0: i32) -> (i32, i32, i32) {
    %c0_i32 = arith.constant 0 : i32
    %c0_i32_0 = arith.constant 0 : i32
    %c0_i32_1 = arith.constant 0 : i32
    %c0_i32_2 = arith.constant 0 : i32
    return %c0_i32, %c0_i32_0, %c0_i32_1 : i32, i32, i32
  }
  func.func @transform_22(%arg0: i32) -> (i32, i32) {
    %c0_i32 = arith.constant 0 : i32
    %c0_i32_0 = arith.constant 0 : i32
    %c0_i32_1 = arith.constant 0 : i32
    return %c0_i32, %c0_i32_0 : i32, i32
  }
  func.func @transform_23(%arg0: i32) -> (i32, i32) {
    %c0_i32 = arith.constant 0 : i32
    %c0_i32_0 = arith.constant 0 : i32
    %c0_i32_1 = arith.constant 0 : i32
    return %c0_i32, %c0_i32_0 : i32, i32
  }
  func.func @transform_24(%arg0: i32) -> (i32, i32, i32) {
    %c0_i32 = arith.constant 0 : i32
    %c0_i32_0 = arith.constant 0 : i32
    %c0_i32_1 = arith.constant 0 : i32
    return %arg0, %c0_i32, %c0_i32_0 : i32, i32, i32
  }
  func.func @transform_25(%arg0: i32) -> (i32, i32, i32, i32) {
    %c0_i32 = arith.constant 0 : i32
    %c0_i32_0 = arith.constant 0 : i32
    %c0_i32_1 = arith.constant 0 : i32
    %c0_i32_2 = arith.constant 0 : i32
    return %arg0, %c0_i32, %c0_i32_0, %c0_i32_1 : i32, i32, i32, i32
  }
}

</mosaic_0001>

<bundles_post_ra>
// kernel: decoder_forward.1
= control target key start
LH: loop header
LB: loop body
LE: loop exit
PB: predicated region body
PF: predicated region fallthrough
CT: control target
= control target key end

     0   :  { %s7335_s0 = inlined_call_operand.vmem [shape: f32[2,8,32], index: 0, kind: input, shape index: {}]   ;;  %s7336_s1 = inlined_call_operand.vmem [shape: f32[2,12,32], index: 1, kind: input, shape index: {}]   ;;  %s7337_s2 = inlined_call_operand.vmem [shape: f32[2,8,8], index: 2, kind: input, shape index: {}]   ;;  %s7338_s3 = inlined_call_operand.vmem [shape: f32[2,1,12], index: 3, kind: input, shape index: {}]   ;;  %s7339_s4 = inlined_call_operand.vmem [shape: f32[2,32,96], index: 4, kind: input, shape index: {}]   ;;  %s7340_s5 = inlined_call_operand.vmem [shape: f32[2,1,96], index: 5, kind: input, shape index: {}]   ;;  %s7341_s6 = inlined_call_operand.vmem [shape: f32[2,32,32], index: 6, kind: input, shape index: {}]   ;;  %s7342_s7 = inlined_call_operand.vmem [shape: f32[2,1,32], index: 7, kind: input, shape index: {}]   ;;  %s7343_s8 = inlined_call_operand.vmem [shape: f32[2,1,32], index: 8, kind: input, shape index: {}]   ;;  %s7344_s9 = inlined_call_operand.vmem [shape: f32[2,1,32], index: 9, kind: input, shape index: {}]   ;;  %s7345_s10 = inlined_call_operand.vmem [shape: f32[2,32,96], index: 10, kind: input, shape index: {}]   ;;  %s7346_s11 = inlined_call_operand.vmem [shape: f32[2,1,96], index: 11, kind: input, shape index: {}]   ;;  %s7347_s12 = inlined_call_operand.vmem [shape: f32[2,32,32], index: 12, kind: input, shape index: {}]   ;;  %s7348_s13 = inlined_call_operand.vmem [shape: f32[2,1,32], index: 13, kind: input, shape index: {}]   ;;  %s7349_s14 = inlined_call_operand.vmem [shape: f32[2,1,32], index: 14, kind: input, shape index: {}]   ;;  %s7350_s15 = inlined_call_operand.vmem [shape: f32[2,1,32], index: 15, kind: input, shape index: {}]   ;;  %s7351_s16 = inlined_call_operand.vmem [shape: f32[2,32,64], index: 16, kind: input, shape index: {}]   ;;  %s7352_s17 = inlined_call_operand.vmem [shape: f32[2,1,64], index: 17, kind: input, shape index: {}]   ;;  %s7353_s18 = inlined_call_operand.vmem [shape: f32[2,64,32], index: 18, kind: input, shape index: {}]   ;;  %s7354_s19 = inlined_call_operand.vmem [shape: f32[2,1,32], index: 19, kind: input, shape index: {}]   ;;  %s7355_s20 = inlined_call_operand.vmem [shape: f32[2,1,32], index: 20, kind: input, shape index: {}]   ;;  %s7356_s21 = inlined_call_operand.vmem [shape: f32[2,1,32], index: 21, kind: input, shape index: {}]   ;;  %s7357_s22 = inlined_call_operand.vmem [shape: f32[32,64], index: 22, kind: input, shape index: {}]   ;;  %s7358_s23 = inlined_call_operand.vmem [shape: f32[1,64], index: 23, kind: input, shape index: {}]   ;;  %s7359_s24 = inlined_call_operand.hbm [shape: f32[2,8,64], index: 24, kind: output, shape index: {0}]   ;;  %s7360_s25 = inlined_call_operand.hbm [shape: f32[2,4,8,12], index: 25, kind: output, shape index: {1}]  }
   0x1   :  { %7402 = sst [smem:[#allocation17_spill]] %s7335_s0 }
   0x2   :  { %7403 = sst [smem:[#allocation18_spill]] %s7336_s1 }
   0x3   :  { %7404 = sst [smem:[#allocation19_spill]] %s7337_s2 }
   0x4   :  { %7405 = sst [smem:[#allocation20_spill]] %s7338_s3 }
   0x5   :  { %7406 = sst [smem:[#allocation21_spill]] %s7339_s4 }
   0x6   :  { %7407 = sst [smem:[#allocation22_spill]] %s7340_s5 }
   0x7   :  { %7408 = sst [smem:[#allocation23_spill]] %s7341_s6 }
   0x8   :  { %7409 = sst [smem:[#allocation24_spill]] %s7342_s7 }
   0x9   :  { %7410 = sst [smem:[#allocation25_spill]] %s7343_s8 }
   0xa   :  { %7411 = sst [smem:[#allocation26_spill]] %s7344_s9 }
   0xb   :  { %7412 = sst [smem:[#allocation27_spill]] %s7345_s10 }
   0xc   :  { %7413 = sst [smem:[#allocation28_spill]] %s7347_s12 }
   0xd   :  { %7414 = sst [smem:[#allocation29_spill]] %s7348_s13 }
   0xe   :  { %7415 = sst [smem:[#allocation30_spill]] %s7357_s22 }
   0xf   :  { %7416 = sst [smem:[#allocation31_spill]] %s7358_s23 }
  0x10   :  { %7417 = sst [smem:[#allocation32_spill]] %s7359_s24 }
  0x11   :  { %7418 = sst [smem:[#allocation33_spill]] %s7360_s25 }
  0x12   :  { %31 = vsyncpa [#allocation3], 0 }
  0x13   :  { %33 = vsyncpa [#allocation3 + $0x1], 0 }
  0x14   :  { %34 = vsyncpa [#allocation5], 0 }
  0x15   :  { %36 = vsyncpa [#allocation5 + $0x1], 0  ;;  %s6363_s29 = smov 0   ;;  %s6365_s2 = smov 0  }
  0x16   :  { %s6367_s6 = smov 0   ;;  %s6369_s30 = smov 0  }
  0x17 LB: > { %7419 = sst [smem:[#allocation8_spill]] %s6205_s29  ;;  %s6384_s7 = sadd.s32 4294967295, %s6217_s30   ;;  %s6217_s30 = sphi %s6369_s30, %s7466_s30   ;;  %s6213_s6 = sphi %s6367_s6, %s7469_s6   ;;  %s6209_s2 = sphi %s6365_s2, %s7468_s2   ;;  %s6205_s29 = sphi %s6363_s29, %s7467_s29  }
  0x18   : > { %7420 = sst [smem:[#allocation9_spill]] %s6209_s2  ;;  %s5291_s3 = sadd.s32 4294967294, %s6217_s30  }
  0x19   : > { %7421 = sst [smem:[#allocation10_spill]] %s6213_s6  ;;  %s6388_s26 = sadd.s32 1, %s6217_s30  }
  0x1a   : > { %7422 = sst [smem:[#allocation11_spill]] %s6217_s30  ;;  %s573_s1 = sadd.s32 1, %s6213_s6 }
  0x1b   : > { %7423 = sst [smem:[#allocation12_spill]] %s6384_s7  ;;  %s570_s8 = ssub.s32 %s6217_s30, %s6388_s26 }
  0x1c   : > { %7424 = sst [smem:[#allocation13_spill]] %s6388_s26  ;;  %p583_p0 = scmp.ne.s32.totalorder %s6213_s6, %s6209_s2 }
  0x1d   : > { %p571_p1 = scmp.eq.s32.totalorder %s570_s8, 0  ;;  %p584_p2 = scmp.eq.s32.totalorder %s6384_s7, 1 }
  0x1e   : > { %p589_p3 = scmp.ne.s32.totalorder %s6209_s2, %s6205_s29  ;;  %p590_p4 = scmp.eq.s32.totalorder %s5291_s3, 1 }
  0x1f   : > { %s6399_s27 = scalar_select %p571_p1, %s6213_s6, %s573_s1  }
  0x20   : > { %p6401_p5 = por %p584_p2, %p583_p0  ;;  %p6405_p6 = por %p590_p4, %p589_p3 }
  0x21   : > { %7425 = sst [smem:[#allocation14_spill]] %s6399_s27  ;;  %p5294_p7 = scmp.ge.s32.totalorder %s6217_s30, 1 }
  0x22   : > { %s7426_s4 = scalar_select %p6401_p5, 1, 0 }
  0x23   : > { %s7428_s28 = scalar_select %p6405_p6, 1, 0 }
  0x24   : > { %7427 = sst [smem:[#allocation15_spill]] %s7426_s4  ;;  %p722_p8 = scmp.lt.s32.totalorder %s6217_s30, 3 }
  0x25   : > { %7429 = sst [smem:[#allocation16_spill]] %s7428_s28 }
  0x26   : > { %p723_p9 = pnand %p5294_p7, %p722_p8 }
  0x27   : > { %s7430_s0 = sld [smem:[#allocation21_spill]] (!%p723_p9)  ;;  %p806_p10 = scmp.lt.s32.totalorder (!%p723_p9), %s6384_s7, 1 }
  0x28   : > { %726 = sbr.rel (%p723_p9) target bundleno = 8466 (0x2112), region = 116  ;;  %s7431_s28 = sld [smem:[#allocation17_spill]] (!%p723_p9) }
  0x29   : > { %s7432_s5 = sld [smem:[#allocation22_spill]] (!%p723_p9)  ;;  %s7378_s6 = smov (!%p723_p9), 120  }
  0x2a   : > { %s7380_s26 = smov (!%p723_p9), 96   ;;  %s7433_s9 = sld [smem:[#allocation19_spill]] (!%p723_p9) }
  0x2b   : > { %s7434_s27 = sld [smem:[#allocation23_spill]] (!%p723_p9)  ;;  %s7386_s1 = smov (!%p723_p9), 8  }
  0x2c   : > { %s7435_s10 = sld [smem:[#allocation27_spill]] (!%p723_p9)  ;;  %s7447_s22 = smov (!%p723_p9), 8  }
  0x2d   : > { %v830_v0 = vld [vmem:[%s7430_s0 + $0x18] sm:$0xff]  ;;  %v6219_v1 = vmov 0.0   ;;  %v829_v2 = vld [vmem:[%s7430_s0 + $0x10] sm:$0xff]  ;;  %vm6220_vm0 = vmmov 0   ;;  %s6422_s8 = scalar_select %p806_p10, %s6384_s7, 1  ;;  %v828_v3 = vld [vmem:[%s7430_s0 + $0x8] sm:$0xff] }
  0x2e   : > { %5621 = vmatprep.subr.mxu0 %v6219_v1  ;;  %5629 = vmatprep.mubr.msk.f32.mxu0 %vm6220_vm0, %v6219_v1  ;;  %v827_v4 = vld [vmem:[%s7430_s0] sm:$0xff]  ;;  %vm838_vm1 = vcmask 261120   ;;  %vm926_vm2 = vcmask 64512   ;;  %vm1601_vm4 = vcmask 130048   ;;  %vm1603_vm5 = vcmask 195584   ;;  %s7437_s30 = sld [smem:[#allocation24_spill]] }
  0x2f   : > { %5622 = vmatpush3.msra.mxu0 %v830_v0  ;;  %5632 = vmatprep.subr.mxu1 %v6219_v1  ;;  %s5297_s3 = sshll.u32 %s6422_s8, 3  ;;  %v5301_v6 = vld [vmem:[%s7432_s5] ss:$0 sm:$0xff]  ;;  %s7445_s25 = sld [smem:[#allocation20_spill]]  ;;  %vm2244_vm8 = vcmask 97280   ;;  %vm2297_vm9 = vcmask 1043456  }
  0x30   : > { %5623 = vmatprep.subr.mxu0 %v6219_v1  ;;  %5634 = vmatprep.mubr.msk.f32.mxu1 %vm6220_vm0, %v6219_v1  ;;  %s809_s29 = scalar_lea.vmem %s7431_s28, %s5297_s3  ;;  %s7376_s28 = smov 112   ;;  %vm2834_vm10 = vcmask 523264  }
  0x31   : > { %5624 = vmatpush3.msra.mxu0 %v829_v2  ;;  %v6441_v5 = vld [vmem:[%s809_s29] sm:$0xff]  ;;  %s7372_s29 = smov 104   ;;  %s7446_s12 = sld [smem:[#allocation28_spill]] }
  0x32   : > { %5625 = vmatprep.subr.mxu0 %v6219_v1  ;;  %s7448_s7 = smov 16   ;;  %s7450_s13 = sld [smem:[#allocation29_spill]] }
  0x33   : > { %5626 = vmatpush3.msra.mxu0 %v828_v3  ;;  %s7451_s23 = smov 64   ;;  %s7452_s2 = sld [smem:[#allocation26_spill]] }
  0x34   : > { %5627 = vmatprep.subr.mxu0 %v6219_v1  ;;  %s7438_s24 = smov %s7437_s30 }
  0x35   : > { %5628 = vmatpush3.msra.mxu0 %v827_v4  ;;  %s821_s4 = scalar_lea.vmem %s7445_s25, %s6422_s8  ;;  %s7457_s25 = sld [smem:[#allocation12_spill]] }
  0x36   : > { %5630 = vmatmul.mubr.msk.f32.vlgmr.msra.gmra.mxu0 %vm838_vm1, %v6441_v5  ;;  %5652 = vmatprep.subr.mxu0 %v6219_v1 }
  0x37   : > { %5654 = vmatprep.mubr.msk.f32.mxu0 %vm6220_vm0, %v6219_v1 }
  0xf6   : > { %v908_v7 = vpop.f32.mrf.mxu0 }
  0xf7   : > { %v6452_v8 = vadd.f32 %v5301_v6, %v908_v7 }
  0xf8   : > { %v5631_v9 = vpop.f32.mrf.mxu0 }
  0xf9   : > { %922 = vrot.lane.b32.xlu1 %v6452_v8, %s7372_s29  ;;  %918 = vrot.lane.b32.xlu0 %v6452_v8, %s7378_s6  ;;  %s818_s29 = scalar_lea.vmem %s7433_s9, %s5297_s3  ;;  %s7374_s3 = smov 64  }
  0xfa   : > { %v6499_v17 = vld [vmem:[%s818_s29] sm:$0xff]  ;;  %s7382_s6 = smov 24   ;;  %s7441_s29 = sld [smem:[#allocation26_spill]] }
  0xfb   : > { %vm1233_vm3 = vcmp.eq.f32.partialorder %v6499_v17, 0.0 }
  0xfd   : > { %924 = vrot.lane.b32.xlu1 %v6452_v8, %s7380_s26  ;;  %920 = vrot.lane.b32.xlu0 %v6452_v8, %s7376_s28 }
 0x16b   : > { %v6462_v10 = vpop.permute.xlu1 %922  ;;  %v919_v11 = vpop.permute.xlu0 %918 }
 0x16c   : > { %1001 = vrot.lane.b32.xlu0 %v919_v11, %s7380_s26 }
 0x16f   : > { %v925_v12 = vpop.permute.xlu1 %924  ;;  %v6465_v13 = vpop.permute.xlu0 %920 }
 0x170   : > { %5633 = vmatpush3.xpose.msk.msra.mxu1 %vm926_vm2, %v925_v12  ;;  %1153 = vrot.lane.b32.xlu0 %v6462_v10, %s7380_s26 }
 0x171   : > { %1077 = vrot.lane.b32.xlu1 %v6465_v13, %s7380_s26  ;;  %5637 = vmatprep.subr.mxu1 %v6219_v1  ;;  %s7439_s26 = sld [smem:[#allocation18_spill]] }
 0x173   : > { %5635 = vmatmul.mubr.msk.f32.vlgmr.msra.gmra.mxu1 %vm926_vm2, %v6452_v8 }
 0x174   : > { %5639 = vmatprep.mubr.msk.f32.mxu1 %vm6220_vm0, %v6219_v1 }
 0x1de   : > { %v1002_v14 = vpop.permute.xlu0 %1001 }
 0x1df   : > { %5638 = vmatpush3.xpose.msk.msra.mxu1 %vm926_vm2, %v1002_v14  ;;  %v915_v14 = vld [vmem:[%s7434_s27 + $0x18] sm:$0xff] }
 0x1e0   : > { %5642 = vmatprep.subr.mxu1 %v6219_v1 }
 0x1e2   : > { %5640 = vmatmul.mubr.msk.f32.vlgmr.msra.gmra.mxu1 %vm926_vm2, %v919_v11  ;;  %v1154_v16 = vpop.permute.xlu0 %1153 }
 0x1e3   : > { %v1078_v15 = vpop.permute.xlu1 %1077  ;;  %5644 = vmatprep.mubr.msk.f32.mxu1 %vm6220_vm0, %v6219_v1 }
 0x1e4   : > { %5643 = vmatpush3.xpose.msk.msra.mxu1 %vm926_vm2, %v1078_v15  ;;  %v914_v15 = vld [vmem:[%s7434_s27 + $0x10] sm:$0xff] }
 0x1e5   : > { %5647 = vmatprep.subr.mxu1 %v6219_v1 }
 0x1e7   : > { %5645 = vmatmul.mubr.msk.f32.vlgmr.msra.gmra.mxu1 %vm926_vm2, %v6465_v13 }
 0x1e8   : > { %5648 = vmatpush3.xpose.msk.msra.mxu1 %vm926_vm2, %v1154_v16  ;;  %5649 = vmatprep.mubr.msk.f32.mxu1 %vm6220_vm0, %v6219_v1  ;;  %v913_v16 = vld [vmem:[%s7434_s27 + $0x8] sm:$0xff] }
 0x1e9   : > { %5657 = vmatprep.subr.mxu1 %v6219_v1 }
 0x1eb   : > { %5650 = vmatmul.mubr.msk.f32.vlgmr.msra.gmra.mxu1 %vm926_vm2, %v6462_v10 }
 0x1ec   : > { %5659 = vmatprep.mubr.msk.f32.mxu1 %vm6220_vm0, %v6219_v1 }
 0x233   : > { %v997_v18 = vpop.f32.mrf.mxu1 }
 0x234   : > { %v1229_v19 = vmul.f32 0.35355338, %v997_v18  ;;  %v912_v18 = vld [vmem:[%s7434_s27] sm:$0xff] }
 0x235   : > { %v5636_v20 = vpop.f32.mrf.mxu1 }
 0x236   : > { %v1236_v21 = vsel %vm1233_vm3, -1e+10, %v1229_v19 }
 0x237   : > { %v1240_v22 = vsel %vm926_vm2, %v1236_v21, -inf }
 0x238   : > { %1241 = vmax.xlane.f32.xlu1 %v1240_v22 }
 0x2a2   : > { %v1073_v23 = vpop.f32.mrf.mxu1 }
 0x2a3   : > { %v1230_v24 = vmul.f32 0.35355338, %v1073_v23 }
 0x2a4   : > { %v5641_v25 = vpop.f32.mrf.mxu1 }
 0x2a5   : > { %v1237_v26 = vsel %vm1233_vm3, -1e+10, %v1230_v24 }
 0x2a6   : > { %v1243_v27 = vsel %vm926_vm2, %v1237_v26, -inf }
 0x2a7   : > { %v1149_v28 = vpop.f32.mrf.mxu1  ;;  %1244 = vmax.xlane.f32.xlu0 %v1243_v27 }
 0x2a8   : > { %v1231_v29 = vmul.f32 0.35355338, %v1149_v28 }
 0x2a9   : > { %v5646_v30 = vpop.f32.mrf.mxu1 }
 0x2aa   : > { %v1238_v31 = vsel %vm1233_vm3, -1e+10, %v1231_v29 }
 0x2ab   : > { %v1225_v32 = vpop.f32.mrf.mxu1  ;;  %v1246_v33 = vsel %vm926_vm2, %v1238_v31, -inf }
 0x2ac   : > { %v1232_v34 = vmul.f32 0.35355338, %v1225_v32  ;;  %1247 = vmax.xlane.f32.xlu0 %v1246_v33  ;;  %v1717_v32 = vld [vmem:[%s7435_s10 + $0x10] sm:$0xff]  ;;  %v5315_v33 = vld [vmem:[%s7437_s30] ss:$0 sm:$0xff]  ;;  %s5454_s30 = sshll.u32 %s6422_s8, 4 }
 0x2ad   : > { %v5651_v35 = vpop.f32.mrf.mxu1  ;;  %s6592_s28 = scalar_lea.vmem %s7439_s26, %s5454_s30  ;;  %s7442_s30 = smov 120  }
 0x2ae   : > { %v1239_v36 = vsel %vm1233_vm3, -1e+10, %v1232_v34  ;;  %s7444_s26 = smov 104   ;;  %s7449_s8 = smov 24  }
 0x2af   : > { %v1249_v37 = vsel %vm926_vm2, %v1239_v36, -inf }
 0x2b0   : > { %1250 = vmax.xlane.f32.xlu1 %v1249_v37 }
 0x2c1   : > { %1360 = vrot.lane.b32.xlu1 %v919_v11, %s7374_s3  ;;  %v1242_v38 = vpop.xlane.xlu1 %1241 }
 0x2c2   : > { %1284 = vrot.lane.b32.xlu0 %v6452_v8, %s7374_s3  ;;  %v1252_v39 = vsub.f32 %v1236_v21, %v1242_v38 }
 0x2c4   : > { %v1256_v40 = vmul.f32 1.442695, %v1252_v39  ;;  %v1716_v39 = vld [vmem:[%s7435_s10 + $0x8] sm:$0xff] }
 0x2c6   : > { %6050 = vpow2.f32 %v1256_v40  ;;  %v1715_v40 = vld [vmem:[%s7435_s10] sm:$0xff] }
 0x2d3   : > { %v6051_v41 = vpop.eup %6050 }
 0x2d4   : > { %v1264_v42 = vsel %vm926_vm2, %v6051_v41, 0.0 }
 0x2e1   : > { %1265 = vadd.xlane.f32.xlu0 %v1264_v42 }
 0x330   : > { %v1245_v43 = vpop.xlane.xlu0 %1244 }
 0x331   : > { %v1253_v44 = vsub.f32 %v1237_v26, %v1245_v43 }
 0x333   : > { %v1258_v45 = vmul.f32 1.442695, %v1253_v44 }
 0x335   : > { %6052 = vpow2.f32 %v1258_v45  ;;  %v1248_v46 = vpop.xlane.xlu0 %1247 }
 0x336   : > { %v1254_v47 = vsub.f32 %v1238_v31, %v1248_v46  ;;  %v1718_v31 = vld [vmem:[%s7435_s10 + $0x18] sm:$0xff] }
 0x338   : > { %v1260_v48 = vmul.f32 1.442695, %v1254_v47 }
 0x339   : > { %v1251_v49 = vpop.xlane.xlu1 %1250  ;;  %v1285_v50 = vpop.permute.xlu0 %1284 }
 0x33a   : > { %6054 = vpow2.f32 %v1260_v48  ;;  %v1255_v51 = vsub.f32 %v1239_v36, %v1251_v49  ;;  %5653 = vmatpush3.msra.mxu0 %v1285_v50  ;;  %v6595_v48 = vld [vmem:[%s6592_s28] sm:$0xff] }
 0x33b   : > { %5662 = vmatprep.subr.mxu0 %v6219_v1  ;;  %v5319_v49 = vld [vmem:[%s7346_s11] ss:$0 sm:$0xff] }
 0x33c   : > { %v1262_v52 = vmul.f32 1.442695, %v1255_v51 }
 0x33d   : > { %v1361_v53 = vpop.permute.xlu1 %1360 }
 0x33e   : > { %6056 = vpow2.f32 %v1262_v52  ;;  %5658 = vmatpush3.msra.mxu1 %v1361_v53 }
 0x33f   : > { %5667 = vmatprep.subr.mxu1 %v6219_v1 }
 0x342   : > { %v6053_v54 = vpop.eup %6052 }
 0x343   : > { %v1267_v55 = vsel %vm926_vm2, %v6053_v54, 0.0 }
 0x344   : > { %1268 = vadd.xlane.f32.xlu1 %v1267_v55 }
 0x347   : > { %v6055_v56 = vpop.eup %6054 }
 0x348   : > { %v1270_v57 = vsel %vm926_vm2, %v6055_v56, 0.0 }
 0x349   : > { %1271 = vadd.xlane.f32.xlu0 %v1270_v57 }
 0x34b   : > { %v6057_v58 = vpop.eup %6056 }
 0x34c   : > { %v1273_v59 = vsel %vm926_vm2, %v6057_v58, 0.0 }
 0x34d   : > { %1274 = vadd.xlane.f32.xlu1 %v1273_v59 }
 0x35e   : > { %1436 = vrot.lane.b32.xlu1 %v6465_v13, %s7374_s3 }
 0x35f   : > { %1512 = vrot.lane.b32.xlu0 %v6462_v10, %s7374_s3  ;;  %s7384_s3 = smov 16  }
 0x36a   : > { %v1266_v60 = vpop.xlane.xlu0 %1265 }
 0x36b   : > { %6058 = vrcp.f32 %v1266_v60 }
 0x378   : > { %v6059_v61 = vpop.eup %6058 }
 0x379   : > { %v1277_v62 = vmul.f32 %v6059_v61, %v6051_v41 }
 0x37b   : > { %5655 = vmatmul.mubr.msk.f32.vlgmr.msra.gmra.mxu0 %vm926_vm2, %v1277_v62 }
 0x37c   : > { %5664 = vmatprep.mubr.msk.f32.mxu0 %vm6220_vm0, %v6219_v1 }
 0x3cd   : > { %v1269_v63 = vpop.xlane.xlu1 %1268 }
 0x3ce   : > { %6060 = vrcp.f32 %v1269_v63 }
 0x3d2   : > { %v1272_v0 = vpop.xlane.xlu0 %1271 }
 0x3d3   : > { %6062 = vrcp.f32 %v1272_v0 }
 0x3d6   : > { %v1275_v2 = vpop.xlane.xlu1 %1274  ;;  %v1513_v7 = vpop.permute.xlu0 %1512 }
 0x3d7   : > { %6064 = vrcp.f32 %v1275_v2 }
 0x3da   : > { %v1437_v3 = vpop.permute.xlu1 %1436 }
 0x3db   : > { %v6061_v4 = vpop.eup %6060  ;;  %5663 = vmatpush3.msra.mxu0 %v1437_v3 }
 0x3dc   : > { %v1279_v6 = vmul.f32 %v6061_v4, %v6053_v54  ;;  %5672 = vmatprep.subr.mxu0 %v6219_v1  ;;  %v824_v54 = vld [vmem:[%s6592_s28 + $0x8] sm:$0xf] }
 0x3de   : > { %5660 = vmatmul.mubr.msk.f32.vlgmr.msra.gmra.mxu1 %vm926_vm2, %v1279_v6 }
 0x3df   : > { %5668 = vmatpush3.msra.mxu1 %v1513_v7  ;;  %5669 = vmatprep.mubr.msk.f32.mxu1 %vm6220_vm0, %v6219_v1 }
 0x3e0   : > { %v6063_v8 = vpop.eup %6062  ;;  %5683 = vmatprep.subr.mxu1 %v6219_v1 }
 0x3e1   : > { %v1281_v9 = vmul.f32 %v6063_v8, %v6055_v56 }
 0x3e3   : > { %5665 = vmatmul.mubr.msk.f32.vlgmr.msra.gmra.mxu0 %vm926_vm2, %v1281_v9 }
 0x3e4   : > { %v6065_v10 = vpop.eup %6064  ;;  %5680 = vmatprep.mubr.msk.f32.mxu0 %vm6220_vm0, %v6219_v1  ;;  %5673 = vmatpush3.msra.mxu0 %v915_v14 }
 0x3e5   : > { %v1283_v11 = vmul.f32 %v6065_v10, %v6057_v58  ;;  %5674 = vmatprep.subr.mxu0 %v6219_v1  ;;  %v5318_v58 = vld [vmem:[%s7441_s29] ss:$0 sm:$0xff] }
 0x3e6   : > { %5675 = vmatpush3.msra.mxu0 %v914_v15 }
 0x3e7   : > { %5670 = vmatmul.mubr.msk.f32.vlgmr.msra.gmra.mxu1 %vm926_vm2, %v1283_v11  ;;  %5676 = vmatprep.subr.mxu0 %v6219_v1 }
 0x3e8   : > { %5691 = vmatprep.mubr.msk.f32.mxu1 %vm6220_vm0, %v6219_v1  ;;  %5677 = vmatpush3.msra.mxu0 %v913_v16  ;;  %v2235_v16 = vlaneseq }
 0x3e9   : > { %5678 = vmatprep.subr.mxu0 %v6219_v1  ;;  %5684 = vmatpush3.msra.mxu1 %v1718_v31 }
 0x3ea   : > { %5679 = vmatpush3.msra.mxu0 %v912_v18  ;;  %5685 = vmatprep.subr.mxu1 %v6219_v1  ;;  %v826_v18 = vld [vmem:[%s821_s4] sm:$0x1]  ;;  %s7454_s4 = sld [smem:[#allocation28_spill]] }
 0x3eb   : > { %5686 = vmatpush3.msra.mxu1 %v1717_v32  ;;  %vm2233_vm6 = vcmp.eq.f32.partialorder %v826_v18, 0.0 }
 0x3ec   : > { %5687 = vmatprep.subr.mxu1 %v6219_v1 }
 0x3ed   : > { %5688 = vmatpush3.msra.mxu1 %v1716_v39 }
 0x3ee   : > { %5689 = vmatprep.subr.mxu1 %v6219_v1 }
 0x3ef   : > { %5690 = vmatpush3.msra.mxu1 %v1715_v40 }
 0x3f0   : > { %5705 = vmatprep.subr.mxu1 %v6219_v1 }
 0x43b   : > { %v1356_v12 = vpop.f32.mrf.mxu0 }
 0x43d   : > { %v5656_v13 = vpop.f32.mrf.mxu0 }
 0x49e   : > { %v1432_v19 = vpop.f32.mrf.mxu1 }
 0x49f   : > { %1589 = vrot.lane.b32.xlu1 %v1432_v19, %s7386_s1  ;;  %s7443_s1 = smov 112   ;;  %v2236_v19 = vshrl.u32 %v2235_v16, 7 }
 0x4a0   : > { %v5661_v20 = vpop.f32.mrf.mxu1 }
 0x4a1   : > { %v2237_v20 = vsub.s32 0, %v2236_v19 }
 0x4a3   : > { %v1508_v21 = vpop.f32.mrf.mxu0 }
 0x4a4   : > { %1593 = vrot.lane.b32.xlu0 %v1508_v21, %s7384_s3  ;;  %s7440_s3 = sld [smem:[#allocation25_spill]]  ;;  %v6229_v21 = vmov 0  }
 0x4a5   : > { %v5666_v22 = vpop.f32.mrf.mxu0 }
 0x4a6   : > { %v2234_v22 = vsel %vm2233_vm6, 1, %v6229_v21 }
 0x4a7   : > { %v1584_v23 = vpop.f32.mrf.mxu1 }
 0x4a8   : > { %1597 = vrot.lane.b32.xlu1 %v1584_v23, %s7382_s6  ;;  %s7436_s6 = smov 96   ;;  %v6683_v23 = vrot.slane %v2234_v22, %v2237_v20 }
 0x4a9   : > { %v5671_v24 = vpop.f32.mrf.mxu1 }
 0x4aa   : > { %v5317_v56 = vld [vmem:[%s7440_s3] ss:$0 sm:$0xff]  ;;  %vm2239_vm7 = vcmp.eq.s32.totalorder %v6683_v23, 1 }
 0x4ac   : > { %1807 = vrot.lane.b32.xlu1 %v1717_v32, %s7436_s6 }
 0x511   : > { %v1590_v25 = vpop.permute.xlu1 %1589 }
 0x512   : > { %v1600_v27 = vsel %vm926_vm2, %v1356_v12, %v1590_v25 }
 0x516   : > { %v1594_v26 = vpop.permute.xlu0 %1593 }
 0x517   : > { %v1602_v28 = vsel %vm1601_vm4, %v1600_v27, %v1594_v26 }
 0x51a   : > { %v1598_v29 = vpop.permute.xlu1 %1597 }
 0x51b   : > { %v1604_v30 = vsel %vm1603_vm5, %v1602_v28, %v1598_v29 }
 0x51c   : > { %5681 = vmatmul.mubr.msk.f32.vlgmr.msra.gmra.mxu0 %vm838_vm1, %v1604_v30 }
 0x51d   : > { %5702 = vmatprep.mubr.msk.f32.mxu0 %vm838_vm1, %v6595_v48 }
 0x51e   : > { %v1808_v44 = vpop.permute.xlu1 %1807 }
 0x5dc   : > { %v1680_v34 = vpop.f32.mrf.mxu0 }
 0x5dd   : > { %v1681_v35 = vadd.f32 %v5315_v33, %v1680_v34 }
 0x5de   : > { %v5682_v36 = vpop.f32.mrf.mxu0 }
 0x5df   : > { %v1684_v37 = vadd.f32 %v1681_v35, %v6441_v5 }
 0x5e1   : > { %v1687_v38 = vsel %vm838_vm1, %v1684_v37, 0.0 }
 0x5e2   : > { %1688 = vadd.xlane.f32.xlu0 %v1687_v38 }
 0x5f8   : > { %1809 = vrot.lane.b32.xlu0 %v1718_v31, %s7436_s6 }
 0x5fc   : > { %1805 = vrot.lane.b32.xlu0 %v1716_v39, %s7436_s6 }
 0x600   : > { %1815 = vrot.lane.b32.xlu0 %v5319_v49, %s7436_s6 }
 0x66b   : > { %v1689_v5 = vpop.xlane.xlu0 %1688 }
 0x66c   : > { %v1691_v41 = vmul.f32 0.03125, %v1689_v5 }
 0x66e   : > { %v1692_v42 = vsub.f32 %v1684_v37, %v1691_v41 }
 0x66f   : > { %v1810_v43 = vpop.permute.xlu0 %1809 }
 0x670   : > { %v1693_v45 = vmul.f32 %v1692_v42, %v1692_v42  ;;  %5694 = vmatprep.subr.mxu0 %v1810_v43 }
 0x671   : > { %5695 = vmatpush3.msra.mxu0 %v1810_v43 }
 0x672   : > { %v1694_v46 = vsel %vm838_vm1, %v1693_v45, 0.0  ;;  %5696 = vmatprep.subr.mxu0 %v1808_v44 }
 0x673   : > { %1695 = vadd.xlane.f32.xlu1 %v1694_v46  ;;  %5697 = vmatpush3.msra.mxu0 %v1808_v44  ;;  %v1806_v47 = vpop.permute.xlu0 %1805 }
 0x674   : > { %5698 = vmatprep.subr.mxu0 %v1806_v47 }
 0x675   : > { %5699 = vmatpush3.msra.mxu0 %v1806_v47 }
 0x677   : > { %v1816_v61 = vpop.permute.xlu0 %1815 }
 0x684   : > { %1803 = vrot.lane.b32.xlu1 %v1715_v40, %s7436_s6 }
 0x6fc   : > { %v1696_v50 = vpop.xlane.xlu1 %1695 }
 0x6fd   : > { %v1697_v51 = vmul.f32 0.03125, %v1696_v50 }
 0x6ff   : > { %v1698_v52 = vadd.f32 1e-05, %v1697_v51 }
 0x700   : > { %v1804_v53 = vpop.permute.xlu1 %1803 }
 0x701   : > { %6066 = vrsqrt.f32 %v1698_v52  ;;  %5700 = vmatprep.subr.mxu0 %v1804_v53 }
 0x702   : > { %5701 = vmatpush3.msra.mxu0 %v1804_v53 }
 0x703   : > { %5703 = vmatmul.mubr.msk.f32.vlgmr.msra.gmra.mxu0 %vm838_vm1, %v824_v54  ;;  %5712 = vmatprep.subr.mxu0 %v6219_v1 }
 0x704   : > { %5716 = vmatprep.mubr.msk.f32.mxu0 %vm6220_vm0, %v6219_v1 }
 0x70e   : > { %v6067_v55 = vpop.eup %6066 }
 0x70f   : > { %v1700_v57 = vmul.f32 %v6067_v55, %v1692_v42 }
 0x711   : > { %v1707_v59 = vmul.f32 %v5317_v56, %v1700_v57 }
 0x713   : > { %v6615_v60 = vadd.f32 %v5318_v58, %v1707_v59 }
 0x715   : > { %5692 = vmatmul.mubr.msk.f32.vlgmr.msra.gmra.mxu1 %vm838_vm1, %v6615_v60 }
 0x716   : > { %5709 = vmatprep.mubr.msk.f32.mxu1 %vm6220_vm0, %v6219_v1 }
 0x7c3   : > { %v5704_v62 = vpop.f32.mrf.mxu0 }
 0x7c4   : > { %v6621_v63 = vadd.f32 %v5704_v62, %v1816_v61 }
 0x7c5   : > { %v1890_v0 = vpop.f32.mrf.mxu0 }
 0x7c6   : > { %1915 = vrot.lane.b32.xlu1 %v6621_v63, %s7442_s30  ;;  %5706 = vmatpush3.xpose.msk.msra.mxu1 %vm926_vm2, %v6621_v63  ;;  %v6627_v2 = vadd.f32 %v1890_v0, %v1816_v61 }
 0x7c7   : > { %5707 = vmatprep.subr.mxu1 %v6219_v1 }
 0x7c8   : > { %1913 = vrot.lane.b32.xlu0 %v6627_v2, %s7442_s30 }
 0x7ca   : > { %1919 = vrot.lane.b32.xlu1 %v6621_v63, %s7443_s1  ;;  %5708 = vmatpush3.xpose.msk.msra.mxu1 %vm926_vm2, %v6627_v2 }
 0x7cb   : > { %5719 = vmatprep.subr.mxu1 %v6219_v1 }
 0x7ce   : > { %1923 = vrot.lane.b32.xlu1 %v6621_v63, %s7444_s26 }
 0x7d2   : > { %1921 = vrot.lane.b32.xlu1 %v6627_v2, %s7444_s26 }
 0x7d5   : > { %v1795_v3 = vpop.f32.mrf.mxu1 }
 0x7d6   : > { %v1796_v4 = vadd.f32 %v5319_v49, %v1795_v3 }
 0x7d7   : > { %v5693_v6 = vpop.f32.mrf.mxu1 }
 0x7d8   : > { %1909 = vrot.lane.b32.xlu1 %v1796_v4, %s7444_s26  ;;  %1905 = vrot.lane.b32.xlu0 %v1796_v4, %s7442_s30 }
 0x7d9   : > { %5710 = vmatmul.mubr.msk.f32.vlgmr.msra.gmra.mxu1 %vm926_vm2, %v1796_v4 }
 0x7da   : > { %5723 = vmatprep.mubr.msk.f32.mxu1 %vm6220_vm0, %v6219_v1 }
 0x7dc   : > { %1917 = vrot.lane.b32.xlu0 %v6627_v2, %s7443_s1 }
 0x7e0   : > { %1907 = vrot.lane.b32.xlu0 %v1796_v4, %s7443_s1 }
 0x838   : > { %v1916_v7 = vpop.permute.xlu1 %1915 }
 0x839   : > { %5713 = vmatpush3.xpose.msk.msra.mxu0 %vm926_vm2, %v1916_v7 }
 0x83a   : > { %5714 = vmatprep.subr.mxu0 %v6219_v1  ;;  %v1914_v8 = vpop.permute.xlu0 %1913 }
 0x83c   : > { %v6651_v9 = vpop.permute.xlu1 %1919 }
 0x83d   : > { %5715 = vmatpush3.xpose.msk.msra.mxu0 %vm926_vm2, %v1914_v8  ;;  %5720 = vmatpush3.xpose.msk.msra.mxu1 %vm926_vm2, %v6651_v9 }
 0x83e   : > { %5726 = vmatprep.subr.mxu0 %v6219_v1  ;;  %5721 = vmatprep.subr.mxu1 %v6219_v1 }
 0x840   : > { %v1924_v10 = vpop.permute.xlu1 %1923 }
 0x844   : > { %v6663_v12 = vpop.permute.xlu1 %1921 }
 0x84a   : > { %v1906_v11 = vpop.permute.xlu0 %1905  ;;  %v1910_v14 = vpop.permute.xlu1 %1909 }
 0x84b   : > { %5717 = vmatmul.mubr.msk.f32.vlgmr.msra.gmra.mxu0 %vm926_vm2, %v1906_v11 }
 0x84c   : > { %5727 = vmatpush3.xpose.msk.msra.mxu0 %vm926_vm2, %v1924_v10  ;;  %5730 = vmatprep.mubr.msk.f32.mxu0 %vm6220_vm0, %v6219_v1 }
 0x84d   : > { %5728 = vmatprep.subr.mxu0 %v6219_v1 }
 0x84e   : > { %v6665_v13 = vpop.permute.xlu0 %1917 }
 0x84f   : > { %5722 = vmatpush3.xpose.msk.msra.mxu1 %vm926_vm2, %v6665_v13 }
 0x850   : > { %5729 = vmatpush3.xpose.msk.msra.mxu0 %vm926_vm2, %v6663_v12  ;;  %5733 = vmatprep.subr.mxu1 %v6219_v1 }
 0x851   : > { %5747 = vmatprep.subr.mxu0 %v6219_v1 }
 0x852   : > { %v1908_v15 = vpop.permute.xlu0 %1907 }
 0x853   : > { %5731 = vmatmul.mubr.msk.f32.vlgmr.msra.gmra.mxu0 %vm926_vm2, %v1910_v14  ;;  %5724 = vmatmul.mubr.msk.f32.vlgmr.msra.gmra.mxu1 %vm926_vm2, %v1908_v15 }
 0x854   : > { %5737 = vmatprep.mubr.msk.f32.mxu1 %vm6220_vm0, %v6219_v1  ;;  %5751 = vmatprep.mubr.msk.f32.mxu0 %vm6220_vm0, %v6219_v1 }
 0x899   : > { %v1997_v24 = vpop.f32.mrf.mxu1 }
 0x89a   : > { %v2229_v25 = vmul.f32 0.35355338, %v1997_v24 }
 0x89b   : > { %v5711_v26 = vpop.f32.mrf.mxu1 }
 0x89c   : > { %v2240_v27 = vsel %vm2239_vm7, -1e+10, %v2229_v25 }
 0x89d   : > { %v2245_v28 = vsel %vm2244_vm8, %v2240_v27, -inf }
 0x89e   : > { %2246 = vmax.xlane.f32.xlu0 %v2245_v28  ;;  %v1901_v28 = vld [vmem:[%s7446_s12 + $0x10] sm:$0xff] }
 0x90b   : > { %v2073_v29 = vpop.f32.mrf.mxu0 }
 0x90c   : > { %v2230_v30 = vmul.f32 0.35355338, %v2073_v29  ;;  %v1900_v29 = vld [vmem:[%s7446_s12 + $0x8] sm:$0xff] }
 0x90d   : > { %v5718_v31 = vpop.f32.mrf.mxu0 }
 0x90e   : > { %v2241_v32 = vsel %vm2239_vm7, -1e+10, %v2230_v30  ;;  %v1899_v31 = vld [vmem:[%s7446_s12] sm:$0xff] }
 0x90f   : > { %v2248_v33 = vsel %vm2244_vm8, %v2241_v32, -inf }
 0x910   : > { %2249 = vmax.xlane.f32.xlu1 %v2248_v33 }
 0x913   : > { %v2225_v34 = vpop.f32.mrf.mxu0  ;;  %v2149_v35 = vpop.f32.mrf.mxu1 }
 0x914   : > { %v2232_v36 = vmul.f32 0.35355338, %v2225_v34  ;;  %v2231_v37 = vmul.f32 0.35355338, %v2149_v35 }
 0x915   : > { %v5732_v38 = vpop.f32.mrf.mxu0  ;;  %v5725_v39 = vpop.f32.mrf.mxu1 }
 0x916   : > { %v2242_v40 = vsel %vm2239_vm7, -1e+10, %v2231_v37  ;;  %v2243_v41 = vsel %vm2239_vm7, -1e+10, %v2232_v36 }
 0x917   : > { %v2251_v5 = vsel %vm2244_vm8, %v2242_v40, -inf  ;;  %v2254_v42 = vsel %vm2244_vm8, %v2243_v41, -inf }
 0x918   : > { %2252 = vmax.xlane.f32.xlu0 %v2251_v5 }
 0x91c   : > { %2255 = vmax.xlane.f32.xlu0 %v2254_v42  ;;  %v5343_v42 = vld [vmem:[%s7450_s13] ss:$0 sm:$0xff] }
 0x921   : > { %2291 = vrot.lane.b32.xlu1 %v6621_v63, %s7436_s6 }
 0x925   : > { %2372 = vrot.lane.b32.xlu1 %v1916_v7, %s7436_s6 }
 0x927   : > { %v2247_v43 = vpop.xlane.xlu0 %2246 }
 0x928   : > { %v2257_v44 = vsub.f32 %v2240_v27, %v2247_v43  ;;  %v1902_v27 = vld [vmem:[%s7446_s12 + $0x18] sm:$0xff]  ;;  %s6230_s12 = smov [#allocation4]  }
 0x929   : > { %2370 = vrot.lane.b32.xlu1 %v1914_v8, %s7436_s6  ;;  %s6131_s13 = sshll.u32 %s6230_s12, 4  ;;  %s6132_s13 = int_to_ptr.vmem [resolvable:$false] %s6131_s13 }
 0x92a   : > { %v2261_v45 = vmul.f32 1.442695, %v2257_v44 }
 0x92c   : > { %6068 = vpow2.f32 %v2261_v45 }
 0x92d   : > { %2532 = vrot.lane.b32.xlu1 %v1924_v10, %s7436_s6 }
 0x932   : > { %2289 = vrot.lane.b32.xlu0 %v6627_v2, %s7436_s6 }
 0x936   : > { %2452 = vrot.lane.b32.xlu0 %v6651_v9, %s7436_s6 }
 0x939   : > { %v6069_v46 = vpop.eup %6068 }
 0x93a   : > { %v2269_v47 = vsel %vm2244_vm8, %v6069_v46, 0.0 }
 0x951   : > { %2270 = vadd.xlane.f32.xlu1 %v2269_v47 }
 0x999   : > { %v2250_v49 = vpop.xlane.xlu1 %2249 }
 0x99a   : > { %v2258_v50 = vsub.f32 %v2241_v32, %v2250_v49 }
 0x99c   : > { %v2263_v51 = vmul.f32 1.442695, %v2258_v50 }
 0x99d   : > { %v2292_v52 = vpop.permute.xlu1 %2291 }
 0x99e   : > { %6070 = vpow2.f32 %v2263_v51  ;;  %5734 = vmatpush3.msk.msra.mxu1 %vm2297_vm9, %v2292_v52 }
 0x99f   : > { %5735 = vmatprep.subr.mxu1 %v6219_v1 }
 0x9a1   : > { %v2253_v53 = vpop.xlane.xlu0 %2252  ;;  %v2373_v6 = vpop.permute.xlu1 %2372 }
 0x9a2   : > { %v2259_v54 = vsub.f32 %v2242_v40, %v2253_v53 }
 0x9a4   : > { %v2265_v55 = vmul.f32 1.442695, %v2259_v54  ;;  %v2737_v54 = vld [vmem:[%s7351_s16 + $0x18] sm:$0xff] }
 0x9a5   : > { %v2256_v56 = vpop.xlane.xlu0 %2255  ;;  %v2371_v7 = vpop.permute.xlu1 %2370 }
 0x9a6   : > { %6072 = vpow2.f32 %v2265_v55  ;;  %v2260_v57 = vsub.f32 %v2243_v41, %v2256_v56  ;;  %v2736_v55 = vld [vmem:[%s7351_s16 + $0x10] sm:$0xff]  ;;  %v2734_v56 = vld [vmem:[%s7351_s16] sm:$0xff] }
 0x9a8   : > { %v2267_v58 = vmul.f32 1.442695, %v2260_v57  ;;  %v2826_v57 = vld [vmem:[%s7353_s18 + $0x38] sm:$0xff] }
 0x9a9   : > { %v2290_v59 = vpop.permute.xlu0 %2289  ;;  %v2533_v8 = vpop.permute.xlu1 %2532 }
 0x9aa   : > { %6074 = vpow2.f32 %v2267_v58  ;;  %5736 = vmatpush3.msra.mxu1 %v2290_v59  ;;  %v2825_v58 = vld [vmem:[%s7353_s18 + $0x30] sm:$0xff]  ;;  %v2824_v59 = vld [vmem:[%s7353_s18 + $0x28] sm:$0xff] }
 0x9ab   : > { %v6071_v61 = vpop.eup %6070  ;;  %5740 = vmatprep.subr.mxu1 %v6219_v1 }
 0x9ac   : > { %v2272_v62 = vsel %vm2244_vm8, %v6071_v61, 0.0 }
 0x9ad   : > { %2273 = vadd.xlane.f32.xlu0 %v2272_v62  ;;  %v2453_v63 = vpop.permute.xlu0 %2452  ;;  %v2822_v62 = vld [vmem:[%s7353_s18 + $0x18] sm:$0xff] }
 0x9ae   : > { %5748 = vmatpush3.msk.msra.mxu0 %vm2297_vm9, %v2453_v63 }
 0x9af   : > { %5749 = vmatprep.subr.mxu0 %v6219_v1 }
 0x9b3   : > { %v6073_v0 = vpop.eup %6072 }
 0x9b4   : > { %v2275_v2 = vsel %vm2244_vm8, %v6073_v0, 0.0 }
 0x9b5   : > { %2276 = vadd.xlane.f32.xlu1 %v2275_v2 }
 0x9b7   : > { %v6075_v3 = vpop.eup %6074 }
 0x9b8   : > { %v2278_v4 = vsel %vm2244_vm8, %v6075_v3, 0.0 }
 0x9b9   : > { %2279 = vadd.xlane.f32.xlu0 %v2278_v4  ;;  %v5345_v4 = vld [vmem:[%s7349_s14] ss:$0 sm:$0xff] }
 0x9c6   : > { %2530 = vrot.lane.b32.xlu1 %v6663_v12, %s7436_s6 }
 0x9cf   : > { %2450 = vrot.lane.b32.xlu0 %v6665_v13, %s7436_s6 }
 0x9da   : > { %v2271_v9 = vpop.xlane.xlu1 %2270 }
 0x9db   : > { %6076 = vrcp.f32 %v2271_v9 }
 0x9e8   : > { %v6077_v10 = vpop.eup %6076 }
 0x9e9   : > { %v2282_v11 = vmul.f32 %v6077_v10, %v6069_v46  ;;  %v2821_v10 = vld [vmem:[%s7353_s18 + $0x10] sm:$0xff] }
 0x9eb   : > { %5738 = vmatmul.mubr.msk.f32.vlgmr.msra.gmra.mxu1 %vm2244_vm8, %v2282_v11  ;;  %v2820_v11 = vld [vmem:[%s7353_s18 + $0x8] sm:$0xff] }
 0x9ec   : > { %5741 = vmatpush3.msk.msra.mxu1 %vm2297_vm9, %v2373_v6  ;;  %5744 = vmatprep.mubr.msk.f32.mxu1 %vm6220_vm0, %v6219_v1 }
 0x9ed   : > { %5742 = vmatprep.subr.mxu1 %v6219_v1 }
 0x9ee   : > { %5743 = vmatpush3.msra.mxu1 %v2371_v7  ;;  %v5346_v7 = vld [vmem:[%s7350_s15] ss:$0 sm:$0xff] }
 0x9ef   : > { %5754 = vmatprep.subr.mxu1 %v6219_v1 }
 0xa36   : > { %v2274_v12 = vpop.xlane.xlu0 %2273 }
 0xa37   : > { %6078 = vrcp.f32 %v2274_v12  ;;  %v2819_v12 = vld [vmem:[%s7353_s18] sm:$0xff] }
 0xa3e   : > { %v2277_v13 = vpop.xlane.xlu1 %2276 }
 0xa3f   : > { %6080 = vrcp.f32 %v2277_v13  ;;  %v5347_v13 = vld [vmem:[%s7352_s17] ss:$0 sm:$0xff] }
 0xa42   : > { %v2280_v14 = vpop.xlane.xlu0 %2279  ;;  %v2531_v19 = vpop.permute.xlu1 %2530 }
 0xa43   : > { %6082 = vrcp.f32 %v2280_v14 }
 0xa44   : > { %v6079_v15 = vpop.eup %6078 }
 0xa45   : > { %v2284_v16 = vmul.f32 %v6079_v15, %v6071_v61  ;;  %v2823_v61 = vld [vmem:[%s7353_s18 + $0x20] sm:$0xff] }
 0xa46   : > { %v2451_v18 = vpop.permute.xlu0 %2450 }
 0xa47   : > { %5745 = vmatmul.mubr.msk.f32.vlgmr.msra.gmra.mxu1 %vm2244_vm8, %v2284_v16  ;;  %5750 = vmatpush3.msra.mxu0 %v2451_v18 }
 0xa48   : > { %5755 = vmatpush3.msk.msra.mxu1 %vm2297_vm9, %v2533_v8  ;;  %5758 = vmatprep.mubr.msk.f32.mxu1 %vm6220_vm0, %v6219_v1 }
 0xa49   : > { %5756 = vmatprep.subr.mxu1 %v6219_v1  ;;  %5761 = vmatprep.subr.mxu0 %v6219_v1 }
 0xa4a   : > { %5757 = vmatpush3.msra.mxu1 %v2531_v19  ;;  %v5349_v19 = vld [vmem:[%s7354_s19] ss:$0 sm:$0xff] }
 0xa4b   : > { %5772 = vmatprep.subr.mxu1 %v6219_v1 }
 0xa4c   : > { %v6081_v20 = vpop.eup %6080 }
 0xa4d   : > { %v2286_v21 = vmul.f32 %v6081_v20, %v6073_v0 }
 0xa4f   : > { %5752 = vmatmul.mubr.msk.f32.vlgmr.msra.gmra.mxu0 %vm2244_vm8, %v2286_v21 }
 0xa50   : > { %v6083_v22 = vpop.eup %6082  ;;  %5769 = vmatprep.mubr.msk.f32.mxu0 %vm6220_vm0, %v6219_v1  ;;  %5762 = vmatpush3.msra.mxu0 %v1902_v27 }
 0xa51   : > { %v2288_v24 = vmul.f32 %v6083_v22, %v6075_v3  ;;  %5763 = vmatprep.subr.mxu0 %v6219_v1 }
 0xa52   : > { %5764 = vmatpush3.msra.mxu0 %v1901_v28 }
 0xa53   : > { %5759 = vmatmul.mubr.msk.f32.vlgmr.msra.gmra.mxu1 %vm2244_vm8, %v2288_v24  ;;  %5765 = vmatprep.subr.mxu0 %v6219_v1 }
 0xa54   : > { %5780 = vmatprep.mubr.msk.f32.mxu1 %vm6220_vm0, %v6219_v1  ;;  %5766 = vmatpush3.msra.mxu0 %v1900_v29 }
 0xa55   : > { %5767 = vmatprep.subr.mxu0 %v6219_v1  ;;  %5773 = vmatpush3.msra.mxu1 %v2737_v54 }
 0xa56   : > { %5768 = vmatpush3.msra.mxu0 %v1899_v31  ;;  %5774 = vmatprep.subr.mxu1 %v6219_v1  ;;  %v5356_v31 = vld [vmem:[%s7430_s0 + $0x38] sm:$0xff] }
 0xa57   : > { %5783 = vmatprep.subr.mxu0 %v6219_v1  ;;  %5775 = vmatpush3.msra.mxu1 %v2736_v55 }
 0xa58   : > { %5776 = vmatprep.subr.mxu1 %v6219_v1 }
 0xaab   : > { %v2366_v25 = vpop.f32.mrf.mxu1 }
 0xaad   : > { %v5739_v26 = vpop.f32.mrf.mxu1 }
 0xb07   : > { %v2446_v30 = vpop.f32.mrf.mxu1 }
 0xb08   : > { %2611 = vrot.lane.b32.xlu0 %v2446_v30, %s7447_s22 }
 0xb09   : > { %v5746_v32 = vpop.f32.mrf.mxu1 }
 0xb0a   : > { %v5355_v32 = vld [vmem:[%s7430_s0 + $0x30] sm:$0xff] }
 0xb0f   : > { %v2526_v33 = vpop.f32.mrf.mxu0 }
 0xb10   : > { %2615 = vrot.lane.b32.xlu1 %v2526_v33, %s7448_s7  ;;  %v5354_v33 = vld [vmem:[%s7430_s0 + $0x28] sm:$0xff] }
 0xb11   : > { %v5753_v34 = vpop.f32.mrf.mxu0 }
 0xb12   : > { %v5353_v34 = vld [vmem:[%s7430_s0 + $0x20] sm:$0xff] }
 0xb13   : > { %v2606_v35 = vpop.f32.mrf.mxu1 }
 0xb14   : > { %2619 = vrot.lane.b32.xlu0 %v2606_v35, %s7449_s8 }
 0xb15   : > { %v5760_v36 = vpop.f32.mrf.mxu1 }
 0xb7a   : > { %v2612_v37 = vpop.permute.xlu0 %2611 }
 0xb7b   : > { %v2622_v39 = vsel %vm926_vm2, %v2366_v25, %v2612_v37 }
 0xb82   : > { %v2616_v38 = vpop.permute.xlu1 %2615 }
 0xb83   : > { %v2623_v40 = vsel %vm1601_vm4, %v2622_v39, %v2616_v38  ;;  %v5351_v39 = vld [vmem:[%s7355_s20] ss:$0 sm:$0xff] }
 0xb86   : > { %v2620_v5 = vpop.permute.xlu0 %2619 }
 0xb87   : > { %v2624_v41 = vsel %vm1603_vm5, %v2623_v40, %v2620_v5  ;;  %v5352_v5 = vld [vmem:[%s7356_s21] ss:$0 sm:$0xff] }
 0xb88   : > { %5770 = vmatmul.mubr.msk.f32.vlgmr.msra.gmra.mxu0 %vm838_vm1, %v2624_v41 }
 0xb89   : > { %5799 = vmatprep.mubr.msk.f32.mxu0 %vm6220_vm0, %v6219_v1  ;;  %5784 = vmatpush3.msra.mxu0 %v2826_v57 }
 0xb8a   : > { %5785 = vmatprep.subr.mxu0 %v6219_v1 }
 0xb8b   : > { %5786 = vmatpush3.msra.mxu0 %v2825_v58 }
 0xb8c   : > { %5787 = vmatprep.subr.mxu0 %v6219_v1 }
 0xb8d   : > { %5788 = vmatpush3.msra.mxu0 %v2824_v59 }
 0xb8e   : > { %5789 = vmatprep.subr.mxu0 %v6219_v1 }
 0xb8f   : > { %5790 = vmatpush3.msra.mxu0 %v2823_v61 }
 0xb90   : > { %5791 = vmatprep.subr.mxu0 %v6219_v1 }
 0xb91   : > { %5792 = vmatpush3.msra.mxu0 %v2822_v62 }
 0xb92   : > { %5793 = vmatprep.subr.mxu0 %v6219_v1 }
 0xb93   : > { %5794 = vmatpush3.msra.mxu0 %v2821_v10 }
 0xb94   : > { %5795 = vmatprep.subr.mxu0 %v6219_v1 }
 0xb95   : > { %5796 = vmatpush3.msra.mxu0 %v2820_v11 }
 0xb96   : > { %5797 = vmatprep.subr.mxu0 %v6219_v1 }
 0xb97   : > { %5798 = vmatpush3.msra.mxu0 %v2819_v12 }
 0xb98   : > { %5823 = vmatprep.subr.mxu0 %v6219_v1 }
 0xc48   : > { %v2700_v43 = vpop.f32.mrf.mxu0 }
 0xc49   : > { %v2701_v44 = vadd.f32 %v5343_v42, %v2700_v43  ;;  %v5358_v43 = vld [vmem:[%s7432_s5 + $0x1] ss:$0 sm:$0xff] }
 0xc4a   : > { %v5771_v45 = vpop.f32.mrf.mxu0 }
 0xc4b   : > { %v2704_v46 = vadd.f32 %v2701_v44, %v6615_v60  ;;  %v2735_v60 = vld [vmem:[%s7351_s16 + $0x8] sm:$0xff] }
 0xc4c   : > { %5777 = vmatpush3.msra.mxu1 %v2735_v60 }
 0xc4d   : > { %v2707_v47 = vsel %vm838_vm1, %v2704_v46, 0.0  ;;  %5778 = vmatprep.subr.mxu1 %v6219_v1 }
 0xc4e   : > { %2708 = vadd.xlane.f32.xlu1 %v2707_v47  ;;  %5779 = vmatpush3.msra.mxu1 %v2734_v56 }
 0xc4f   : > { %5802 = vmatprep.subr.mxu1 %v6219_v1 }
 0xcd7   : > { %v2709_v49 = vpop.xlane.xlu1 %2708 }
 0xcd8   : > { %v2710_v50 = vmul.f32 0.03125, %v2709_v49 }
 0xcda   : > { %v2711_v51 = vsub.f32 %v2704_v46, %v2710_v50 }
 0xcdc   : > { %v2712_v52 = vmul.f32 %v2711_v51, %v2711_v51 }
 0xcde   : > { %v2713_v53 = vsel %vm838_vm1, %v2712_v52, 0.0 }
 0xcdf   : > { %2714 = vadd.xlane.f32.xlu0 %v2713_v53 }
 0xd68   : > { %v2715_v63 = vpop.xlane.xlu0 %2714 }
 0xd69   : > { %v2716_v0 = vmul.f32 0.03125, %v2715_v63 }
 0xd6b   : > { %v2717_v2 = vadd.f32 1e-05, %v2716_v0 }
 0xd6d   : > { %6084 = vrsqrt.f32 %v2717_v2 }
 0xd7a   : > { %v6085_v3 = vpop.eup %6084 }
 0xd7b   : > { %v2719_v6 = vmul.f32 %v6085_v3, %v2711_v51 }
 0xd7d   : > { %v2726_v8 = vmul.f32 %v5345_v4, %v2719_v6 }
 0xd7f   : > { %v2733_v9 = vadd.f32 %v5346_v7, %v2726_v8 }
 0xd81   : > { %5781 = vmatmul.mubr.msk.f32.vlgmr.msra.gmra.mxu1 %vm838_vm1, %v2733_v9 }
 0xd82   : > { %5810 = vmatprep.mubr.msk.f32.mxu1 %vm6220_vm0, %v6219_v1  ;;  %5803 = vmatpush3.msra.mxu1 %v5356_v31 }
 0xd83   : > { %5804 = vmatprep.subr.mxu1 %v6219_v1 }
 0xd84   : > { %5805 = vmatpush3.msra.mxu1 %v5355_v32 }
 0xd85   : > { %5806 = vmatprep.subr.mxu1 %v6219_v1 }
 0xd86   : > { %5807 = vmatpush3.msra.mxu1 %v5354_v33 }
 0xd87   : > { %5808 = vmatprep.subr.mxu1 %v6219_v1 }
 0xd88   : > { %5809 = vmatpush3.msra.mxu1 %v5353_v34 }
 0xd89   : > { %5813 = vmatprep.subr.mxu1 %v6219_v1 }
 0xe41   : > { %v2814_v14 = vpop.f32.mrf.mxu1 }
 0xe42   : > { %v2815_v15 = vadd.f32 %v5347_v13, %v2814_v14 }
 0xe43   : > { %v5782_v16 = vpop.f32.mrf.mxu1 }
 0xe44   : > { %v2818_v18 = vmax.f32 %v2815_v15, 0.0 }
 0xe46   : > { %5800 = vmatmul.mubr.msk.f32.vlgmr.msra.gmra.mxu0 %vm2834_vm10, %v2818_v18 }
 0xe47   : > { %5825 = vmatprep.mubr.msk.f32.mxu0 %vm6220_vm0, %v6219_v1 }
 0xf06   : > { %v2904_v20 = vpop.f32.mrf.mxu0 }
 0xf07   : > { %v2905_v21 = vadd.f32 %v5349_v19, %v2904_v20 }
 0xf08   : > { %v5801_v22 = vpop.f32.mrf.mxu0 }
 0xf09   : > { %v2908_v24 = vadd.f32 %v2905_v21, %v2733_v9 }
 0xf0b   : > { %v2911_v25 = vsel %vm838_vm1, %v2908_v24, 0.0 }
 0xf0c   : > { %2912 = vadd.xlane.f32.xlu0 %v2911_v25 }
 0xf95   : > { %v2913_v26 = vpop.xlane.xlu0 %2912 }
 0xf96   : > { %v2914_v27 = vmul.f32 0.03125, %v2913_v26 }
 0xf98   : > { %v2915_v28 = vsub.f32 %v2908_v24, %v2914_v27 }
 0xf9a   : > { %v2916_v29 = vmul.f32 %v2915_v28, %v2915_v28 }
 0xf9c   : > { %v2917_v30 = vsel %vm838_vm1, %v2916_v29, 0.0 }
 0xf9d   : > { %2918 = vadd.xlane.f32.xlu1 %v2917_v30 }
0x1026   : > { %v2919_v35 = vpop.xlane.xlu1 %2918 }
0x1027   : > { %v2920_v36 = vmul.f32 0.03125, %v2919_v35 }
0x1029   : > { %v2921_v37 = vadd.f32 1e-05, %v2920_v36 }
0x102b   : > { %6086 = vrsqrt.f32 %v2921_v37 }
0x1038   : > { %v6087_v38 = vpop.eup %6086 }
0x1039   : > { %v2923_v40 = vmul.f32 %v6087_v38, %v2915_v28 }
0x103b   : > { %v2930_v41 = vmul.f32 %v5351_v39, %v2923_v40 }
0x103d   : > { %v6860_v42 = vadd.f32 %v5352_v5, %v2930_v41 }
0x103f   : > { %5811 = vmatmul.mubr.msk.f32.vlgmr.msra.gmra.mxu1 %vm838_vm1, %v6860_v42 }
0x1040   : > { %5815 = vmatprep.mubr.msk.f32.mxu1 %vm6220_vm0, %v6219_v1 }
0x10ff   : > { %v3020_v44 = vpop.f32.mrf.mxu1 }
0x1100   : > { %v3021_v45 = vadd.f32 %v5358_v43, %v3020_v44 }
0x1101   : > { %v5812_v46 = vpop.f32.mrf.mxu1 }
0x1102   : > { %3034 = vrot.lane.b32.xlu1 %v3021_v45, %s7443_s1  ;;  %3032 = vrot.lane.b32.xlu0 %v3021_v45, %s7442_s30 }
0x1106   : > { %3036 = vrot.lane.b32.xlu1 %v3021_v45, %s7444_s26  ;;  %3038 = vrot.lane.b32.xlu0 %v3021_v45, %s7436_s6 }
0x1174   : > { %v6873_v47 = vpop.permute.xlu1 %3034  ;;  %v6875_v49 = vpop.permute.xlu0 %3032 }
0x1175   : > { %3190 = vrot.lane.b32.xlu0 %v6873_v47, %s7436_s6  ;;  %3114 = vrot.lane.b32.xlu1 %v6875_v49, %s7436_s6 }
0x1178   : > { %v6881_v50 = vpop.permute.xlu1 %3036  ;;  %v3039_v51 = vpop.permute.xlu0 %3038 }
0x1179   : > { %3266 = vrot.lane.b32.xlu1 %v6881_v50, %s7436_s6  ;;  %5814 = vmatpush3.xpose.msk.msra.mxu1 %vm926_vm2, %v3039_v51  ;;  %v5363_v51 = vld [vmem:[%s7434_s27 + $0x38] sm:$0xff] }
0x117a   : > { %5818 = vmatprep.subr.mxu1 %v6219_v1 }
0x117c   : > { %5816 = vmatmul.mubr.msk.f32.vlgmr.msra.gmra.mxu1 %vm926_vm2, %v3021_v45 }
0x117d   : > { %5820 = vmatprep.mubr.msk.f32.mxu1 %vm6220_vm0, %v6219_v1 }
0x11e7   : > { %v3115_v52 = vpop.permute.xlu1 %3114  ;;  %v3191_v53 = vpop.permute.xlu0 %3190 }
0x11e8   : > { %5819 = vmatpush3.xpose.msk.msra.mxu1 %vm926_vm2, %v3115_v52  ;;  %5824 = vmatpush3.xpose.msk.msra.mxu0 %vm926_vm2, %v3191_v53 }
0x11e9   : > { %5828 = vmatprep.subr.mxu1 %v6219_v1  ;;  %5833 = vmatprep.subr.mxu0 %v6219_v1 }
0x11eb   : > { %v3267_v54 = vpop.permute.xlu1 %3266  ;;  %5821 = vmatmul.mubr.msk.f32.vlgmr.msra.gmra.mxu1 %vm926_vm2, %v6875_v49  ;;  %5826 = vmatmul.mubr.msk.f32.vlgmr.msra.gmra.mxu0 %vm926_vm2, %v6873_v47 }
0x11ec   : > { %5829 = vmatpush3.xpose.msk.msra.mxu1 %vm926_vm2, %v3267_v54  ;;  %5830 = vmatprep.mubr.msk.f32.mxu1 %vm6220_vm0, %v6219_v1  ;;  %v5362_v54 = vld [vmem:[%s7434_s27 + $0x30] sm:$0xff] }
0x11ed   : > { %5835 = vmatprep.mubr.msk.f32.mxu0 %vm6220_vm0, %v6219_v1  ;;  %5838 = vmatprep.subr.mxu1 %v6219_v1 }
0x11ef   : > { %5831 = vmatmul.mubr.msk.f32.vlgmr.msra.gmra.mxu1 %vm926_vm2, %v6881_v50 }
0x11f0   : > { %5840 = vmatprep.mubr.msk.f32.mxu1 %vm6220_vm0, %v6219_v1 }
0x123c   : > { %v3110_v55 = vpop.f32.mrf.mxu1 }
0x123d   : > { %v3342_v60 = vmul.f32 0.35355338, %v3110_v55  ;;  %v5361_v55 = vld [vmem:[%s7434_s27 + $0x28] sm:$0xff] }
0x123e   : > { %v5817_v56 = vpop.f32.mrf.mxu1 }
0x123f   : > { %v3346_v57 = vsel %vm1233_vm3, -1e+10, %v3342_v60  ;;  %v5360_v60 = vld [vmem:[%s7434_s27 + $0x20] sm:$0xff] }
0x1240   : > { %v3350_v58 = vsel %vm926_vm2, %v3346_v57, -inf }
0x1241   : > { %3351 = vmax.xlane.f32.xlu0 %v3350_v58 }
0x12ab   : > { %v3186_v59 = vpop.f32.mrf.mxu1  ;;  %v3262_v61 = vpop.f32.mrf.mxu0 }
0x12ac   : > { %v3343_v62 = vmul.f32 0.35355338, %v3186_v59  ;;  %v3344_v63 = vmul.f32 0.35355338, %v3262_v61 }
0x12ad   : > { %v5822_v0 = vpop.f32.mrf.mxu1  ;;  %v5827_v2 = vpop.f32.mrf.mxu0 }
0x12ae   : > { %v3348_v3 = vsel %vm1233_vm3, -1e+10, %v3344_v63  ;;  %v3347_v4 = vsel %vm1233_vm3, -1e+10, %v3343_v62 }
0x12af   : > { %v3338_v6 = vpop.f32.mrf.mxu1  ;;  %v3356_v7 = vsel %vm926_vm2, %v3348_v3, -inf  ;;  %v3353_v8 = vsel %vm926_vm2, %v3347_v4, -inf }
0x12b0   : > { %v3345_v9 = vmul.f32 0.35355338, %v3338_v6  ;;  %3357 = vmax.xlane.f32.xlu0 %v3356_v7  ;;  %3354 = vmax.xlane.f32.xlu1 %v3353_v8  ;;  %v5386_v7 = vld [vmem:[%s7435_s10 + $0x38] sm:$0xff]  ;;  %v5377_v8 = vld [vmem:[%s7438_s24 + $0x1] ss:$0 sm:$0xff] }
0x12b1   : > { %v5832_v10 = vpop.f32.mrf.mxu1 }
0x12b2   : > { %v3349_v11 = vsel %vm1233_vm3, -1e+10, %v3345_v9 }
0x12b3   : > { %v3359_v12 = vsel %vm926_vm2, %v3349_v11, -inf }
0x12b4   : > { %3360 = vmax.xlane.f32.xlu0 %v3359_v12 }
0x12c1   : > { %3394 = vrot.lane.b32.xlu1 %v3021_v45, %s7451_s23 }
0x12ca   : > { %v3352_v13 = vpop.xlane.xlu0 %3351 }
0x12cb   : > { %v3362_v14 = vsub.f32 %v3346_v57, %v3352_v13  ;;  %v5385_v13 = vld [vmem:[%s7435_s10 + $0x30] sm:$0xff] }
0x12cd   : > { %v3366_v15 = vmul.f32 1.442695, %v3362_v14  ;;  %v5384_v14 = vld [vmem:[%s7435_s10 + $0x28] sm:$0xff] }
0x12cf   : > { %6088 = vpow2.f32 %v3366_v15 }
0x12dc   : > { %v6089_v16 = vpop.eup %6088 }
0x12dd   : > { %v3374_v18 = vsel %vm926_vm2, %v6089_v16, 0.0 }
0x12e5   : > { %3375 = vadd.xlane.f32.xlu1 %v3374_v18 }
0x1339   : > { %v3358_v19 = vpop.xlane.xlu0 %3357  ;;  %v3355_v20 = vpop.xlane.xlu1 %3354 }
0x133a   : > { %v3364_v21 = vsub.f32 %v3348_v3, %v3358_v19  ;;  %v3363_v22 = vsub.f32 %v3347_v4, %v3355_v20 }
0x133c   : > { %v3370_v24 = vmul.f32 1.442695, %v3364_v21  ;;  %v3368_v17 = vmul.f32 1.442695, %v3363_v22 }
0x133d   : > { %v3395_v25 = vpop.permute.xlu1 %3394  ;;  %v3361_v26 = vpop.xlane.xlu0 %3360 }
0x133e   : > { %6090 = vpow2.f32 %v3370_v24  ;;  %v3365_v27 = vsub.f32 %v3349_v11, %v3361_v26  ;;  %5834 = vmatpush3.msra.mxu0 %v3395_v25 }
0x133f   : > { %6092 = vpow2.f32 %v3368_v17  ;;  %5843 = vmatprep.subr.mxu0 %v6219_v1  ;;  %v5388_v17 = vld [vmem:[%s7346_s11 + $0x1] ss:$0 sm:$0xff] }
0x1340   : > { %v3372_v28 = vmul.f32 1.442695, %v3365_v27 }
0x1342   : > { %6094 = vpow2.f32 %v3372_v28 }
0x134b   : > { %v6091_v29 = vpop.eup %6090 }
0x134c   : > { %v6093_v30 = vpop.eup %6092  ;;  %v3380_v31 = vsel %vm926_vm2, %v6091_v29, 0.0 }
0x134d   : > { %3381 = vadd.xlane.f32.xlu1 %v3380_v31  ;;  %v3377_v32 = vsel %vm926_vm2, %v6093_v30, 0.0  ;;  %v5381_v31 = vld [vmem:[%s7440_s3 + $0x1] ss:$0 sm:$0xff] }
0x134e   : > { %3378 = vadd.xlane.f32.xlu0 %v3377_v32 }
0x134f   : > { %v6095_v33 = vpop.eup %6094 }
0x1350   : > { %v3383_v34 = vsel %vm926_vm2, %v6095_v33, 0.0 }
0x1352   : > { %3384 = vadd.xlane.f32.xlu0 %v3383_v34 }
0x135e   : > { %3546 = vrot.lane.b32.xlu1 %v6873_v47, %s7451_s23 }
0x1362   : > { %3622 = vrot.lane.b32.xlu1 %v6881_v50, %s7451_s23 }
0x1368   : > { %3470 = vrot.lane.b32.xlu0 %v6875_v49, %s7451_s23  ;;  %s7456_s23 = sld [smem:[#allocation30_spill]] }
0x136e   : > { %v3376_v35 = vpop.xlane.xlu1 %3375 }
0x136f   : > { %6096 = vrcp.f32 %v3376_v35 }
0x137c   : > { %v6097_v36 = vpop.eup %6096 }
0x137d   : > { %v3387_v37 = vmul.f32 %v6097_v36, %v6089_v16 }
0x137f   : > { %5836 = vmatmul.mubr.msk.f32.vlgmr.msra.gmra.mxu0 %vm926_vm2, %v3387_v37 }
0x1380   : > { %5845 = vmatprep.mubr.msk.f32.mxu0 %vm6220_vm0, %v6219_v1 }
0x13d6   : > { %v3382_v38 = vpop.xlane.xlu1 %3381 }
0x13d7   : > { %6098 = vrcp.f32 %v3382_v38  ;;  %v3379_v39 = vpop.xlane.xlu0 %3378 }
0x13d8   : > { %6100 = vrcp.f32 %v3379_v39 }
0x13da   : > { %v3547_v40 = vpop.permute.xlu1 %3546 }
0x13db   : > { %v3385_v5 = vpop.xlane.xlu0 %3384  ;;  %5844 = vmatpush3.msra.mxu0 %v3547_v40 }
0x13dc   : > { %6102 = vrcp.f32 %v3385_v5  ;;  %5853 = vmatprep.subr.mxu0 %v6219_v1 }
0x13de   : > { %v3623_v47 = vpop.permute.xlu1 %3622 }
0x13df   : > { %v3471_v41 = vpop.permute.xlu0 %3470 }
0x13e0   : > { %5839 = vmatpush3.msra.mxu1 %v3471_v41 }
0x13e1   : > { %5848 = vmatprep.subr.mxu1 %v6219_v1 }
0x13e4   : > { %v6099_v43 = vpop.eup %6098 }
0x13e5   : > { %v6101_v44 = vpop.eup %6100  ;;  %v3391_v45 = vmul.f32 %v6099_v43, %v6091_v29  ;;  %v6126_v29 = vld [vmem:[%s6592_s28 + $0x8] sm:$0xf]  ;;  %s7453_s28 = sld [smem:[#allocation9_spill]] }
0x13e6   : > { %v3389_v46 = vmul.f32 %v6101_v44, %v6093_v30 }
0x13e7   : > { %5846 = vmatmul.mubr.msk.f32.vlgmr.msra.gmra.mxu0 %vm926_vm2, %v3391_v45 }
0x13e8   : > { %5841 = vmatmul.mubr.msk.f32.vlgmr.msra.gmra.mxu1 %vm926_vm2, %v3389_v46  ;;  %5861 = vmatprep.mubr.msk.f32.mxu0 %vm6220_vm0, %v6219_v1 }
0x13e9   : > { %v6103_v49 = vpop.eup %6102  ;;  %5849 = vmatpush3.msra.mxu1 %v3623_v47  ;;  %5850 = vmatprep.mubr.msk.f32.mxu1 %vm6220_vm0, %v6219_v1 }
0x13ea   : > { %v3393_v50 = vmul.f32 %v6103_v49, %v6095_v33  ;;  %5864 = vmatprep.subr.mxu1 %v6219_v1  ;;  %5854 = vmatpush3.msra.mxu0 %v5363_v51  ;;  %v5382_v33 = vld [vmem:[%s7452_s2 + $0x1] ss:$0 sm:$0xff] }
0x13eb   : > { %5855 = vmatprep.subr.mxu0 %v6219_v1 }
0x13ec   : > { %5851 = vmatmul.mubr.msk.f32.vlgmr.msra.gmra.mxu1 %vm926_vm2, %v3393_v50  ;;  %5856 = vmatpush3.msra.mxu0 %v5362_v54 }
0x13ed   : > { %5872 = vmatprep.mubr.msk.f32.mxu1 %vm6220_vm0, %v6219_v1  ;;  %5857 = vmatprep.subr.mxu0 %v6219_v1 }
0x13ee   : > { %5858 = vmatpush3.msra.mxu0 %v5361_v55  ;;  %5865 = vmatpush3.msra.mxu1 %v5386_v7 }
0x13ef   : > { %5859 = vmatprep.subr.mxu0 %v6219_v1  ;;  %5866 = vmatprep.subr.mxu1 %v6219_v1 }
0x13f0   : > { %5860 = vmatpush3.msra.mxu0 %v5360_v60  ;;  %5867 = vmatpush3.msra.mxu1 %v5385_v13 }
0x13f1   : > { %5868 = vmatprep.subr.mxu1 %v6219_v1 }
0x13f2   : > { %5869 = vmatpush3.msra.mxu1 %v5384_v14 }
0x13f3   : > { %5870 = vmatprep.subr.mxu1 %v6219_v1 }
0x143f   : > { %v3466_v52 = vpop.f32.mrf.mxu0 }
0x1441   : > { %v5837_v53 = vpop.f32.mrf.mxu0 }
0x14a7   : > { %v3618_v56 = vpop.f32.mrf.mxu0 }
0x14a8   : > { %v3542_v57 = vpop.f32.mrf.mxu1  ;;  %3703 = vrot.lane.b32.xlu1 %v3618_v56, %s7448_s7 }
0x14a9   : > { %3699 = vrot.lane.b32.xlu0 %v3542_v57, %s7447_s22  ;;  %v5847_v58 = vpop.f32.mrf.mxu0 }
0x14aa   : > { %v5842_v59 = vpop.f32.mrf.mxu1 }
0x14ac   : > { %v3694_v61 = vpop.f32.mrf.mxu1 }
0x14ad   : > { %3707 = vrot.lane.b32.xlu0 %v3694_v61, %s7449_s8 }
0x14ae   : > { %v5852_v62 = vpop.f32.mrf.mxu1 }
0x14b1   : > { %3920 = vrot.lane.b32.xlu0 %v5386_v7, %s7436_s6 }
0x151a   : > { %v3704_v0 = vpop.permute.xlu1 %3703 }
0x151b   : > { %v3700_v63 = vpop.permute.xlu0 %3699 }
0x151c   : > { %v3710_v2 = vsel %vm926_vm2, %v3466_v52, %v3700_v63 }
0x151d   : > { %v3711_v3 = vsel %vm1601_vm4, %v3710_v2, %v3704_v0 }
0x151f   : > { %v3708_v4 = vpop.permute.xlu0 %3707 }
0x1520   : > { %v3712_v6 = vsel %vm1603_vm5, %v3711_v3, %v3708_v4 }
0x1521   : > { %5862 = vmatmul.mubr.msk.f32.vlgmr.msra.gmra.mxu0 %vm838_vm1, %v3712_v6 }
0x1522   : > { %5883 = vmatprep.mubr.msk.f32.mxu0 %vm838_vm1, %v6595_v48 }
0x1523   : > { %v3921_v15 = vpop.permute.xlu0 %3920 }
0x1524   : > { %5875 = vmatprep.subr.mxu0 %v3921_v15 }
0x1525   : > { %5876 = vmatpush3.msra.mxu0 %v3921_v15 }
0x15e1   : > { %v3788_v9 = vpop.f32.mrf.mxu0 }
0x15e2   : > { %v3789_v10 = vadd.f32 %v5377_v8, %v3788_v9 }
0x15e3   : > { %v5863_v11 = vpop.f32.mrf.mxu0 }
0x15e4   : > { %v3792_v12 = vadd.f32 %v3789_v10, %v6860_v42  ;;  %v5383_v42 = vld [vmem:[%s7435_s10 + $0x20] sm:$0xff] }
0x15e5   : > { %5871 = vmatpush3.msra.mxu1 %v5383_v42 }
0x15e6   : > { %v3797_v48 = vsel %vm838_vm1, %v3792_v12, 0.0  ;;  %5886 = vmatprep.subr.mxu1 %v6219_v1 }
0x15e7   : > { %3798 = vadd.xlane.f32.xlu1 %v3797_v48 }
0x15f8   : > { %3918 = vrot.lane.b32.xlu1 %v5385_v13, %s7436_s6 }
0x15fc   : > { %3916 = vrot.lane.b32.xlu1 %v5384_v14, %s7436_s6 }
0x1600   : > { %3926 = vrot.lane.b32.xlu1 %v5388_v17, %s7436_s6 }
0x1670   : > { %v3799_v16 = vpop.xlane.xlu1 %3798 }
0x1671   : > { %v3800_v18 = vmul.f32 0.03125, %v3799_v16 }
0x1673   : > { %v3801_v19 = vsub.f32 %v3792_v12, %v3800_v18 }
0x1674   : > { %v3919_v20 = vpop.permute.xlu1 %3918 }
0x1675   : > { %v3802_v21 = vmul.f32 %v3801_v19, %v3801_v19  ;;  %5877 = vmatprep.subr.mxu0 %v3919_v20 }
0x1676   : > { %5878 = vmatpush3.msra.mxu0 %v3919_v20 }
0x1677   : > { %v3803_v22 = vsel %vm838_vm1, %v3802_v21, 0.0 }
0x1678   : > { %3804 = vadd.xlane.f32.xlu0 %v3803_v22  ;;  %v3917_v24 = vpop.permute.xlu1 %3916 }
0x1679   : > { %5879 = vmatprep.subr.mxu0 %v3917_v24 }
0x167a   : > { %5880 = vmatpush3.msra.mxu0 %v3917_v24 }
0x167c   : > { %v3927_v36 = vpop.permute.xlu1 %3926 }
0x168e   : > { %3914 = vrot.lane.b32.xlu0 %v5383_v42, %s7436_s6 }
0x1701   : > { %v3805_v25 = vpop.xlane.xlu0 %3804 }
0x1702   : > { %v3806_v26 = vmul.f32 0.03125, %v3805_v25 }
0x1704   : > { %v3807_v27 = vadd.f32 1e-05, %v3806_v26 }
0x1705   : > { %v3915_v28 = vpop.permute.xlu0 %3914 }
0x1706   : > { %6104 = vrsqrt.f32 %v3807_v27  ;;  %5881 = vmatprep.subr.mxu0 %v3915_v28 }
0x1707   : > { %5882 = vmatpush3.msra.mxu0 %v3915_v28 }
0x1708   : > { %5884 = vmatmul.mubr.msk.f32.vlgmr.msra.gmra.mxu0 %vm838_vm1, %v6126_v29  ;;  %5893 = vmatprep.subr.mxu0 %v6219_v1 }
0x1709   : > { %5897 = vmatprep.mubr.msk.f32.mxu0 %vm6220_vm0, %v6219_v1 }
0x1713   : > { %v6105_v30 = vpop.eup %6104 }
0x1714   : > { %v3809_v32 = vmul.f32 %v6105_v30, %v3801_v19 }
0x1716   : > { %v3816_v34 = vmul.f32 %v5381_v31, %v3809_v32 }
0x1718   : > { %v7012_v35 = vadd.f32 %v5382_v33, %v3816_v34 }
0x171a   : > { %5873 = vmatmul.mubr.msk.f32.vlgmr.msra.gmra.mxu1 %vm838_vm1, %v7012_v35 }
0x171b   : > { %5890 = vmatprep.mubr.msk.f32.mxu1 %vm6220_vm0, %v6219_v1 }
0x17c8   : > { %v5885_v37 = vpop.f32.mrf.mxu0 }
0x17c9   : > { %v7018_v38 = vadd.f32 %v5885_v37, %v3927_v36 }
0x17ca   : > { %v3995_v39 = vpop.f32.mrf.mxu0 }
0x17cb   : > { %4022 = vrot.lane.b32.xlu0 %v7018_v38, %s7442_s30  ;;  %5887 = vmatpush3.xpose.msk.msra.mxu1 %vm926_vm2, %v7018_v38  ;;  %v7024_v40 = vadd.f32 %v3995_v39, %v3927_v36 }
0x17cc   : > { %5888 = vmatprep.subr.mxu1 %v6219_v1 }
0x17cd   : > { %4020 = vrot.lane.b32.xlu1 %v7024_v40, %s7442_s30 }
0x17cf   : > { %4026 = vrot.lane.b32.xlu0 %v7018_v38, %s7443_s1  ;;  %5889 = vmatpush3.xpose.msk.msra.mxu1 %vm926_vm2, %v7024_v40 }
0x17d0   : > { %5900 = vmatprep.subr.mxu1 %v6219_v1 }
0x17d3   : > { %4030 = vrot.lane.b32.xlu0 %v7018_v38, %s7444_s26 }
0x17d7   : > { %4028 = vrot.lane.b32.xlu0 %v7024_v40, %s7444_s26 }
0x17da   : > { %v3906_v5 = vpop.f32.mrf.mxu1 }
0x17db   : > { %v3907_v41 = vadd.f32 %v5388_v17, %v3906_v5 }
0x17dc   : > { %v5874_v43 = vpop.f32.mrf.mxu1 }
0x17dd   : > { %4016 = vrot.lane.b32.xlu0 %v3907_v41, %s7444_s26  ;;  %4012 = vrot.lane.b32.xlu1 %v3907_v41, %s7442_s30  ;;  %s7107_s30 = sand.u32 1, %s7453_s28   ;;  %s5455_s28 = sshll.u32 %s7457_s25, 9 }
0x17de   : > { %5891 = vmatmul.mubr.msk.f32.vlgmr.msra.gmra.mxu1 %vm926_vm2, %v3907_v41 }
0x17df   : > { %5904 = vmatprep.mubr.msk.f32.mxu1 %vm6220_vm0, %v6219_v1 }
0x17e1   : > { %4024 = vrot.lane.b32.xlu1 %v7024_v40, %s7443_s1 }
0x17e5   : > { %4014 = vrot.lane.b32.xlu1 %v3907_v41, %s7443_s1  ;;  %s5296_s1 = sshll.u32 %s7107_s30, 5 }
0x17e6   : > { %s7111_s26 = scalar_lea.vmem [#allocation4], %s5296_s1  ;;  %s7455_s1 = sld [smem:[#allocation29_spill]] }
0x17e7   : > { %s5164_s2 = sshll.u32 %s7111_s26, 4  ;;  %s7259_s2 = int_to_ptr.vmem [resolvable:$true] %s5164_s2 }
0x17e8   : > { %s6127_s29 = scalar_lea.vmem %s7259_s2, 512  ;;  %p6134_p0 = scmp.lt.s32.totalorder %s7259_s2, %s6132_s13 }
0x17e9   : > { %p6128_p11 = scmp.ne.s32.totalorder %s7259_s2, %s6127_s29 }
0x17eb   : > { %p6129_p12 = pnand %p6128_p11, %p6401_p5 }
0x17ed   : > { %p6130_p13 = pneg %p6129_p12 }
0x183d   : > { %v4023_v44 = vpop.permute.xlu0 %4022 }
0x183e   : > { %5894 = vmatpush3.xpose.msk.msra.mxu0 %vm926_vm2, %v4023_v44 }
0x183f   : > { %5895 = vmatprep.subr.mxu0 %v6219_v1  ;;  %v4021_v45 = vpop.permute.xlu1 %4020 }
0x1841   : > { %v4027_v46 = vpop.permute.xlu0 %4026 }
0x1842   : > { %5896 = vmatpush3.xpose.msk.msra.mxu0 %vm926_vm2, %v4021_v45  ;;  %5901 = vmatpush3.xpose.msk.msra.mxu1 %vm926_vm2, %v4027_v46 }
0x1843   : > { %5907 = vmatprep.subr.mxu0 %v6219_v1  ;;  %5902 = vmatprep.subr.mxu1 %v6219_v1 }
0x1845   : > { %v4031_v47 = vpop.permute.xlu0 %4030 }
0x1849   : > { %v7057_v50 = vpop.permute.xlu0 %4028 }
0x184f   : > { %v4013_v49 = vpop.permute.xlu1 %4012  ;;  %v4017_v52 = vpop.permute.xlu0 %4016 }
0x1850   : > { %5898 = vmatmul.mubr.msk.f32.vlgmr.msra.gmra.mxu0 %vm926_vm2, %v4013_v49 }
0x1851   : > { %5908 = vmatpush3.xpose.msk.msra.mxu0 %vm926_vm2, %v4031_v47  ;;  %5911 = vmatprep.mubr.msk.f32.mxu0 %vm6220_vm0, %v6219_v1 }
0x1852   : > { %5909 = vmatprep.subr.mxu0 %v6219_v1 }
0x1853   : > { %v7059_v51 = vpop.permute.xlu1 %4024 }
0x1854   : > { %5903 = vmatpush3.xpose.msk.msra.mxu1 %vm926_vm2, %v7059_v51 }
0x1855   : > { %5910 = vmatpush3.xpose.msk.msra.mxu0 %vm926_vm2, %v7057_v50  ;;  %5914 = vmatprep.subr.mxu1 %v6219_v1 }
0x1856   : > { %5928 = vmatprep.subr.mxu0 %v6219_v1 }
0x1857   : > { %v4015_v53 = vpop.permute.xlu1 %4014 }
0x1858   : > { %5912 = vmatmul.mubr.msk.f32.vlgmr.msra.gmra.mxu0 %vm926_vm2, %v4017_v52  ;;  %5905 = vmatmul.mubr.msk.f32.vlgmr.msra.gmra.mxu1 %vm926_vm2, %v4015_v53 }
0x1859   : > { %5918 = vmatprep.mubr.msk.f32.mxu1 %vm6220_vm0, %v6219_v1  ;;  %5932 = vmatprep.mubr.msk.f32.mxu0 %vm6220_vm0, %v6219_v1 }
0x189e   : > { %v4104_v54 = vpop.f32.mrf.mxu1 }
0x189f   : > { %v4336_v55 = vmul.f32 0.35355338, %v4104_v54  ;;  %v5395_v54 = vld [vmem:[%s7454_s4 + $0x38] sm:$0xff] }
0x18a0   : > { %v5892_v60 = vpop.f32.mrf.mxu1 }
0x18a1   : > { %v4340_v56 = vsel %vm2239_vm7, -1e+10, %v4336_v55  ;;  %v5394_v55 = vld [vmem:[%s7454_s4 + $0x30] sm:$0xff]  ;;  %v5393_v60 = vld [vmem:[%s7454_s4 + $0x28] sm:$0xff] }
0x18a2   : > { %v4344_v57 = vsel %vm2244_vm8, %v4340_v56, -inf }
0x18a3   : > { %4345 = vmax.xlane.f32.xlu1 %v4344_v57 }
0x1910   : > { %v4180_v58 = vpop.f32.mrf.mxu0 }
0x1911   : > { %v4337_v59 = vmul.f32 0.35355338, %v4180_v58 }
0x1912   : > { %v5899_v61 = vpop.f32.mrf.mxu0 }
0x1913   : > { %v4341_v62 = vsel %vm2239_vm7, -1e+10, %v4337_v59 }
0x1914   : > { %v4347_v63 = vsel %vm2244_vm8, %v4341_v62, -inf }
0x1915   : > { %4348 = vmax.xlane.f32.xlu0 %v4347_v63 }
0x1918   : > { %v4332_v0 = vpop.f32.mrf.mxu0  ;;  %v4256_v2 = vpop.f32.mrf.mxu1 }
0x1919   : > { %v4339_v3 = vmul.f32 0.35355338, %v4332_v0  ;;  %v4338_v4 = vmul.f32 0.35355338, %v4256_v2 }
0x191a   : > { %v5913_v6 = vpop.f32.mrf.mxu0  ;;  %v5906_v7 = vpop.f32.mrf.mxu1 }
0x191b   : > { %v4343_v8 = vsel %vm2239_vm7, -1e+10, %v4339_v3  ;;  %v4342_v9 = vsel %vm2239_vm7, -1e+10, %v4338_v4 }
0x191c   : > { %v4353_v10 = vsel %vm2244_vm8, %v4343_v8, -inf  ;;  %v4350_v11 = vsel %vm2244_vm8, %v4342_v9, -inf }
0x191d   : > { %4354 = vmax.xlane.f32.xlu1 %v4353_v10  ;;  %4351 = vmax.xlane.f32.xlu0 %v4350_v11 }
0x192c   : > { %v4346_v23 = vpop.xlane.xlu1 %4345 }
0x192d   : > { %v4356_v12 = vsub.f32 %v4340_v56, %v4346_v23  ;;  %v5392_v56 = vld [vmem:[%s7454_s4 + $0x20] sm:$0xff] }
0x192e   : > { %4388 = vrot.lane.b32.xlu1 %v7024_v40, %s7436_s6 }
0x192f   : > { %v4360_v48 = vmul.f32 1.442695, %v4356_v12 }
0x1931   : > { %6106 = vpow2.f32 %v4360_v48 }
0x1932   : > { %4470 = vrot.lane.b32.xlu1 %v4023_v44, %s7436_s6 }
0x1933   : > { %4390 = vrot.lane.b32.xlu0 %v7018_v38, %s7436_s6 }
0x1936   : > { %4550 = vrot.lane.b32.xlu1 %v4027_v46, %s7436_s6 }
0x1937   : > { %4468 = vrot.lane.b32.xlu0 %v4021_v45, %s7436_s6 }
0x193b   : > { %4630 = vrot.lane.b32.xlu0 %v4031_v47, %s7436_s6 }
0x193e   : > { %v6107_v13 = vpop.eup %6106 }
0x193f   : > { %v4368_v14 = vsel %vm2244_vm8, %v6107_v13, 0.0 }
0x195a   : > { %4369 = vadd.xlane.f32.xlu0 %v4368_v14 }
0x199e   : > { %v4349_v42 = vpop.xlane.xlu0 %4348 }
0x199f   : > { %v4357_v15 = vsub.f32 %v4341_v62, %v4349_v42 }
0x19a1   : > { %v4362_v16 = vmul.f32 1.442695, %v4357_v15 }
0x19a3   : > { %6108 = vpow2.f32 %v4362_v16  ;;  %v5426_v16 = vld [vmem:[%s7351_s16 + $0x38] sm:$0xff] }
0x19a6   : > { %v4355_v18 = vpop.xlane.xlu1 %4354  ;;  %v4352_v19 = vpop.xlane.xlu0 %4351 }
0x19a7   : > { %v4359_v20 = vsub.f32 %v4343_v8, %v4355_v18  ;;  %v4358_v21 = vsub.f32 %v4342_v9, %v4352_v19  ;;  %v5417_v8 = vld [vmem:[%s7455_s1 + $0x1] ss:$0 sm:$0xff]  ;;  %v5424_v18 = vld [vmem:[%s7351_s16 + $0x28] sm:$0xff] }
0x19a8   : > { %v5423_v19 = vld [vmem:[%s7351_s16 + $0x20] sm:$0xff] }
0x19a9   : > { %v4366_v22 = vmul.f32 1.442695, %v4359_v20  ;;  %v4364_v24 = vmul.f32 1.442695, %v4358_v21  ;;  %v5437_v20 = vld [vmem:[%s7353_s18 + $0x78] sm:$0xff]  ;;  %v5436_v21 = vld [vmem:[%s7353_s18 + $0x70] sm:$0xff] }
0x19aa   : > { %v4389_v17 = vpop.permute.xlu1 %4388  ;;  %v4391_v25 = vpop.permute.xlu0 %4390 }
0x19ab   : > { %6110 = vpow2.f32 %v4366_v22  ;;  %5915 = vmatpush3.msk.msra.mxu1 %vm2297_vm9, %v4391_v25  ;;  %v5435_v22 = vld [vmem:[%s7353_s18 + $0x68] sm:$0xff] }
0x19ac   : > { %6112 = vpow2.f32 %v4364_v24  ;;  %5916 = vmatprep.subr.mxu1 %v6219_v1  ;;  %v5434_v24 = vld [vmem:[%s7353_s18 + $0x60] sm:$0xff] }
0x19ad   : > { %5917 = vmatpush3.msra.mxu1 %v4389_v17  ;;  %v5433_v17 = vld [vmem:[%s7353_s18 + $0x58] sm:$0xff] }
0x19ae   : > { %v4471_v26 = vpop.permute.xlu1 %4470  ;;  %5921 = vmatprep.subr.mxu1 %v6219_v1  ;;  %v4469_v34 = vpop.permute.xlu0 %4468 }
0x19b0   : > { %v6109_v27 = vpop.eup %6108 }
0x19b1   : > { %v4371_v28 = vsel %vm2244_vm8, %v6109_v27, 0.0 }
0x19b2   : > { %v4551_v29 = vpop.permute.xlu1 %4550  ;;  %4372 = vadd.xlane.f32.xlu1 %v4371_v28  ;;  %v4631_v36 = vpop.permute.xlu0 %4630 }
0x19b3   : > { %5929 = vmatpush3.msk.msra.mxu0 %vm2297_vm9, %v4551_v29  ;;  %v5421_v29 = vld [vmem:[%s7349_s14 + $0x1] ss:$0 sm:$0xff] }
0x19b4   : > { %5930 = vmatprep.subr.mxu0 %v6219_v1 }
0x19b8   : > { %v6111_v30 = vpop.eup %6110 }
0x19b9   : > { %v6113_v31 = vpop.eup %6112  ;;  %v4377_v32 = vsel %vm2244_vm8, %v6111_v30, 0.0 }
0x19ba   : > { %4378 = vadd.xlane.f32.xlu1 %v4377_v32  ;;  %v4374_v33 = vsel %vm2244_vm8, %v6113_v31, 0.0 }
0x19bb   : > { %4375 = vadd.xlane.f32.xlu0 %v4374_v33 }
0x19cb   : > { %4548 = vrot.lane.b32.xlu1 %v7059_v51, %s7436_s6 }
0x19d1   : > { %4628 = vrot.lane.b32.xlu0 %v7057_v50, %s7436_s6 }
0x19e3   : > { %v4370_v37 = vpop.xlane.xlu0 %4369 }
0x19e4   : > { %6114 = vrcp.f32 %v4370_v37  ;;  %v5430_v37 = vld [vmem:[%s7353_s18 + $0x40] sm:$0xff] }
0x19f1   : > { %v6115_v38 = vpop.eup %6114 }
0x19f2   : > { %v4381_v39 = vmul.f32 %v6115_v38, %v6107_v13  ;;  %v5428_v38 = vld [vmem:[%s7352_s17 + $0x1] ss:$0 sm:$0xff] }
0x19f4   : > { %5919 = vmatmul.mubr.msk.f32.vlgmr.msra.gmra.mxu1 %vm2244_vm8, %v4381_v39  ;;  %5043 = vst.msk [vmem:[%s7111_s26] sm:$0xff] %vm2244_vm8, %v4381_v39 }
0x19f5   : > { %5922 = vmatpush3.msk.msra.mxu1 %vm2297_vm9, %v4471_v26  ;;  %5925 = vmatprep.mubr.msk.f32.mxu1 %vm6220_vm0, %v6219_v1 }
0x19f6   : > { %5923 = vmatprep.subr.mxu1 %v6219_v1 }
0x19f7   : > { %5924 = vmatpush3.msra.mxu1 %v4469_v34  ;;  %v5432_v34 = vld [vmem:[%s7353_s18 + $0x50] sm:$0xff] }
0x19f8   : > { %5935 = vmatprep.subr.mxu1 %v6219_v1 }
0x1a3b   : > { %v4373_v40 = vpop.xlane.xlu1 %4372 }
0x1a3c   : > { %6116 = vrcp.f32 %v4373_v40 }
0x1a43   : > { %v4379_v5 = vpop.xlane.xlu1 %4378 }
0x1a44   : > { %6118 = vrcp.f32 %v4379_v5  ;;  %v4376_v41 = vpop.xlane.xlu0 %4375 }
0x1a45   : > { %6120 = vrcp.f32 %v4376_v41 }
0x1a47   : > { %v4549_v43 = vpop.permute.xlu1 %4548 }
0x1a48   : > { %5931 = vmatpush3.msra.mxu0 %v4549_v43  ;;  %v4629_v46 = vpop.permute.xlu0 %4628  ;;  %v5439_v43 = vld [vmem:[%s7354_s19 + $0x1] ss:$0 sm:$0xff] }
0x1a49   : > { %v6117_v44 = vpop.eup %6116  ;;  %5942 = vmatprep.subr.mxu0 %v6219_v1 }
0x1a4a   : > { %v4383_v45 = vmul.f32 %v6117_v44, %v6109_v27 }
0x1a4c   : > { %5926 = vmatmul.mubr.msk.f32.vlgmr.msra.gmra.mxu1 %vm2244_vm8, %v4383_v45  ;;  %5044 = vst.msk [vmem:[%s7111_s26 + $0x8] sm:$0xff] %vm2244_vm8, %v4383_v45 }
0x1a4d   : > { %5936 = vmatpush3.msk.msra.mxu1 %vm2297_vm9, %v4631_v36  ;;  %5939 = vmatprep.mubr.msk.f32.mxu1 %vm6220_vm0, %v6219_v1  ;;  %v5431_v36 = vld [vmem:[%s7353_s18 + $0x48] sm:$0xff] }
0x1a4e   : > { %5937 = vmatprep.subr.mxu1 %v6219_v1 }
0x1a4f   : > { %5938 = vmatpush3.msra.mxu1 %v4629_v46 }
0x1a50   : > { %5953 = vmatprep.subr.mxu1 %v6219_v1 }
0x1a51   : > { %v6119_v47 = vpop.eup %6118 }
0x1a52   : > { %v6121_v49 = vpop.eup %6120  ;;  %v4387_v50 = vmul.f32 %v6119_v47, %v6111_v30 }
0x1a53   : > { %v4385_v51 = vmul.f32 %v6121_v49, %v6113_v31  ;;  %v5422_v31 = vld [vmem:[%s7350_s15 + $0x1] ss:$0 sm:$0xff] }
0x1a54   : > { %5940 = vmatmul.mubr.msk.f32.vlgmr.msra.gmra.mxu1 %vm2244_vm8, %v4387_v50  ;;  %5046 = vst.msk [vmem:[%s7111_s26 + $0x18] sm:$0xff] %vm2244_vm8, %v4387_v50 }
0x1a55   : > { %5933 = vmatmul.mubr.msk.f32.vlgmr.msra.gmra.mxu0 %vm2244_vm8, %v4385_v51  ;;  %5961 = vmatprep.mubr.msk.f32.mxu1 %vm6220_vm0, %v6219_v1  ;;  %5045 = vst.msk [vmem:[%s7111_s26 + $0x10] sm:$0xff] %vm2244_vm8, %v4385_v51  ;;  %s6133_s26 = scalar_lea.vmem %s6132_s13, 1024 }
0x1a56   : > { %5950 = vmatprep.mubr.msk.f32.mxu0 %vm6220_vm0, %v6219_v1  ;;  %5943 = vmatpush3.msra.mxu0 %v5395_v54  ;;  %p6135_p1 = scmp.lt.s32.totalorder %s6133_s26, %s6127_s29 }
0x1a57   : > { %5944 = vmatprep.subr.mxu0 %v6219_v1  ;;  %5954 = vmatpush3.msra.mxu1 %v5426_v16 }
0x1a58   : > { %5945 = vmatpush3.msra.mxu0 %v5394_v55  ;;  %5955 = vmatprep.subr.mxu1 %v6219_v1  ;;  %v5050_v55 = vld [vmem:[%s7456_s23 + $0x18] sm:$0xff]  ;;  %p6136_p2 = por %p6135_p1, %p6134_p0 }
0x1a59   : > { %5946 = vmatprep.subr.mxu0 %v6219_v1 }
0x1a5a   : > { %5947 = vmatpush3.msra.mxu0 %v5393_v60  ;;  %v5049_v60 = vld [vmem:[%s7456_s23 + $0x10] sm:$0xff]  ;;  %p6137_p3 = pnand %p6136_p2, %p6130_p13 }
0x1a5b   : > { %5948 = vmatprep.subr.mxu0 %v6219_v1 }
0x1a5c   : > { %5949 = vmatpush3.msra.mxu0 %v5392_v56  ;;  %v5048_v56 = vld [vmem:[%s7456_s23 + $0x8] sm:$0xff] }
0x1a5d   : > { %5964 = vmatprep.subr.mxu0 %v6219_v1 }
0x1ab4   : > { %v4464_v52 = vpop.f32.mrf.mxu1 }
0x1ab6   : > { %v5920_v53 = vpop.f32.mrf.mxu1 }
0x1b0c   : > { %v4544_v57 = vpop.f32.mrf.mxu1 }
0x1b0d   : > { %4709 = vrot.lane.b32.xlu1 %v4544_v57, %s7447_s22  ;;  %v5047_v57 = vld [vmem:[%s7456_s23] sm:$0xff] }
0x1b0e   : > { %v5927_v58 = vpop.f32.mrf.mxu1 }
0x1b14   : > { %v4704_v59 = vpop.f32.mrf.mxu1 }
0x1b15   : > { %v4624_v61 = vpop.f32.mrf.mxu0  ;;  %4717 = vrot.lane.b32.xlu1 %v4704_v59, %s7449_s8 }
0x1b16   : > { %4713 = vrot.lane.b32.xlu0 %v4624_v61, %s7448_s7  ;;  %v5941_v62 = vpop.f32.mrf.mxu1  ;;  %s7459_s7 = sld [smem:[#allocation33_spill]] }
0x1b17   : > { %v5934_v63 = vpop.f32.mrf.mxu0 }
0x1b18   : > { %v5443_v63 = vld [vmem:[%s7355_s20 + $0x1] ss:$0 sm:$0xff] }
0x1b1c   : > { %s7264_s6 = scalar_lea.hbm %s7459_s7, %s5455_s28 }
0x1b7f   : > { %v4710_v0 = vpop.permute.xlu1 %4709 }
0x1b80   : > { %v4720_v2 = vsel %vm926_vm2, %v4464_v52, %v4710_v0 }
0x1b87   : > { %v4718_v4 = vpop.permute.xlu1 %4717 }
0x1b88   : > { %v4714_v3 = vpop.permute.xlu0 %4713 }
0x1b89   : > { %v4721_v6 = vsel %vm1601_vm4, %v4720_v2, %v4714_v3  ;;  %v5444_v2 = vld [vmem:[%s7356_s21 + $0x1] ss:$0 sm:$0xff] }
0x1b8a   : > { %v4722_v7 = vsel %vm1603_vm5, %v4721_v6, %v4718_v4 }
0x1b8b   : > { %5951 = vmatmul.mubr.msk.f32.vlgmr.msra.gmra.mxu0 %vm838_vm1, %v4722_v7 }
0x1b8c   : > { %5980 = vmatprep.mubr.msk.f32.mxu0 %vm6220_vm0, %v6219_v1  ;;  %5965 = vmatpush3.msra.mxu0 %v5437_v20 }
0x1b8d   : > { %5966 = vmatprep.subr.mxu0 %v6219_v1 }
0x1b8e   : > { %5967 = vmatpush3.msra.mxu0 %v5436_v21 }
0x1b8f   : > { %5968 = vmatprep.subr.mxu0 %v6219_v1 }
0x1b90   : > { %5969 = vmatpush3.msra.mxu0 %v5435_v22 }
0x1b91   : > { %5970 = vmatprep.subr.mxu0 %v6219_v1 }
0x1b92   : > { %5971 = vmatpush3.msra.mxu0 %v5434_v24 }
0x1b93   : > { %5972 = vmatprep.subr.mxu0 %v6219_v1 }
0x1b94   : > { %5973 = vmatpush3.msra.mxu0 %v5433_v17 }
0x1b95   : > { %5974 = vmatprep.subr.mxu0 %v6219_v1 }
0x1b96   : > { %5975 = vmatpush3.msra.mxu0 %v5432_v34 }
0x1b97   : > { %5976 = vmatprep.subr.mxu0 %v6219_v1 }
0x1b98   : > { %5977 = vmatpush3.msra.mxu0 %v5431_v36 }
0x1b99   : > { %5978 = vmatprep.subr.mxu0 %v6219_v1 }
0x1b9a   : > { %5979 = vmatpush3.msra.mxu0 %v5430_v37 }
0x1c4b   : > { %v4798_v9 = vpop.f32.mrf.mxu0 }
0x1c4c   : > { %v4799_v10 = vadd.f32 %v5417_v8, %v4798_v9 }
0x1c4d   : > { %v5952_v11 = vpop.f32.mrf.mxu0 }
0x1c4e   : > { %v4802_v23 = vadd.f32 %v4799_v10, %v7012_v35  ;;  %v5425_v35 = vld [vmem:[%s7351_s16 + $0x30] sm:$0xff] }
0x1c4f   : > { %5956 = vmatpush3.msra.mxu1 %v5425_v35 }
0x1c50   : > { %v4807_v12 = vsel %vm838_vm1, %v4802_v23, 0.0  ;;  %5957 = vmatprep.subr.mxu1 %v6219_v1 }
0x1c51   : > { %4808 = vadd.xlane.f32.xlu0 %v4807_v12  ;;  %5958 = vmatpush3.msra.mxu1 %v5424_v18 }
0x1c52   : > { %5959 = vmatprep.subr.mxu1 %v6219_v1 }
0x1c53   : > { %5960 = vmatpush3.msra.mxu1 %v5423_v19 }
0x1c54   : > { %5983 = vmatprep.subr.mxu1 %v6219_v1 }
0x1cda   : > { %v4809_v48 = vpop.xlane.xlu0 %4808 }
0x1cdb   : > { %v4810_v13 = vmul.f32 0.03125, %v4809_v48 }
0x1cdd   : > { %v4811_v14 = vsub.f32 %v4802_v23, %v4810_v13 }
0x1cdf   : > { %v4812_v42 = vmul.f32 %v4811_v14, %v4811_v14 }
0x1ce1   : > { %v4813_v15 = vsel %vm838_vm1, %v4812_v42, 0.0 }
0x1ce2   : > { %4814 = vadd.xlane.f32.xlu1 %v4813_v15 }
0x1d6b   : > { %v4815_v25 = vpop.xlane.xlu1 %4814 }
0x1d6c   : > { %v4816_v26 = vmul.f32 0.03125, %v4815_v25 }
0x1d6e   : > { %v4817_v27 = vadd.f32 1e-05, %v4816_v26 }
0x1d70   : > { %6122 = vrsqrt.f32 %v4817_v27 }
0x1d7d   : > { %v6123_v28 = vpop.eup %6122 }
0x1d7e   : > { %v4819_v30 = vmul.f32 %v6123_v28, %v4811_v14 }
0x1d80   : > { %v4826_v32 = vmul.f32 %v5421_v29, %v4819_v30 }
0x1d82   : > { %v4833_v33 = vadd.f32 %v5422_v31, %v4826_v32 }
0x1d84   : > { %5962 = vmatmul.mubr.msk.f32.vlgmr.msra.gmra.mxu1 %vm838_vm1, %v4833_v33 }
0x1d85   : > { %5991 = vmatprep.mubr.msk.f32.mxu1 %vm6220_vm0, %v6219_v1  ;;  %5984 = vmatpush3.msra.mxu1 %v5050_v55 }
0x1d86   : > { %5985 = vmatprep.subr.mxu1 %v6219_v1 }
0x1d87   : > { %5986 = vmatpush3.msra.mxu1 %v5049_v60 }
0x1d88   : > { %5987 = vmatprep.subr.mxu1 %v6219_v1 }
0x1d89   : > { %5988 = vmatpush3.msra.mxu1 %v5048_v56 }
0x1d8a   : > { %5989 = vmatprep.subr.mxu1 %v6219_v1 }
0x1d8b   : > { %5990 = vmatpush3.msra.mxu1 %v5047_v57 }
0x1e44   : > { %v4916_v39 = vpop.f32.mrf.mxu1 }
0x1e45   : > { %v4917_v40 = vadd.f32 %v5428_v38, %v4916_v39 }
0x1e46   : > { %v5963_v5 = vpop.f32.mrf.mxu1 }
0x1e47   : > { %v4920_v41 = vmax.f32 %v4917_v40, 0.0 }
0x1e49   : > { %5981 = vmatmul.mubr.msk.f32.vlgmr.msra.gmra.mxu0 %vm2834_vm10, %v4920_v41 }
0x1f09   : > { %v5007_v44 = vpop.f32.mrf.mxu0 }
0x1f0a   : > { %v5008_v45 = vadd.f32 %v5439_v43, %v5007_v44 }
0x1f0b   : > { %v5982_v46 = vpop.f32.mrf.mxu0 }
0x1f0c   : > { %v5011_v47 = vadd.f32 %v5008_v45, %v4833_v33 }
0x1f0e   : > { %v5016_v49 = vsel %vm838_vm1, %v5011_v47, 0.0 }
0x1f0f   : > { %5017 = vadd.xlane.f32.xlu0 %v5016_v49 }
0x1f98   : > { %v5018_v50 = vpop.xlane.xlu0 %5017 }
0x1f99   : > { %v5019_v51 = vmul.f32 0.03125, %v5018_v50 }
0x1f9b   : > { %v5020_v52 = vsub.f32 %v5011_v47, %v5019_v51 }
0x1f9d   : > { %v5021_v53 = vmul.f32 %v5020_v52, %v5020_v52 }
0x1f9f   : > { %v5022_v54 = vsel %vm838_vm1, %v5021_v53, 0.0 }
0x1fa0   : > { %5023 = vadd.xlane.f32.xlu0 %v5022_v54 }
0x2029   : > { %v5024_v58 = vpop.xlane.xlu0 %5023 }
0x202a   : > { %v5025_v59 = vmul.f32 0.03125, %v5024_v58 }
0x202c   : > { %v5026_v61 = vadd.f32 1e-05, %v5025_v59 }
0x202e   : > { %6124 = vrsqrt.f32 %v5026_v61 }
0x203b   : > { %v6125_v62 = vpop.eup %6124 }
0x203c   : > { %v5028_v0 = vmul.f32 %v6125_v62, %v5020_v52 }
0x203e   : > { %v5035_v3 = vmul.f32 %v5443_v63, %v5028_v0 }
0x2040   : > { %v5042_v4 = vadd.f32 %v5444_v2, %v5035_v3 }
0x2042   : > { %5992 = vmatmul.mubr.msk.f32.vlgmr.msra.gmra.mxu1 %vm838_vm1, %v5042_v4 }
0x2043   : > { %6140 = shalt.err (!%p6137_p3)
}
0x2044   : > { %s6141_s28 = scalar_lea.hbm %s7264_s6, 512  ;;  %s6145_s12 = scalar_lea.hbm %s7459_s7, 1024 }
0x2045   : > { %p6142_p4 = scmp.ne.s32.totalorder %s7264_s6, %s6141_s28  ;;  %p6146_p9 = scmp.lt.s32.totalorder %s7264_s6, %s7459_s7 }
0x2046   : > { %p6147_p10 = scmp.lt.s32.totalorder %s6145_s12, %s6141_s28 }
0x2047   : > { %p6143_p7 = pnand %p6142_p4, %p6401_p5 }
0x2048   : > { %p6148_p11 = por %p6147_p10, %p6146_p9 }
0x2049   : > { %p6144_p8 = pneg %p6143_p7 }
0x204b   : > { %p6149_p12 = pnand %p6148_p11, %p6144_p8 }
0x204d   : > { %6152 = shalt.err (!%p6149_p12)
}
0x204e   : > { %s6231_s29 = smov 128   ;;  %s7460_s13 = scalar_lea.sflag [#allocation5], %s7107_s30 }
0x204f   : > { %5995 = dma.vmem_to_hbm [thread:$0]  (%p6401_p5), %s7259_s2, 512, %s7264_s6, %s7460_s13, %s6231_s29, %s6231_s29, %s7447_s22  }
0x2050   : > { %s5295_s26 = sshll.u32 %s7107_s30, 3  ;;  %s7461_s28 = sld [smem:[#allocation31_spill]] }
0x2051   : > { %s5449_s8 = sshll.u32 %s7457_s25, 7  ;;  %s798_s1 = scalar_lea.vmem [#allocation2], %s5295_s26 }
0x2052   : > { %s5151_s12 = sshll.u32 %s798_s1, 4  ;;  %s7462_s7 = sld [smem:[#allocation32_spill]]  ;;  %s5152_s12 = int_to_ptr.vmem [resolvable:$true] %s5151_s12 }
0x2053   : > { %s5133_s22 = scalar_lea.sflag [#allocation3], %s7107_s30  ;;  %s6153_s2 = scalar_lea.vmem %s5152_s12, 128 }
0x2054   : > { %p6154_p13 = scmp.ne.s32.totalorder %s5152_s12, %s6153_s2  ;;  %s6232_s25 = smov [#allocation2]  }
0x2055   : > { %s6157_s6 = sshll.u32 %s6232_s25, 4  ;;  %s6158_s6 = int_to_ptr.vmem [resolvable:$false] %s6157_s6 }
0x2056   : > { %v5445_v1 = vld [vmem:[%s7461_s28] ss:$0 sm:$0xff]  ;;  %p6155_p0 = pnand %p6154_p13, %p6401_p5  ;;  %s6159_s29 = scalar_lea.vmem %s6158_s6, 256 }
0x2057   : > { %p6160_p2 = scmp.lt.s32.totalorder %s5152_s12, %s6158_s6  ;;  %p6161_p3 = scmp.lt.s32.totalorder %s6159_s29, %s6153_s2 }
0x2058   : > { %s7298_s10 = scalar_lea.hbm %s7462_s7, %s5449_s8  ;;  %p6156_p1 = pneg %p6155_p0 }
0x2059   : > { %p6162_p4 = por %p6161_p3, %p6160_p2 }
0x205b   : > { %p6163_p7 = pnand %p6162_p4, %p6156_p1 }
0x2102   : > { %v5127_v6 = vpop.f32.mrf.mxu1 }
0x2103   : > { %v5128_v7 = vadd.f32 %v5445_v1, %v5127_v6 }
0x2104   : > { %v5993_v8 = vpop.f32.mrf.mxu1 }
0x2105   : > { %5131 = vst.msk [vmem:[%s798_s1] sm:$0xff] %vm2834_vm10, %v5128_v7 }
0x2106   : > { %6166 = shalt.err (!%p6163_p7)
}
0x2107   : > { %s6167_s5 = scalar_lea.hbm %s7298_s10, 128  ;;  %s6171_s13 = scalar_lea.hbm %s7462_s7, 256 }
0x2108   : > { %p6168_p8 = scmp.ne.s32.totalorder %s7298_s10, %s6167_s5  ;;  %p6172_p11 = scmp.lt.s32.totalorder %s7298_s10, %s7462_s7 }
0x2109   : > { %p6173_p12 = scmp.lt.s32.totalorder %s6171_s13, %s6167_s5 }
0x210a   : > { %p6169_p9 = pnand %p6168_p8, %p6401_p5 }
0x210b   : > { %p6174_p13 = por %p6173_p12, %p6172_p11 }
0x210c   : > { %p6170_p10 = pneg %p6169_p9 }
0x210e   : > { %p6175_p0 = pnand %p6174_p13, %p6170_p10 }
0x2110   : > { %6178 = shalt.err (!%p6175_p0)
}
0x2111   : > { %5994 = dma.vmem_to_hbm [thread:$0]  (%p6401_p5), %s5152_s12, 128, %s7298_s10, %s5133_s22  }
0x2112 PF: > { %s7463_s9 = sld [smem:[#allocation11_spill]] }
0x2113   : > { %s7464_s28 = sld [smem:[#allocation8_spill]] }
0x2118   : > { %p6005_p1 = scmp.ge.s32.totalorder %s7463_s9, 2 }
0x2119   : > { %s5179_s1 = sand.u32 1, %s7464_s28  }
0x211a   : > { %p5999_p2 = pnand %p6005_p1, %p6405_p6  ;;  %s5180_s2 = scalar_lea.sflag [#allocation3], %s5179_s1 }
0x211c   : > { %p6000_p3 = pneg %p5999_p2 }
0x211e   : > { %6196 = dma.done.wait (%p6000_p3), %s5180_s2, 128  }
0x211f   : > { %6198 = vsyncadd (%p6000_p3), %s5180_s2, 4294967168  ;;  %s5189_s25 = scalar_lea.sflag [#allocation5], %s5179_s1 }
0x2120   : > { %6200 = dma.done.wait (%p6000_p3), %s5189_s25, 512  }
0x2121   : > { %6202 = vsyncadd (%p6000_p3), %s5189_s25, 4294966784  ;;  %s7466_s30 = sld [smem:[#allocation13_spill]] }
0x2122   : > { %s7467_s29 = sld [smem:[#allocation9_spill]] }
0x2123   : > { %s7468_s2 = sld [smem:[#allocation10_spill]] }
0x2124   : > { %s7469_s6 = sld [smem:[#allocation14_spill]] }
0x2127   : > { %p39_p5 = scmp.ge.s32.totalorder %s7466_s30, 4  }
0x2129   :  { %41 = sbr.rel (!%p39_p5) target bundleno = 23 (0x17), region = 195 }
0x212e   :  { %5194 = vsyncpa [#allocation3], 1 }
0x212f   :  { %5196 = vsyncpa [#allocation3 + $0x1], 1 }
0x2130   :  { %5197 = vsyncpa [#allocation5], 1 }
0x2131   :  { %5199 = vsyncpa [#allocation5 + $0x1], 1 }

</bundles_post_ra>
